<compile_context>
chip_gen: v6e
topology: v6e:2x2x1
jax: 0.10.0
libtpu: 0.0.40
codegen_flags: <defaults>
</compile_context>

<pallas_src>
import jax
import jax.numpy as jnp
from jax import lax
from jax.experimental import pallas as pl
from jax.experimental.pallas import tpu as pltpu


def _vmem_spec():
    return pl.BlockSpec(memory_space=pltpu.MemorySpace.VMEM)


# ----------------------------------------------------------------------------
# Fused encoder kernel: bidirectional LSTM over the full sequence + fc/fc2 heads.
# ----------------------------------------------------------------------------
def _encoder_kernel(x_ref, wih_ref, whh_ref, b_ref,
                    fcw_ref, fcb_ref, fc2w_ref, fc2b_ref,
                    out_f_ref, out_b_ref, hid_ref, cell_ref):
    T, B, _ = x_ref.shape
    H = whh_ref.shape[-1]

    # Hoist every weight / bias load above the recurrent loop.
    # Gate order matches PyTorch: (i, f, g, o); direction 0 = forward, 1 = reverse.
    wih = tuple(tuple(wih_ref[d, g] for g in range(4)) for d in range(2))   # (E, H) blocks
    whh = tuple(tuple(whh_ref[d, g] for g in range(4)) for d in range(2))   # (H, H) blocks
    bias = tuple(tuple(b_ref[d, g] for g in range(4)) for d in range(2))    # (1, H) blocks
    fcw = (fcw_ref[0], fcw_ref[1])                                          # (H, Dd) halves
    fc2w = (fc2w_ref[0], fc2w_ref[1])
    fcb = fcb_ref[...]
    fc2b = fc2b_ref[...]

    def lstm_cell(x, h, c, d):
        # Each gate pre-activation is a full lane-aligned (B, H) tile.
        def pre(g):
            return (jnp.dot(x, wih[d][g], preferred_element_type=jnp.float32)
                    + jnp.dot(h, whh[d][g], preferred_element_type=jnp.float32)
                    + bias[d][g])
        i = jax.nn.sigmoid(pre(0))
        f = jax.nn.sigmoid(pre(1))
        g_ = jnp.tanh(pre(2))
        o = jax.nn.sigmoid(pre(3))
        c_new = f * c + i * g_
        h_new = o * jnp.tanh(c_new)
        return h_new, c_new

    zeros = jnp.zeros((B, H), jnp.float32)
    hf, cf = zeros, zeros
    hb, cb = zeros, zeros

    # Fully unrolled time loop (static T): forward consumes x[t], backward
    # consumes x[T-1-t]; both recurrent states stay resident across the sequence.
    for t in range(T):
        rt = T - 1 - t
        hf, cf = lstm_cell(x_ref[t], hf, cf, 0)
        hb, cb = lstm_cell(x_ref[rt], hb, cb, 1)
        out_f_ref[t] = hf
        out_b_ref[rt] = hb

    # Fused fc / fc2 + tanh heads on the final (forward, backward) states:
    # cat((hf, hb)) @ W  ==  hf @ W[:H] + hb @ W[H:]
    hid_ref[...] = jnp.tanh(
        jnp.dot(hf, fcw[0], preferred_element_type=jnp.float32)
        + jnp.dot(hb, fcw[1], preferred_element_type=jnp.float32)
        + fcb)
    cell_ref[...] = jnp.tanh(
        jnp.dot(cf, fc2w[0], preferred_element_type=jnp.float32)
        + jnp.dot(cb, fc2w[1], preferred_element_type=jnp.float32)
        + fc2b)


@jax.jit
def encoder_forward(src, params):
    """src: (T, B, emb_dim) time-major, as in nn.LSTM defaults."""
    T, B, _ = src.shape
    H = params["whh"].shape[-1]
    Dd = params["fc_w"].shape[-1]
    out_shape = (
        jax.ShapeDtypeStruct((T, B, H), jnp.float32),   # forward-direction outputs
        jax.ShapeDtypeStruct((T, B, H), jnp.float32),   # backward-direction outputs
        jax.ShapeDtypeStruct((B, Dd), jnp.float32),     # hidden head
        jax.ShapeDtypeStruct((B, Dd), jnp.float32),     # cell head
    )
    out_f, out_b, hidden, cell = pl.pallas_call(
        _encoder_kernel,
        out_shape=out_shape,
        in_specs=[_vmem_spec() for _ in range(8)],
        out_specs=tuple(_vmem_spec() for _ in range(4)),
    )(src, params["wih"], params["whh"], params["b"],
      params["fc_w"], params["fc_b"], params["fc2_w"], params["fc2_b"])
    # outputs layout matches PyTorch bidirectional LSTM: [..., :H]=fwd, [..., H:]=bwd
    outputs = jnp.concatenate([out_f, out_b], axis=-1)
    return outputs, hidden, cell


# ----------------------------------------------------------------------------
# Pure-JAX reference (same math, HIGHEST-precision dots) for a correctness check.
# ----------------------------------------------------------------------------
def encoder_reference(src, params):
    T, B, _ = src.shape
    H = params["whh"].shape[-1]
    hp = lax.Precision.HIGHEST

    def cell_step(x, h, c, d):
        pre = [jnp.dot(x, params["wih"][d, g], precision=hp)
               + jnp.dot(h, params["whh"][d, g], precision=hp)
               + params["b"][d, g] for g in range(4)]
        i = jax.nn.sigmoid(pre[0])
        f = jax.nn.sigmoid(pre[1])
        g_ = jnp.tanh(pre[2])
        o = jax.nn.sigmoid(pre[3])
        c_new = f * c + i * g_
        return o * jnp.tanh(c_new), c_new

    hf = cf = hb = cb = jnp.zeros((B, H), jnp.float32)
    outs_f = [None] * T
    outs_b = [None] * T
    for t in range(T):
        hf, cf = cell_step(src[t], hf, cf, 0)
        outs_f[t] = hf
    for t in range(T - 1, -1, -1):
        hb, cb = cell_step(src[t], hb, cb, 1)
        outs_b[t] = hb
    outputs = jnp.concatenate([jnp.stack(outs_f), jnp.stack(outs_b)], axis=-1)
    hidden = jnp.tanh(jnp.dot(hf, params["fc_w"][0], precision=hp)
                      + jnp.dot(hb, params["fc_w"][1], precision=hp) + params["fc_b"])
    cell = jnp.tanh(jnp.dot(cf, params["fc2_w"][0], precision=hp)
                    + jnp.dot(cb, params["fc2_w"][1], precision=hp) + params["fc2_b"])
    return outputs, hidden, cell


# ----------------------------------------------------------------------------
# Parameter init. Layout (equivalent to PyTorch nn.LSTM / nn.Linear weights):
#   wih  : (2, 4, E, H)   = weight_ih_l0{,_reverse} split per gate, transposed
#   whh  : (2, 4, H, H)   = weight_hh_l0{,_reverse} split per gate, transposed
#   b    : (2, 4, 1, H)   = b_ih + b_hh (summed), split per gate
#   fc_w : (2, H, Dd)     = fc.weight.T split into [forward-half; backward-half]
#   fc_b : (1, Dd)
# ----------------------------------------------------------------------------
def init_params(key, emb_dim, enc_hid_dim, dec_hid_dim):
    ks = jax.random.split(key, 7)
    u = lambda k, shape: jax.random.uniform(k, shape, jnp.float32, -0.1, 0.1)
    return {
        "wih":   u(ks[0], (2, 4, emb_dim, enc_hid_dim)),
        "whh":   u(ks[1], (2, 4, enc_hid_dim, enc_hid_dim)),
        "b":     u(ks[2], (2, 4, 1, enc_hid_dim)),
        "fc_w":  u(ks[3], (2, enc_hid_dim, dec_hid_dim)),
        "fc_b":  u(ks[4], (1, dec_hid_dim)),
        "fc2_w": u(ks[5], (2, enc_hid_dim, dec_hid_dim)),
        "fc2_b": u(ks[6], (1, dec_hid_dim)),
    }


if __name__ == "__main__":
    T = 8            # sequence length
    B = 8            # batch (multiple of 8 f32 sublanes)
    emb_dim = 16
    enc_hid_dim = 32
    dec_hid_dim = 32

    key = jax.random.PRNGKey(0)
    k_src, k_par = jax.random.split(key)
    src = jax.random.normal(k_src, (T, B, emb_dim), jnp.float32)
    params = init_params(k_par, emb_dim, enc_hid_dim, dec_hid_dim)

    outputs, hidden, cell = encoder_forward(src, params)
    jax.block_until_ready((outputs, hidden, cell))

    assert outputs.shape == (T, B, 2 * enc_hid_dim)
    assert hidden.shape == (B, dec_hid_dim)
    assert cell.shape == (B, dec_hid_dim)

    ref_out, ref_hid, ref_cell = encoder_reference(src, params)
    for got, ref in ((outputs, ref_out), (hidden, ref_hid), (cell, ref_cell)):
        err = float(jnp.max(jnp.abs(got - ref)))
        assert err < 1e-3, f"kernel/reference mismatch: max abs err = {err}"

    print("KERNEL_OK")
</pallas_src>

<mosaic_0001>
module attributes {stable_mosaic.version = 11 : i64} {
  func.func @_encoder_kernel(%arg0: memref<8x8x16xf32, #tpu.memory_space<vmem>>, %arg1: memref<2x4x16x32xf32, #tpu.memory_space<vmem>>, %arg2: memref<2x4x32x32xf32, #tpu.memory_space<vmem>>, %arg3: memref<2x4x1x32xf32, #tpu.memory_space<vmem>>, %arg4: memref<2x32x32xf32, #tpu.memory_space<vmem>>, %arg5: memref<1x32xf32, #tpu.memory_space<vmem>>, %arg6: memref<2x32x32xf32, #tpu.memory_space<vmem>>, %arg7: memref<1x32xf32, #tpu.memory_space<vmem>>, %arg8: memref<8x8x32xf32, #tpu.memory_space<vmem>>, %arg9: memref<8x8x32xf32, #tpu.memory_space<vmem>>, %arg10: memref<8x32xf32, #tpu.memory_space<vmem>>, %arg11: memref<8x32xf32, #tpu.memory_space<vmem>>) attributes {dimension_semantics = [], scalar_prefetch = 0 : i64, scratch_operands = 0 : i64, tpu.core_type = #tpu.core_type<tc>} {
    %c0 = arith.constant 0 : index
    %c0_0 = arith.constant 0 : index
    %c0_1 = arith.constant 0 : index
    %c0_2 = arith.constant 0 : index
    %0 = vector.load %arg1[%c0, %c0_0, %c0_1, %c0_2] : memref<2x4x16x32xf32, #tpu.memory_space<vmem>>, vector<1x1x16x32xf32>
    %1 = vector.shape_cast %0 : vector<1x1x16x32xf32> to vector<16x32xf32>
    %c0_3 = arith.constant 0 : index
    %c1 = arith.constant 1 : index
    %c0_4 = arith.constant 0 : index
    %c0_5 = arith.constant 0 : index
    %2 = vector.load %arg1[%c0_3, %c1, %c0_4, %c0_5] : memref<2x4x16x32xf32, #tpu.memory_space<vmem>>, vector<1x1x16x32xf32>
    %3 = vector.shape_cast %2 : vector<1x1x16x32xf32> to vector<16x32xf32>
    %c0_6 = arith.constant 0 : index
    %c2 = arith.constant 2 : index
    %c0_7 = arith.constant 0 : index
    %c0_8 = arith.constant 0 : index
    %4 = vector.load %arg1[%c0_6, %c2, %c0_7, %c0_8] : memref<2x4x16x32xf32, #tpu.memory_space<vmem>>, vector<1x1x16x32xf32>
    %5 = vector.shape_cast %4 : vector<1x1x16x32xf32> to vector<16x32xf32>
    %c0_9 = arith.constant 0 : index
    %c3 = arith.constant 3 : index
    %c0_10 = arith.constant 0 : index
    %c0_11 = arith.constant 0 : index
    %6 = vector.load %arg1[%c0_9, %c3, %c0_10, %c0_11] : memref<2x4x16x32xf32, #tpu.memory_space<vmem>>, vector<1x1x16x32xf32>
    %7 = vector.shape_cast %6 : vector<1x1x16x32xf32> to vector<16x32xf32>
    %c1_12 = arith.constant 1 : index
    %c0_13 = arith.constant 0 : index
    %c0_14 = arith.constant 0 : index
    %c0_15 = arith.constant 0 : index
    %8 = vector.load %arg1[%c1_12, %c0_13, %c0_14, %c0_15] : memref<2x4x16x32xf32, #tpu.memory_space<vmem>>, vector<1x1x16x32xf32>
    %9 = vector.shape_cast %8 : vector<1x1x16x32xf32> to vector<16x32xf32>
    %c1_16 = arith.constant 1 : index
    %c1_17 = arith.constant 1 : index
    %c0_18 = arith.constant 0 : index
    %c0_19 = arith.constant 0 : index
    %10 = vector.load %arg1[%c1_16, %c1_17, %c0_18, %c0_19] : memref<2x4x16x32xf32, #tpu.memory_space<vmem>>, vector<1x1x16x32xf32>
    %11 = vector.shape_cast %10 : vector<1x1x16x32xf32> to vector<16x32xf32>
    %c1_20 = arith.constant 1 : index
    %c2_21 = arith.constant 2 : index
    %c0_22 = arith.constant 0 : index
    %c0_23 = arith.constant 0 : index
    %12 = vector.load %arg1[%c1_20, %c2_21, %c0_22, %c0_23] : memref<2x4x16x32xf32, #tpu.memory_space<vmem>>, vector<1x1x16x32xf32>
    %13 = vector.shape_cast %12 : vector<1x1x16x32xf32> to vector<16x32xf32>
    %c1_24 = arith.constant 1 : index
    %c3_25 = arith.constant 3 : index
    %c0_26 = arith.constant 0 : index
    %c0_27 = arith.constant 0 : index
    %14 = vector.load %arg1[%c1_24, %c3_25, %c0_26, %c0_27] : memref<2x4x16x32xf32, #tpu.memory_space<vmem>>, vector<1x1x16x32xf32>
    %15 = vector.shape_cast %14 : vector<1x1x16x32xf32> to vector<16x32xf32>
    %c0_28 = arith.constant 0 : index
    %c0_29 = arith.constant 0 : index
    %c0_30 = arith.constant 0 : index
    %c0_31 = arith.constant 0 : index
    %16 = vector.load %arg2[%c0_28, %c0_29, %c0_30, %c0_31] : memref<2x4x32x32xf32, #tpu.memory_space<vmem>>, vector<1x1x32x32xf32>
    %17 = vector.shape_cast %16 : vector<1x1x32x32xf32> to vector<32x32xf32>
    %c0_32 = arith.constant 0 : index
    %c1_33 = arith.constant 1 : index
    %c0_34 = arith.constant 0 : index
    %c0_35 = arith.constant 0 : index
    %18 = vector.load %arg2[%c0_32, %c1_33, %c0_34, %c0_35] : memref<2x4x32x32xf32, #tpu.memory_space<vmem>>, vector<1x1x32x32xf32>
    %19 = vector.shape_cast %18 : vector<1x1x32x32xf32> to vector<32x32xf32>
    %c0_36 = arith.constant 0 : index
    %c2_37 = arith.constant 2 : index
    %c0_38 = arith.constant 0 : index
    %c0_39 = arith.constant 0 : index
    %20 = vector.load %arg2[%c0_36, %c2_37, %c0_38, %c0_39] : memref<2x4x32x32xf32, #tpu.memory_space<vmem>>, vector<1x1x32x32xf32>
    %21 = vector.shape_cast %20 : vector<1x1x32x32xf32> to vector<32x32xf32>
    %c0_40 = arith.constant 0 : index
    %c3_41 = arith.constant 3 : index
    %c0_42 = arith.constant 0 : index
    %c0_43 = arith.constant 0 : index
    %22 = vector.load %arg2[%c0_40, %c3_41, %c0_42, %c0_43] : memref<2x4x32x32xf32, #tpu.memory_space<vmem>>, vector<1x1x32x32xf32>
    %23 = vector.shape_cast %22 : vector<1x1x32x32xf32> to vector<32x32xf32>
    %c1_44 = arith.constant 1 : index
    %c0_45 = arith.constant 0 : index
    %c0_46 = arith.constant 0 : index
    %c0_47 = arith.constant 0 : index
    %24 = vector.load %arg2[%c1_44, %c0_45, %c0_46, %c0_47] : memref<2x4x32x32xf32, #tpu.memory_space<vmem>>, vector<1x1x32x32xf32>
    %25 = vector.shape_cast %24 : vector<1x1x32x32xf32> to vector<32x32xf32>
    %c1_48 = arith.constant 1 : index
    %c1_49 = arith.constant 1 : index
    %c0_50 = arith.constant 0 : index
    %c0_51 = arith.constant 0 : index
    %26 = vector.load %arg2[%c1_48, %c1_49, %c0_50, %c0_51] : memref<2x4x32x32xf32, #tpu.memory_space<vmem>>, vector<1x1x32x32xf32>
    %27 = vector.shape_cast %26 : vector<1x1x32x32xf32> to vector<32x32xf32>
    %c1_52 = arith.constant 1 : index
    %c2_53 = arith.constant 2 : index
    %c0_54 = arith.constant 0 : index
    %c0_55 = arith.constant 0 : index
    %28 = vector.load %arg2[%c1_52, %c2_53, %c0_54, %c0_55] : memref<2x4x32x32xf32, #tpu.memory_space<vmem>>, vector<1x1x32x32xf32>
    %29 = vector.shape_cast %28 : vector<1x1x32x32xf32> to vector<32x32xf32>
    %c1_56 = arith.constant 1 : index
    %c3_57 = arith.constant 3 : index
    %c0_58 = arith.constant 0 : index
    %c0_59 = arith.constant 0 : index
    %30 = vector.load %arg2[%c1_56, %c3_57, %c0_58, %c0_59] : memref<2x4x32x32xf32, #tpu.memory_space<vmem>>, vector<1x1x32x32xf32>
    %31 = vector.shape_cast %30 : vector<1x1x32x32xf32> to vector<32x32xf32>
    %c0_60 = arith.constant 0 : index
    %c0_61 = arith.constant 0 : index
    %c0_62 = arith.constant 0 : index
    %c0_63 = arith.constant 0 : index
    %32 = vector.load %arg3[%c0_60, %c0_61, %c0_62, %c0_63] : memref<2x4x1x32xf32, #tpu.memory_space<vmem>>, vector<1x1x1x32xf32>
    %33 = vector.shape_cast %32 : vector<1x1x1x32xf32> to vector<1x32xf32>
    %c0_64 = arith.constant 0 : index
    %c1_65 = arith.constant 1 : index
    %c0_66 = arith.constant 0 : index
    %c0_67 = arith.constant 0 : index
    %34 = vector.load %arg3[%c0_64, %c1_65, %c0_66, %c0_67] : memref<2x4x1x32xf32, #tpu.memory_space<vmem>>, vector<1x1x1x32xf32>
    %35 = vector.shape_cast %34 : vector<1x1x1x32xf32> to vector<1x32xf32>
    %c0_68 = arith.constant 0 : index
    %c2_69 = arith.constant 2 : index
    %c0_70 = arith.constant 0 : index
    %c0_71 = arith.constant 0 : index
    %36 = vector.load %arg3[%c0_68, %c2_69, %c0_70, %c0_71] : memref<2x4x1x32xf32, #tpu.memory_space<vmem>>, vector<1x1x1x32xf32>
    %37 = vector.shape_cast %36 : vector<1x1x1x32xf32> to vector<1x32xf32>
    %c0_72 = arith.constant 0 : index
    %c3_73 = arith.constant 3 : index
    %c0_74 = arith.constant 0 : index
    %c0_75 = arith.constant 0 : index
    %38 = vector.load %arg3[%c0_72, %c3_73, %c0_74, %c0_75] : memref<2x4x1x32xf32, #tpu.memory_space<vmem>>, vector<1x1x1x32xf32>
    %39 = vector.shape_cast %38 : vector<1x1x1x32xf32> to vector<1x32xf32>
    %c1_76 = arith.constant 1 : index
    %c0_77 = arith.constant 0 : index
    %c0_78 = arith.constant 0 : index
    %c0_79 = arith.constant 0 : index
    %40 = vector.load %arg3[%c1_76, %c0_77, %c0_78, %c0_79] : memref<2x4x1x32xf32, #tpu.memory_space<vmem>>, vector<1x1x1x32xf32>
    %41 = vector.shape_cast %40 : vector<1x1x1x32xf32> to vector<1x32xf32>
    %c1_80 = arith.constant 1 : index
    %c1_81 = arith.constant 1 : index
    %c0_82 = arith.constant 0 : index
    %c0_83 = arith.constant 0 : index
    %42 = vector.load %arg3[%c1_80, %c1_81, %c0_82, %c0_83] : memref<2x4x1x32xf32, #tpu.memory_space<vmem>>, vector<1x1x1x32xf32>
    %43 = vector.shape_cast %42 : vector<1x1x1x32xf32> to vector<1x32xf32>
    %c1_84 = arith.constant 1 : index
    %c2_85 = arith.constant 2 : index
    %c0_86 = arith.constant 0 : index
    %c0_87 = arith.constant 0 : index
    %44 = vector.load %arg3[%c1_84, %c2_85, %c0_86, %c0_87] : memref<2x4x1x32xf32, #tpu.memory_space<vmem>>, vector<1x1x1x32xf32>
    %45 = vector.shape_cast %44 : vector<1x1x1x32xf32> to vector<1x32xf32>
    %c1_88 = arith.constant 1 : index
    %c3_89 = arith.constant 3 : index
    %c0_90 = arith.constant 0 : index
    %c0_91 = arith.constant 0 : index
    %46 = vector.load %arg3[%c1_88, %c3_89, %c0_90, %c0_91] : memref<2x4x1x32xf32, #tpu.memory_space<vmem>>, vector<1x1x1x32xf32>
    %47 = vector.shape_cast %46 : vector<1x1x1x32xf32> to vector<1x32xf32>
    %c0_92 = arith.constant 0 : index
    %c0_93 = arith.constant 0 : index
    %c0_94 = arith.constant 0 : index
    %48 = vector.load %arg4[%c0_92, %c0_93, %c0_94] : memref<2x32x32xf32, #tpu.memory_space<vmem>>, vector<1x32x32xf32>
    %49 = vector.shape_cast %48 : vector<1x32x32xf32> to vector<32x32xf32>
    %c1_95 = arith.constant 1 : index
    %c0_96 = arith.constant 0 : index
    %c0_97 = arith.constant 0 : index
    %50 = vector.load %arg4[%c1_95, %c0_96, %c0_97] : memref<2x32x32xf32, #tpu.memory_space<vmem>>, vector<1x32x32xf32>
    %51 = vector.shape_cast %50 : vector<1x32x32xf32> to vector<32x32xf32>
    %c0_98 = arith.constant 0 : index
    %c0_99 = arith.constant 0 : index
    %c0_100 = arith.constant 0 : index
    %52 = vector.load %arg6[%c0_98, %c0_99, %c0_100] : memref<2x32x32xf32, #tpu.memory_space<vmem>>, vector<1x32x32xf32>
    %53 = vector.shape_cast %52 : vector<1x32x32xf32> to vector<32x32xf32>
    %c1_101 = arith.constant 1 : index
    %c0_102 = arith.constant 0 : index
    %c0_103 = arith.constant 0 : index
    %54 = vector.load %arg6[%c1_101, %c0_102, %c0_103] : memref<2x32x32xf32, #tpu.memory_space<vmem>>, vector<1x32x32xf32>
    %55 = vector.shape_cast %54 : vector<1x32x32xf32> to vector<32x32xf32>
    %c0_104 = arith.constant 0 : index
    %c0_105 = arith.constant 0 : index
    %56 = vector.load %arg5[%c0_104, %c0_105] : memref<1x32xf32, #tpu.memory_space<vmem>>, vector<1x32xf32>
    %c0_106 = arith.constant 0 : index
    %c0_107 = arith.constant 0 : index
    %57 = vector.load %arg7[%c0_106, %c0_107] : memref<1x32xf32, #tpu.memory_space<vmem>>, vector<1x32xf32>
    %cst = arith.constant 0.000000e+00 : f32
    %58 = vector.broadcast %cst : f32 to vector<8x32xf32>
    %c0_108 = arith.constant 0 : index
    %c0_109 = arith.constant 0 : index
    %c0_110 = arith.constant 0 : index
    %59 = vector.load %arg0[%c0_108, %c0_109, %c0_110] : memref<8x8x16xf32, #tpu.memory_space<vmem>>, vector<1x8x16xf32>
    %60 = vector.shape_cast %59 : vector<1x8x16xf32> to vector<8x16xf32>
    %cst_111 = arith.constant dense<0.000000e+00> : vector<8x32xf32>
    %61 = tpu.matmul %60, %1, %cst_111 {dimension_numbers = #tpu.dot_dimension_numbers<[1], [0], [0], [1], [0, 0, 1, 1], [], []>} : vector<8x16xf32>, vector<16x32xf32>, vector<8x32xf32> -> vector<8x32xf32>
    %cst_112 = arith.constant dense<0.000000e+00> : vector<8x32xf32>
    %62 = tpu.matmul %58, %17, %cst_112 {dimension_numbers = #tpu.dot_dimension_numbers<[1], [0], [0], [1], [0, 0, 1, 1], [], []>} : vector<8x32xf32>, vector<32x32xf32>, vector<8x32xf32> -> vector<8x32xf32>
    %63 = arith.addf %61, %62 : vector<8x32xf32>
    %64 = vector.broadcast %33 : vector<1x32xf32> to vector<8x32xf32>
    %65 = arith.addf %63, %64 : vector<8x32xf32>
    %66 = arith.negf %65 : vector<8x32xf32>
    %67 = math.exp %66 : vector<8x32xf32>
    %cst_113 = arith.constant 1.000000e+00 : f32
    %68 = vector.broadcast %cst_113 : f32 to vector<8x32xf32>
    %69 = arith.addf %68, %67 : vector<8x32xf32>
    %70 = arith.divf %68, %69 : vector<8x32xf32>
    %cst_114 = arith.constant dense<0.000000e+00> : vector<8x32xf32>
    %71 = tpu.matmul %60, %3, %cst_114 {dimension_numbers = #tpu.dot_dimension_numbers<[1], [0], [0], [1], [0, 0, 1, 1], [], []>} : vector<8x16xf32>, vector<16x32xf32>, vector<8x32xf32> -> vector<8x32xf32>
    %cst_115 = arith.constant dense<0.000000e+00> : vector<8x32xf32>
    %72 = tpu.matmul %58, %19, %cst_115 {dimension_numbers = #tpu.dot_dimension_numbers<[1], [0], [0], [1], [0, 0, 1, 1], [], []>} : vector<8x32xf32>, vector<32x32xf32>, vector<8x32xf32> -> vector<8x32xf32>
    %73 = arith.addf %71, %72 : vector<8x32xf32>
    %74 = vector.broadcast %35 : vector<1x32xf32> to vector<8x32xf32>
    %75 = arith.addf %73, %74 : vector<8x32xf32>
    %76 = arith.negf %75 : vector<8x32xf32>
    %77 = math.exp %76 : vector<8x32xf32>
    %cst_116 = arith.constant 1.000000e+00 : f32
    %78 = vector.broadcast %cst_116 : f32 to vector<8x32xf32>
    %79 = arith.addf %78, %77 : vector<8x32xf32>
    %80 = arith.divf %78, %79 : vector<8x32xf32>
    %cst_117 = arith.constant dense<0.000000e+00> : vector<8x32xf32>
    %81 = tpu.matmul %60, %5, %cst_117 {dimension_numbers = #tpu.dot_dimension_numbers<[1], [0], [0], [1], [0, 0, 1, 1], [], []>} : vector<8x16xf32>, vector<16x32xf32>, vector<8x32xf32> -> vector<8x32xf32>
    %cst_118 = arith.constant dense<0.000000e+00> : vector<8x32xf32>
    %82 = tpu.matmul %58, %21, %cst_118 {dimension_numbers = #tpu.dot_dimension_numbers<[1], [0], [0], [1], [0, 0, 1, 1], [], []>} : vector<8x32xf32>, vector<32x32xf32>, vector<8x32xf32> -> vector<8x32xf32>
    %83 = arith.addf %81, %82 : vector<8x32xf32>
    %84 = vector.broadcast %37 : vector<1x32xf32> to vector<8x32xf32>
    %85 = arith.addf %83, %84 : vector<8x32xf32>
    %86 = math.tanh %85 : vector<8x32xf32>
    %cst_119 = arith.constant dense<0.000000e+00> : vector<8x32xf32>
    %87 = tpu.matmul %60, %7, %cst_119 {dimension_numbers = #tpu.dot_dimension_numbers<[1], [0], [0], [1], [0, 0, 1, 1], [], []>} : vector<8x16xf32>, vector<16x32xf32>, vector<8x32xf32> -> vector<8x32xf32>
    %cst_120 = arith.constant dense<0.000000e+00> : vector<8x32xf32>
    %88 = tpu.matmul %58, %23, %cst_120 {dimension_numbers = #tpu.dot_dimension_numbers<[1], [0], [0], [1], [0, 0, 1, 1], [], []>} : vector<8x32xf32>, vector<32x32xf32>, vector<8x32xf32> -> vector<8x32xf32>
    %89 = arith.addf %87, %88 : vector<8x32xf32>
    %90 = vector.broadcast %39 : vector<1x32xf32> to vector<8x32xf32>
    %91 = arith.addf %89, %90 : vector<8x32xf32>
    %92 = arith.negf %91 : vector<8x32xf32>
    %93 = math.exp %92 : vector<8x32xf32>
    %cst_121 = arith.constant 1.000000e+00 : f32
    %94 = vector.broadcast %cst_121 : f32 to vector<8x32xf32>
    %95 = arith.addf %94, %93 : vector<8x32xf32>
    %96 = arith.divf %94, %95 : vector<8x32xf32>
    %97 = arith.mulf %80, %58 : vector<8x32xf32>
    %98 = arith.mulf %70, %86 : vector<8x32xf32>
    %99 = arith.addf %97, %98 : vector<8x32xf32>
    %100 = math.tanh %99 : vector<8x32xf32>
    %101 = arith.mulf %96, %100 : vector<8x32xf32>
    %c7 = arith.constant 7 : index
    %c0_122 = arith.constant 0 : index
    %c0_123 = arith.constant 0 : index
    %102 = vector.load %arg0[%c7, %c0_122, %c0_123] : memref<8x8x16xf32, #tpu.memory_space<vmem>>, vector<1x8x16xf32>
    %103 = vector.shape_cast %102 : vector<1x8x16xf32> to vector<8x16xf32>
    %cst_124 = arith.constant dense<0.000000e+00> : vector<8x32xf32>
    %104 = tpu.matmul %103, %9, %cst_124 {dimension_numbers = #tpu.dot_dimension_numbers<[1], [0], [0], [1], [0, 0, 1, 1], [], []>} : vector<8x16xf32>, vector<16x32xf32>, vector<8x32xf32> -> vector<8x32xf32>
    %cst_125 = arith.constant dense<0.000000e+00> : vector<8x32xf32>
    %105 = tpu.matmul %58, %25, %cst_125 {dimension_numbers = #tpu.dot_dimension_numbers<[1], [0], [0], [1], [0, 0, 1, 1], [], []>} : vector<8x32xf32>, vector<32x32xf32>, vector<8x32xf32> -> vector<8x32xf32>
    %106 = arith.addf %104, %105 : vector<8x32xf32>
    %107 = vector.broadcast %41 : vector<1x32xf32> to vector<8x32xf32>
    %108 = arith.addf %106, %107 : vector<8x32xf32>
    %109 = arith.negf %108 : vector<8x32xf32>
    %110 = math.exp %109 : vector<8x32xf32>
    %cst_126 = arith.constant 1.000000e+00 : f32
    %111 = vector.broadcast %cst_126 : f32 to vector<8x32xf32>
    %112 = arith.addf %111, %110 : vector<8x32xf32>
    %113 = arith.divf %111, %112 : vector<8x32xf32>
    %cst_127 = arith.constant dense<0.000000e+00> : vector<8x32xf32>
    %114 = tpu.matmul %103, %11, %cst_127 {dimension_numbers = #tpu.dot_dimension_numbers<[1], [0], [0], [1], [0, 0, 1, 1], [], []>} : vector<8x16xf32>, vector<16x32xf32>, vector<8x32xf32> -> vector<8x32xf32>
    %cst_128 = arith.constant dense<0.000000e+00> : vector<8x32xf32>
    %115 = tpu.matmul %58, %27, %cst_128 {dimension_numbers = #tpu.dot_dimension_numbers<[1], [0], [0], [1], [0, 0, 1, 1], [], []>} : vector<8x32xf32>, vector<32x32xf32>, vector<8x32xf32> -> vector<8x32xf32>
    %116 = arith.addf %114, %115 : vector<8x32xf32>
    %117 = vector.broadcast %43 : vector<1x32xf32> to vector<8x32xf32>
    %118 = arith.addf %116, %117 : vector<8x32xf32>
    %119 = arith.negf %118 : vector<8x32xf32>
    %120 = math.exp %119 : vector<8x32xf32>
    %cst_129 = arith.constant 1.000000e+00 : f32
    %121 = vector.broadcast %cst_129 : f32 to vector<8x32xf32>
    %122 = arith.addf %121, %120 : vector<8x32xf32>
    %123 = arith.divf %121, %122 : vector<8x32xf32>
    %cst_130 = arith.constant dense<0.000000e+00> : vector<8x32xf32>
    %124 = tpu.matmul %103, %13, %cst_130 {dimension_numbers = #tpu.dot_dimension_numbers<[1], [0], [0], [1], [0, 0, 1, 1], [], []>} : vector<8x16xf32>, vector<16x32xf32>, vector<8x32xf32> -> vector<8x32xf32>
    %cst_131 = arith.constant dense<0.000000e+00> : vector<8x32xf32>
    %125 = tpu.matmul %58, %29, %cst_131 {dimension_numbers = #tpu.dot_dimension_numbers<[1], [0], [0], [1], [0, 0, 1, 1], [], []>} : vector<8x32xf32>, vector<32x32xf32>, vector<8x32xf32> -> vector<8x32xf32>
    %126 = arith.addf %124, %125 : vector<8x32xf32>
    %127 = vector.broadcast %45 : vector<1x32xf32> to vector<8x32xf32>
    %128 = arith.addf %126, %127 : vector<8x32xf32>
    %129 = math.tanh %128 : vector<8x32xf32>
    %cst_132 = arith.constant dense<0.000000e+00> : vector<8x32xf32>
    %130 = tpu.matmul %103, %15, %cst_132 {dimension_numbers = #tpu.dot_dimension_numbers<[1], [0], [0], [1], [0, 0, 1, 1], [], []>} : vector<8x16xf32>, vector<16x32xf32>, vector<8x32xf32> -> vector<8x32xf32>
    %cst_133 = arith.constant dense<0.000000e+00> : vector<8x32xf32>
    %131 = tpu.matmul %58, %31, %cst_133 {dimension_numbers = #tpu.dot_dimension_numbers<[1], [0], [0], [1], [0, 0, 1, 1], [], []>} : vector<8x32xf32>, vector<32x32xf32>, vector<8x32xf32> -> vector<8x32xf32>
    %132 = arith.addf %130, %131 : vector<8x32xf32>
    %133 = vector.broadcast %47 : vector<1x32xf32> to vector<8x32xf32>
    %134 = arith.addf %132, %133 : vector<8x32xf32>
    %135 = arith.negf %134 : vector<8x32xf32>
    %136 = math.exp %135 : vector<8x32xf32>
    %cst_134 = arith.constant 1.000000e+00 : f32
    %137 = vector.broadcast %cst_134 : f32 to vector<8x32xf32>
    %138 = arith.addf %137, %136 : vector<8x32xf32>
    %139 = arith.divf %137, %138 : vector<8x32xf32>
    %140 = arith.mulf %123, %58 : vector<8x32xf32>
    %141 = arith.mulf %113, %129 : vector<8x32xf32>
    %142 = arith.addf %140, %141 : vector<8x32xf32>
    %143 = math.tanh %142 : vector<8x32xf32>
    %144 = arith.mulf %139, %143 : vector<8x32xf32>
    %c0_135 = arith.constant 0 : index
    %c0_136 = arith.constant 0 : index
    %c0_137 = arith.constant 0 : index
    %145 = vector.load %arg8[%c0_135, %c0_136, %c0_137] : memref<8x8x32xf32, #tpu.memory_space<vmem>>, vector<1x8x32xf32>
    %146 = vector.shape_cast %145 : vector<1x8x32xf32> to vector<8x32xf32>
    %147 = vector.shape_cast %101 : vector<8x32xf32> to vector<1x8x32xf32>
    tpu.vector_store %arg8[%c0_135, %c0_136, %c0_137], %147 {strides = array<i32>} : memref<8x8x32xf32, #tpu.memory_space<vmem>>, vector<1x8x32xf32>,
    %c7_138 = arith.constant 7 : index
    %c0_139 = arith.constant 0 : index
    %c0_140 = arith.constant 0 : index
    %148 = vector.load %arg9[%c7_138, %c0_139, %c0_140] : memref<8x8x32xf32, #tpu.memory_space<vmem>>, vector<1x8x32xf32>
    %149 = vector.shape_cast %148 : vector<1x8x32xf32> to vector<8x32xf32>
    %150 = vector.shape_cast %144 : vector<8x32xf32> to vector<1x8x32xf32>
    tpu.vector_store %arg9[%c7_138, %c0_139, %c0_140], %150 {strides = array<i32>} : memref<8x8x32xf32, #tpu.memory_space<vmem>>, vector<1x8x32xf32>,
    %c1_141 = arith.constant 1 : index
    %c0_142 = arith.constant 0 : index
    %c0_143 = arith.constant 0 : index
    %151 = vector.load %arg0[%c1_141, %c0_142, %c0_143] : memref<8x8x16xf32, #tpu.memory_space<vmem>>, vector<1x8x16xf32>
    %152 = vector.shape_cast %151 : vector<1x8x16xf32> to vector<8x16xf32>
    %cst_144 = arith.constant dense<0.000000e+00> : vector<8x32xf32>
    %153 = tpu.matmul %152, %1, %cst_144 {dimension_numbers = #tpu.dot_dimension_numbers<[1], [0], [0], [1], [0, 0, 1, 1], [], []>} : vector<8x16xf32>, vector<16x32xf32>, vector<8x32xf32> -> vector<8x32xf32>
    %cst_145 = arith.constant dense<0.000000e+00> : vector<8x32xf32>
    %154 = tpu.matmul %101, %17, %cst_145 {dimension_numbers = #tpu.dot_dimension_numbers<[1], [0], [0], [1], [0, 0, 1, 1], [], []>} : vector<8x32xf32>, vector<32x32xf32>, vector<8x32xf32> -> vector<8x32xf32>
    %155 = arith.addf %153, %154 : vector<8x32xf32>
    %156 = vector.broadcast %33 : vector<1x32xf32> to vector<8x32xf32>
    %157 = arith.addf %155, %156 : vector<8x32xf32>
    %158 = arith.negf %157 : vector<8x32xf32>
    %159 = math.exp %158 : vector<8x32xf32>
    %cst_146 = arith.constant 1.000000e+00 : f32
    %160 = vector.broadcast %cst_146 : f32 to vector<8x32xf32>
    %161 = arith.addf %160, %159 : vector<8x32xf32>
    %162 = arith.divf %160, %161 : vector<8x32xf32>
    %cst_147 = arith.constant dense<0.000000e+00> : vector<8x32xf32>
    %163 = tpu.matmul %152, %3, %cst_147 {dimension_numbers = #tpu.dot_dimension_numbers<[1], [0], [0], [1], [0, 0, 1, 1], [], []>} : vector<8x16xf32>, vector<16x32xf32>, vector<8x32xf32> -> vector<8x32xf32>
    %cst_148 = arith.constant dense<0.000000e+00> : vector<8x32xf32>
    %164 = tpu.matmul %101, %19, %cst_148 {dimension_numbers = #tpu.dot_dimension_numbers<[1], [0], [0], [1], [0, 0, 1, 1], [], []>} : vector<8x32xf32>, vector<32x32xf32>, vector<8x32xf32> -> vector<8x32xf32>
    %165 = arith.addf %163, %164 : vector<8x32xf32>
    %166 = vector.broadcast %35 : vector<1x32xf32> to vector<8x32xf32>
    %167 = arith.addf %165, %166 : vector<8x32xf32>
    %168 = arith.negf %167 : vector<8x32xf32>
    %169 = math.exp %168 : vector<8x32xf32>
    %cst_149 = arith.constant 1.000000e+00 : f32
    %170 = vector.broadcast %cst_149 : f32 to vector<8x32xf32>
    %171 = arith.addf %170, %169 : vector<8x32xf32>
    %172 = arith.divf %170, %171 : vector<8x32xf32>
    %cst_150 = arith.constant dense<0.000000e+00> : vector<8x32xf32>
    %173 = tpu.matmul %152, %5, %cst_150 {dimension_numbers = #tpu.dot_dimension_numbers<[1], [0], [0], [1], [0, 0, 1, 1], [], []>} : vector<8x16xf32>, vector<16x32xf32>, vector<8x32xf32> -> vector<8x32xf32>
    %cst_151 = arith.constant dense<0.000000e+00> : vector<8x32xf32>
    %174 = tpu.matmul %101, %21, %cst_151 {dimension_numbers = #tpu.dot_dimension_numbers<[1], [0], [0], [1], [0, 0, 1, 1], [], []>} : vector<8x32xf32>, vector<32x32xf32>, vector<8x32xf32> -> vector<8x32xf32>
    %175 = arith.addf %173, %174 : vector<8x32xf32>
    %176 = vector.broadcast %37 : vector<1x32xf32> to vector<8x32xf32>
    %177 = arith.addf %175, %176 : vector<8x32xf32>
    %178 = math.tanh %177 : vector<8x32xf32>
    %cst_152 = arith.constant dense<0.000000e+00> : vector<8x32xf32>
    %179 = tpu.matmul %152, %7, %cst_152 {dimension_numbers = #tpu.dot_dimension_numbers<[1], [0], [0], [1], [0, 0, 1, 1], [], []>} : vector<8x16xf32>, vector<16x32xf32>, vector<8x32xf32> -> vector<8x32xf32>
    %cst_153 = arith.constant dense<0.000000e+00> : vector<8x32xf32>
    %180 = tpu.matmul %101, %23, %cst_153 {dimension_numbers = #tpu.dot_dimension_numbers<[1], [0], [0], [1], [0, 0, 1, 1], [], []>} : vector<8x32xf32>, vector<32x32xf32>, vector<8x32xf32> -> vector<8x32xf32>
    %181 = arith.addf %179, %180 : vector<8x32xf32>
    %182 = vector.broadcast %39 : vector<1x32xf32> to vector<8x32xf32>
    %183 = arith.addf %181, %182 : vector<8x32xf32>
    %184 = arith.negf %183 : vector<8x32xf32>
    %185 = math.exp %184 : vector<8x32xf32>
    %cst_154 = arith.constant 1.000000e+00 : f32
    %186 = vector.broadcast %cst_154 : f32 to vector<8x32xf32>
    %187 = arith.addf %186, %185 : vector<8x32xf32>
    %188 = arith.divf %186, %187 : vector<8x32xf32>
    %189 = arith.mulf %172, %99 : vector<8x32xf32>
    %190 = arith.mulf %162, %178 : vector<8x32xf32>
    %191 = arith.addf %189, %190 : vector<8x32xf32>
    %192 = math.tanh %191 : vector<8x32xf32>
    %193 = arith.mulf %188, %192 : vector<8x32xf32>
    %c6 = arith.constant 6 : index
    %c0_155 = arith.constant 0 : index
    %c0_156 = arith.constant 0 : index
    %194 = vector.load %arg0[%c6, %c0_155, %c0_156] : memref<8x8x16xf32, #tpu.memory_space<vmem>>, vector<1x8x16xf32>
    %195 = vector.shape_cast %194 : vector<1x8x16xf32> to vector<8x16xf32>
    %cst_157 = arith.constant dense<0.000000e+00> : vector<8x32xf32>
    %196 = tpu.matmul %195, %9, %cst_157 {dimension_numbers = #tpu.dot_dimension_numbers<[1], [0], [0], [1], [0, 0, 1, 1], [], []>} : vector<8x16xf32>, vector<16x32xf32>, vector<8x32xf32> -> vector<8x32xf32>
    %cst_158 = arith.constant dense<0.000000e+00> : vector<8x32xf32>
    %197 = tpu.matmul %144, %25, %cst_158 {dimension_numbers = #tpu.dot_dimension_numbers<[1], [0], [0], [1], [0, 0, 1, 1], [], []>} : vector<8x32xf32>, vector<32x32xf32>, vector<8x32xf32> -> vector<8x32xf32>
    %198 = arith.addf %196, %197 : vector<8x32xf32>
    %199 = vector.broadcast %41 : vector<1x32xf32> to vector<8x32xf32>
    %200 = arith.addf %198, %199 : vector<8x32xf32>
    %201 = arith.negf %200 : vector<8x32xf32>
    %202 = math.exp %201 : vector<8x32xf32>
    %cst_159 = arith.constant 1.000000e+00 : f32
    %203 = vector.broadcast %cst_159 : f32 to vector<8x32xf32>
    %204 = arith.addf %203, %202 : vector<8x32xf32>
    %205 = arith.divf %203, %204 : vector<8x32xf32>
    %cst_160 = arith.constant dense<0.000000e+00> : vector<8x32xf32>
    %206 = tpu.matmul %195, %11, %cst_160 {dimension_numbers = #tpu.dot_dimension_numbers<[1], [0], [0], [1], [0, 0, 1, 1], [], []>} : vector<8x16xf32>, vector<16x32xf32>, vector<8x32xf32> -> vector<8x32xf32>
    %cst_161 = arith.constant dense<0.000000e+00> : vector<8x32xf32>
    %207 = tpu.matmul %144, %27, %cst_161 {dimension_numbers = #tpu.dot_dimension_numbers<[1], [0], [0], [1], [0, 0, 1, 1], [], []>} : vector<8x32xf32>, vector<32x32xf32>, vector<8x32xf32> -> vector<8x32xf32>
    %208 = arith.addf %206, %207 : vector<8x32xf32>
    %209 = vector.broadcast %43 : vector<1x32xf32> to vector<8x32xf32>
    %210 = arith.addf %208, %209 : vector<8x32xf32>
    %211 = arith.negf %210 : vector<8x32xf32>
    %212 = math.exp %211 : vector<8x32xf32>
    %cst_162 = arith.constant 1.000000e+00 : f32
    %213 = vector.broadcast %cst_162 : f32 to vector<8x32xf32>
    %214 = arith.addf %213, %212 : vector<8x32xf32>
    %215 = arith.divf %213, %214 : vector<8x32xf32>
    %cst_163 = arith.constant dense<0.000000e+00> : vector<8x32xf32>
    %216 = tpu.matmul %195, %13, %cst_163 {dimension_numbers = #tpu.dot_dimension_numbers<[1], [0], [0], [1], [0, 0, 1, 1], [], []>} : vector<8x16xf32>, vector<16x32xf32>, vector<8x32xf32> -> vector<8x32xf32>
    %cst_164 = arith.constant dense<0.000000e+00> : vector<8x32xf32>
    %217 = tpu.matmul %144, %29, %cst_164 {dimension_numbers = #tpu.dot_dimension_numbers<[1], [0], [0], [1], [0, 0, 1, 1], [], []>} : vector<8x32xf32>, vector<32x32xf32>, vector<8x32xf32> -> vector<8x32xf32>
    %218 = arith.addf %216, %217 : vector<8x32xf32>
    %219 = vector.broadcast %45 : vector<1x32xf32> to vector<8x32xf32>
    %220 = arith.addf %218, %219 : vector<8x32xf32>
    %221 = math.tanh %220 : vector<8x32xf32>
    %cst_165 = arith.constant dense<0.000000e+00> : vector<8x32xf32>
    %222 = tpu.matmul %195, %15, %cst_165 {dimension_numbers = #tpu.dot_dimension_numbers<[1], [0], [0], [1], [0, 0, 1, 1], [], []>} : vector<8x16xf32>, vector<16x32xf32>, vector<8x32xf32> -> vector<8x32xf32>
    %cst_166 = arith.constant dense<0.000000e+00> : vector<8x32xf32>
    %223 = tpu.matmul %144, %31, %cst_166 {dimension_numbers = #tpu.dot_dimension_numbers<[1], [0], [0], [1], [0, 0, 1, 1], [], []>} : vector<8x32xf32>, vector<32x32xf32>, vector<8x32xf32> -> vector<8x32xf32>
    %224 = arith.addf %222, %223 : vector<8x32xf32>
    %225 = vector.broadcast %47 : vector<1x32xf32> to vector<8x32xf32>
    %226 = arith.addf %224, %225 : vector<8x32xf32>
    %227 = arith.negf %226 : vector<8x32xf32>
    %228 = math.exp %227 : vector<8x32xf32>
    %cst_167 = arith.constant 1.000000e+00 : f32
    %229 = vector.broadcast %cst_167 : f32 to vector<8x32xf32>
    %230 = arith.addf %229, %228 : vector<8x32xf32>
    %231 = arith.divf %229, %230 : vector<8x32xf32>
    %232 = arith.mulf %215, %142 : vector<8x32xf32>
    %233 = arith.mulf %205, %221 : vector<8x32xf32>
    %234 = arith.addf %232, %233 : vector<8x32xf32>
    %235 = math.tanh %234 : vector<8x32xf32>
    %236 = arith.mulf %231, %235 : vector<8x32xf32>
    %c1_168 = arith.constant 1 : index
    %c0_169 = arith.constant 0 : index
    %c0_170 = arith.constant 0 : index
    %237 = vector.load %arg8[%c1_168, %c0_169, %c0_170] : memref<8x8x32xf32, #tpu.memory_space<vmem>>, vector<1x8x32xf32>
    %238 = vector.shape_cast %237 : vector<1x8x32xf32> to vector<8x32xf32>
    %239 = vector.shape_cast %193 : vector<8x32xf32> to vector<1x8x32xf32>
    tpu.vector_store %arg8[%c1_168, %c0_169, %c0_170], %239 {strides = array<i32>} : memref<8x8x32xf32, #tpu.memory_space<vmem>>, vector<1x8x32xf32>,
    %c6_171 = arith.constant 6 : index
    %c0_172 = arith.constant 0 : index
    %c0_173 = arith.constant 0 : index
    %240 = vector.load %arg9[%c6_171, %c0_172, %c0_173] : memref<8x8x32xf32, #tpu.memory_space<vmem>>, vector<1x8x32xf32>
    %241 = vector.shape_cast %240 : vector<1x8x32xf32> to vector<8x32xf32>
    %242 = vector.shape_cast %236 : vector<8x32xf32> to vector<1x8x32xf32>
    tpu.vector_store %arg9[%c6_171, %c0_172, %c0_173], %242 {strides = array<i32>} : memref<8x8x32xf32, #tpu.memory_space<vmem>>, vector<1x8x32xf32>,
    %c2_174 = arith.constant 2 : index
    %c0_175 = arith.constant 0 : index
    %c0_176 = arith.constant 0 : index
    %243 = vector.load %arg0[%c2_174, %c0_175, %c0_176] : memref<8x8x16xf32, #tpu.memory_space<vmem>>, vector<1x8x16xf32>
    %244 = vector.shape_cast %243 : vector<1x8x16xf32> to vector<8x16xf32>
    %cst_177 = arith.constant dense<0.000000e+00> : vector<8x32xf32>
    %245 = tpu.matmul %244, %1, %cst_177 {dimension_numbers = #tpu.dot_dimension_numbers<[1], [0], [0], [1], [0, 0, 1, 1], [], []>} : vector<8x16xf32>, vector<16x32xf32>, vector<8x32xf32> -> vector<8x32xf32>
    %cst_178 = arith.constant dense<0.000000e+00> : vector<8x32xf32>
    %246 = tpu.matmul %193, %17, %cst_178 {dimension_numbers = #tpu.dot_dimension_numbers<[1], [0], [0], [1], [0, 0, 1, 1], [], []>} : vector<8x32xf32>, vector<32x32xf32>, vector<8x32xf32> -> vector<8x32xf32>
    %247 = arith.addf %245, %246 : vector<8x32xf32>
    %248 = vector.broadcast %33 : vector<1x32xf32> to vector<8x32xf32>
    %249 = arith.addf %247, %248 : vector<8x32xf32>
    %250 = arith.negf %249 : vector<8x32xf32>
    %251 = math.exp %250 : vector<8x32xf32>
    %cst_179 = arith.constant 1.000000e+00 : f32
    %252 = vector.broadcast %cst_179 : f32 to vector<8x32xf32>
    %253 = arith.addf %252, %251 : vector<8x32xf32>
    %254 = arith.divf %252, %253 : vector<8x32xf32>
    %cst_180 = arith.constant dense<0.000000e+00> : vector<8x32xf32>
    %255 = tpu.matmul %244, %3, %cst_180 {dimension_numbers = #tpu.dot_dimension_numbers<[1], [0], [0], [1], [0, 0, 1, 1], [], []>} : vector<8x16xf32>, vector<16x32xf32>, vector<8x32xf32> -> vector<8x32xf32>
    %cst_181 = arith.constant dense<0.000000e+00> : vector<8x32xf32>
    %256 = tpu.matmul %193, %19, %cst_181 {dimension_numbers = #tpu.dot_dimension_numbers<[1], [0], [0], [1], [0, 0, 1, 1], [], []>} : vector<8x32xf32>, vector<32x32xf32>, vector<8x32xf32> -> vector<8x32xf32>
    %257 = arith.addf %255, %256 : vector<8x32xf32>
    %258 = vector.broadcast %35 : vector<1x32xf32> to vector<8x32xf32>
    %259 = arith.addf %257, %258 : vector<8x32xf32>
    %260 = arith.negf %259 : vector<8x32xf32>
    %261 = math.exp %260 : vector<8x32xf32>
    %cst_182 = arith.constant 1.000000e+00 : f32
    %262 = vector.broadcast %cst_182 : f32 to vector<8x32xf32>
    %263 = arith.addf %262, %261 : vector<8x32xf32>
    %264 = arith.divf %262, %263 : vector<8x32xf32>
    %cst_183 = arith.constant dense<0.000000e+00> : vector<8x32xf32>
    %265 = tpu.matmul %244, %5, %cst_183 {dimension_numbers = #tpu.dot_dimension_numbers<[1], [0], [0], [1], [0, 0, 1, 1], [], []>} : vector<8x16xf32>, vector<16x32xf32>, vector<8x32xf32> -> vector<8x32xf32>
    %cst_184 = arith.constant dense<0.000000e+00> : vector<8x32xf32>
    %266 = tpu.matmul %193, %21, %cst_184 {dimension_numbers = #tpu.dot_dimension_numbers<[1], [0], [0], [1], [0, 0, 1, 1], [], []>} : vector<8x32xf32>, vector<32x32xf32>, vector<8x32xf32> -> vector<8x32xf32>
    %267 = arith.addf %265, %266 : vector<8x32xf32>
    %268 = vector.broadcast %37 : vector<1x32xf32> to vector<8x32xf32>
    %269 = arith.addf %267, %268 : vector<8x32xf32>
    %270 = math.tanh %269 : vector<8x32xf32>
    %cst_185 = arith.constant dense<0.000000e+00> : vector<8x32xf32>
    %271 = tpu.matmul %244, %7, %cst_185 {dimension_numbers = #tpu.dot_dimension_numbers<[1], [0], [0], [1], [0, 0, 1, 1], [], []>} : vector<8x16xf32>, vector<16x32xf32>, vector<8x32xf32> -> vector<8x32xf32>
    %cst_186 = arith.constant dense<0.000000e+00> : vector<8x32xf32>
    %272 = tpu.matmul %193, %23, %cst_186 {dimension_numbers = #tpu.dot_dimension_numbers<[1], [0], [0], [1], [0, 0, 1, 1], [], []>} : vector<8x32xf32>, vector<32x32xf32>, vector<8x32xf32> -> vector<8x32xf32>
    %273 = arith.addf %271, %272 : vector<8x32xf32>
    %274 = vector.broadcast %39 : vector<1x32xf32> to vector<8x32xf32>
    %275 = arith.addf %273, %274 : vector<8x32xf32>
    %276 = arith.negf %275 : vector<8x32xf32>
    %277 = math.exp %276 : vector<8x32xf32>
    %cst_187 = arith.constant 1.000000e+00 : f32
    %278 = vector.broadcast %cst_187 : f32 to vector<8x32xf32>
    %279 = arith.addf %278, %277 : vector<8x32xf32>
    %280 = arith.divf %278, %279 : vector<8x32xf32>
    %281 = arith.mulf %264, %191 : vector<8x32xf32>
    %282 = arith.mulf %254, %270 : vector<8x32xf32>
    %283 = arith.addf %281, %282 : vector<8x32xf32>
    %284 = math.tanh %283 : vector<8x32xf32>
    %285 = arith.mulf %280, %284 : vector<8x32xf32>
    %c5 = arith.constant 5 : index
    %c0_188 = arith.constant 0 : index
    %c0_189 = arith.constant 0 : index
    %286 = vector.load %arg0[%c5, %c0_188, %c0_189] : memref<8x8x16xf32, #tpu.memory_space<vmem>>, vector<1x8x16xf32>
    %287 = vector.shape_cast %286 : vector<1x8x16xf32> to vector<8x16xf32>
    %cst_190 = arith.constant dense<0.000000e+00> : vector<8x32xf32>
    %288 = tpu.matmul %287, %9, %cst_190 {dimension_numbers = #tpu.dot_dimension_numbers<[1], [0], [0], [1], [0, 0, 1, 1], [], []>} : vector<8x16xf32>, vector<16x32xf32>, vector<8x32xf32> -> vector<8x32xf32>
    %cst_191 = arith.constant dense<0.000000e+00> : vector<8x32xf32>
    %289 = tpu.matmul %236, %25, %cst_191 {dimension_numbers = #tpu.dot_dimension_numbers<[1], [0], [0], [1], [0, 0, 1, 1], [], []>} : vector<8x32xf32>, vector<32x32xf32>, vector<8x32xf32> -> vector<8x32xf32>
    %290 = arith.addf %288, %289 : vector<8x32xf32>
    %291 = vector.broadcast %41 : vector<1x32xf32> to vector<8x32xf32>
    %292 = arith.addf %290, %291 : vector<8x32xf32>
    %293 = arith.negf %292 : vector<8x32xf32>
    %294 = math.exp %293 : vector<8x32xf32>
    %cst_192 = arith.constant 1.000000e+00 : f32
    %295 = vector.broadcast %cst_192 : f32 to vector<8x32xf32>
    %296 = arith.addf %295, %294 : vector<8x32xf32>
    %297 = arith.divf %295, %296 : vector<8x32xf32>
    %cst_193 = arith.constant dense<0.000000e+00> : vector<8x32xf32>
    %298 = tpu.matmul %287, %11, %cst_193 {dimension_numbers = #tpu.dot_dimension_numbers<[1], [0], [0], [1], [0, 0, 1, 1], [], []>} : vector<8x16xf32>, vector<16x32xf32>, vector<8x32xf32> -> vector<8x32xf32>
    %cst_194 = arith.constant dense<0.000000e+00> : vector<8x32xf32>
    %299 = tpu.matmul %236, %27, %cst_194 {dimension_numbers = #tpu.dot_dimension_numbers<[1], [0], [0], [1], [0, 0, 1, 1], [], []>} : vector<8x32xf32>, vector<32x32xf32>, vector<8x32xf32> -> vector<8x32xf32>
    %300 = arith.addf %298, %299 : vector<8x32xf32>
    %301 = vector.broadcast %43 : vector<1x32xf32> to vector<8x32xf32>
    %302 = arith.addf %300, %301 : vector<8x32xf32>
    %303 = arith.negf %302 : vector<8x32xf32>
    %304 = math.exp %303 : vector<8x32xf32>
    %cst_195 = arith.constant 1.000000e+00 : f32
    %305 = vector.broadcast %cst_195 : f32 to vector<8x32xf32>
    %306 = arith.addf %305, %304 : vector<8x32xf32>
    %307 = arith.divf %305, %306 : vector<8x32xf32>
    %cst_196 = arith.constant dense<0.000000e+00> : vector<8x32xf32>
    %308 = tpu.matmul %287, %13, %cst_196 {dimension_numbers = #tpu.dot_dimension_numbers<[1], [0], [0], [1], [0, 0, 1, 1], [], []>} : vector<8x16xf32>, vector<16x32xf32>, vector<8x32xf32> -> vector<8x32xf32>
    %cst_197 = arith.constant dense<0.000000e+00> : vector<8x32xf32>
    %309 = tpu.matmul %236, %29, %cst_197 {dimension_numbers = #tpu.dot_dimension_numbers<[1], [0], [0], [1], [0, 0, 1, 1], [], []>} : vector<8x32xf32>, vector<32x32xf32>, vector<8x32xf32> -> vector<8x32xf32>
    %310 = arith.addf %308, %309 : vector<8x32xf32>
    %311 = vector.broadcast %45 : vector<1x32xf32> to vector<8x32xf32>
    %312 = arith.addf %310, %311 : vector<8x32xf32>
    %313 = math.tanh %312 : vector<8x32xf32>
    %cst_198 = arith.constant dense<0.000000e+00> : vector<8x32xf32>
    %314 = tpu.matmul %287, %15, %cst_198 {dimension_numbers = #tpu.dot_dimension_numbers<[1], [0], [0], [1], [0, 0, 1, 1], [], []>} : vector<8x16xf32>, vector<16x32xf32>, vector<8x32xf32> -> vector<8x32xf32>
    %cst_199 = arith.constant dense<0.000000e+00> : vector<8x32xf32>
    %315 = tpu.matmul %236, %31, %cst_199 {dimension_numbers = #tpu.dot_dimension_numbers<[1], [0], [0], [1], [0, 0, 1, 1], [], []>} : vector<8x32xf32>, vector<32x32xf32>, vector<8x32xf32> -> vector<8x32xf32>
    %316 = arith.addf %314, %315 : vector<8x32xf32>
    %317 = vector.broadcast %47 : vector<1x32xf32> to vector<8x32xf32>
    %318 = arith.addf %316, %317 : vector<8x32xf32>
    %319 = arith.negf %318 : vector<8x32xf32>
    %320 = math.exp %319 : vector<8x32xf32>
    %cst_200 = arith.constant 1.000000e+00 : f32
    %321 = vector.broadcast %cst_200 : f32 to vector<8x32xf32>
    %322 = arith.addf %321, %320 : vector<8x32xf32>
    %323 = arith.divf %321, %322 : vector<8x32xf32>
    %324 = arith.mulf %307, %234 : vector<8x32xf32>
    %325 = arith.mulf %297, %313 : vector<8x32xf32>
    %326 = arith.addf %324, %325 : vector<8x32xf32>
    %327 = math.tanh %326 : vector<8x32xf32>
    %328 = arith.mulf %323, %327 : vector<8x32xf32>
    %c2_201 = arith.constant 2 : index
    %c0_202 = arith.constant 0 : index
    %c0_203 = arith.constant 0 : index
    %329 = vector.load %arg8[%c2_201, %c0_202, %c0_203] : memref<8x8x32xf32, #tpu.memory_space<vmem>>, vector<1x8x32xf32>
    %330 = vector.shape_cast %329 : vector<1x8x32xf32> to vector<8x32xf32>
    %331 = vector.shape_cast %285 : vector<8x32xf32> to vector<1x8x32xf32>
    tpu.vector_store %arg8[%c2_201, %c0_202, %c0_203], %331 {strides = array<i32>} : memref<8x8x32xf32, #tpu.memory_space<vmem>>, vector<1x8x32xf32>,
    %c5_204 = arith.constant 5 : index
    %c0_205 = arith.constant 0 : index
    %c0_206 = arith.constant 0 : index
    %332 = vector.load %arg9[%c5_204, %c0_205, %c0_206] : memref<8x8x32xf32, #tpu.memory_space<vmem>>, vector<1x8x32xf32>
    %333 = vector.shape_cast %332 : vector<1x8x32xf32> to vector<8x32xf32>
    %334 = vector.shape_cast %328 : vector<8x32xf32> to vector<1x8x32xf32>
    tpu.vector_store %arg9[%c5_204, %c0_205, %c0_206], %334 {strides = array<i32>} : memref<8x8x32xf32, #tpu.memory_space<vmem>>, vector<1x8x32xf32>,
    %c3_207 = arith.constant 3 : index
    %c0_208 = arith.constant 0 : index
    %c0_209 = arith.constant 0 : index
    %335 = vector.load %arg0[%c3_207, %c0_208, %c0_209] : memref<8x8x16xf32, #tpu.memory_space<vmem>>, vector<1x8x16xf32>
    %336 = vector.shape_cast %335 : vector<1x8x16xf32> to vector<8x16xf32>
    %cst_210 = arith.constant dense<0.000000e+00> : vector<8x32xf32>
    %337 = tpu.matmul %336, %1, %cst_210 {dimension_numbers = #tpu.dot_dimension_numbers<[1], [0], [0], [1], [0, 0, 1, 1], [], []>} : vector<8x16xf32>, vector<16x32xf32>, vector<8x32xf32> -> vector<8x32xf32>
    %cst_211 = arith.constant dense<0.000000e+00> : vector<8x32xf32>
    %338 = tpu.matmul %285, %17, %cst_211 {dimension_numbers = #tpu.dot_dimension_numbers<[1], [0], [0], [1], [0, 0, 1, 1], [], []>} : vector<8x32xf32>, vector<32x32xf32>, vector<8x32xf32> -> vector<8x32xf32>
    %339 = arith.addf %337, %338 : vector<8x32xf32>
    %340 = vector.broadcast %33 : vector<1x32xf32> to vector<8x32xf32>
    %341 = arith.addf %339, %340 : vector<8x32xf32>
    %342 = arith.negf %341 : vector<8x32xf32>
    %343 = math.exp %342 : vector<8x32xf32>
    %cst_212 = arith.constant 1.000000e+00 : f32
    %344 = vector.broadcast %cst_212 : f32 to vector<8x32xf32>
    %345 = arith.addf %344, %343 : vector<8x32xf32>
    %346 = arith.divf %344, %345 : vector<8x32xf32>
    %cst_213 = arith.constant dense<0.000000e+00> : vector<8x32xf32>
    %347 = tpu.matmul %336, %3, %cst_213 {dimension_numbers = #tpu.dot_dimension_numbers<[1], [0], [0], [1], [0, 0, 1, 1], [], []>} : vector<8x16xf32>, vector<16x32xf32>, vector<8x32xf32> -> vector<8x32xf32>
    %cst_214 = arith.constant dense<0.000000e+00> : vector<8x32xf32>
    %348 = tpu.matmul %285, %19, %cst_214 {dimension_numbers = #tpu.dot_dimension_numbers<[1], [0], [0], [1], [0, 0, 1, 1], [], []>} : vector<8x32xf32>, vector<32x32xf32>, vector<8x32xf32> -> vector<8x32xf32>
    %349 = arith.addf %347, %348 : vector<8x32xf32>
    %350 = vector.broadcast %35 : vector<1x32xf32> to vector<8x32xf32>
    %351 = arith.addf %349, %350 : vector<8x32xf32>
    %352 = arith.negf %351 : vector<8x32xf32>
    %353 = math.exp %352 : vector<8x32xf32>
    %cst_215 = arith.constant 1.000000e+00 : f32
    %354 = vector.broadcast %cst_215 : f32 to vector<8x32xf32>
    %355 = arith.addf %354, %353 : vector<8x32xf32>
    %356 = arith.divf %354, %355 : vector<8x32xf32>
    %cst_216 = arith.constant dense<0.000000e+00> : vector<8x32xf32>
    %357 = tpu.matmul %336, %5, %cst_216 {dimension_numbers = #tpu.dot_dimension_numbers<[1], [0], [0], [1], [0, 0, 1, 1], [], []>} : vector<8x16xf32>, vector<16x32xf32>, vector<8x32xf32> -> vector<8x32xf32>
    %cst_217 = arith.constant dense<0.000000e+00> : vector<8x32xf32>
    %358 = tpu.matmul %285, %21, %cst_217 {dimension_numbers = #tpu.dot_dimension_numbers<[1], [0], [0], [1], [0, 0, 1, 1], [], []>} : vector<8x32xf32>, vector<32x32xf32>, vector<8x32xf32> -> vector<8x32xf32>
    %359 = arith.addf %357, %358 : vector<8x32xf32>
    %360 = vector.broadcast %37 : vector<1x32xf32> to vector<8x32xf32>
    %361 = arith.addf %359, %360 : vector<8x32xf32>
    %362 = math.tanh %361 : vector<8x32xf32>
    %cst_218 = arith.constant dense<0.000000e+00> : vector<8x32xf32>
    %363 = tpu.matmul %336, %7, %cst_218 {dimension_numbers = #tpu.dot_dimension_numbers<[1], [0], [0], [1], [0, 0, 1, 1], [], []>} : vector<8x16xf32>, vector<16x32xf32>, vector<8x32xf32> -> vector<8x32xf32>
    %cst_219 = arith.constant dense<0.000000e+00> : vector<8x32xf32>
    %364 = tpu.matmul %285, %23, %cst_219 {dimension_numbers = #tpu.dot_dimension_numbers<[1], [0], [0], [1], [0, 0, 1, 1], [], []>} : vector<8x32xf32>, vector<32x32xf32>, vector<8x32xf32> -> vector<8x32xf32>
    %365 = arith.addf %363, %364 : vector<8x32xf32>
    %366 = vector.broadcast %39 : vector<1x32xf32> to vector<8x32xf32>
    %367 = arith.addf %365, %366 : vector<8x32xf32>
    %368 = arith.negf %367 : vector<8x32xf32>
    %369 = math.exp %368 : vector<8x32xf32>
    %cst_220 = arith.constant 1.000000e+00 : f32
    %370 = vector.broadcast %cst_220 : f32 to vector<8x32xf32>
    %371 = arith.addf %370, %369 : vector<8x32xf32>
    %372 = arith.divf %370, %371 : vector<8x32xf32>
    %373 = arith.mulf %356, %283 : vector<8x32xf32>
    %374 = arith.mulf %346, %362 : vector<8x32xf32>
    %375 = arith.addf %373, %374 : vector<8x32xf32>
    %376 = math.tanh %375 : vector<8x32xf32>
    %377 = arith.mulf %372, %376 : vector<8x32xf32>
    %c4 = arith.constant 4 : index
    %c0_221 = arith.constant 0 : index
    %c0_222 = arith.constant 0 : index
    %378 = vector.load %arg0[%c4, %c0_221, %c0_222] : memref<8x8x16xf32, #tpu.memory_space<vmem>>, vector<1x8x16xf32>
    %379 = vector.shape_cast %378 : vector<1x8x16xf32> to vector<8x16xf32>
    %cst_223 = arith.constant dense<0.000000e+00> : vector<8x32xf32>
    %380 = tpu.matmul %379, %9, %cst_223 {dimension_numbers = #tpu.dot_dimension_numbers<[1], [0], [0], [1], [0, 0, 1, 1], [], []>} : vector<8x16xf32>, vector<16x32xf32>, vector<8x32xf32> -> vector<8x32xf32>
    %cst_224 = arith.constant dense<0.000000e+00> : vector<8x32xf32>
    %381 = tpu.matmul %328, %25, %cst_224 {dimension_numbers = #tpu.dot_dimension_numbers<[1], [0], [0], [1], [0, 0, 1, 1], [], []>} : vector<8x32xf32>, vector<32x32xf32>, vector<8x32xf32> -> vector<8x32xf32>
    %382 = arith.addf %380, %381 : vector<8x32xf32>
    %383 = vector.broadcast %41 : vector<1x32xf32> to vector<8x32xf32>
    %384 = arith.addf %382, %383 : vector<8x32xf32>
    %385 = arith.negf %384 : vector<8x32xf32>
    %386 = math.exp %385 : vector<8x32xf32>
    %cst_225 = arith.constant 1.000000e+00 : f32
    %387 = vector.broadcast %cst_225 : f32 to vector<8x32xf32>
    %388 = arith.addf %387, %386 : vector<8x32xf32>
    %389 = arith.divf %387, %388 : vector<8x32xf32>
    %cst_226 = arith.constant dense<0.000000e+00> : vector<8x32xf32>
    %390 = tpu.matmul %379, %11, %cst_226 {dimension_numbers = #tpu.dot_dimension_numbers<[1], [0], [0], [1], [0, 0, 1, 1], [], []>} : vector<8x16xf32>, vector<16x32xf32>, vector<8x32xf32> -> vector<8x32xf32>
    %cst_227 = arith.constant dense<0.000000e+00> : vector<8x32xf32>
    %391 = tpu.matmul %328, %27, %cst_227 {dimension_numbers = #tpu.dot_dimension_numbers<[1], [0], [0], [1], [0, 0, 1, 1], [], []>} : vector<8x32xf32>, vector<32x32xf32>, vector<8x32xf32> -> vector<8x32xf32>
    %392 = arith.addf %390, %391 : vector<8x32xf32>
    %393 = vector.broadcast %43 : vector<1x32xf32> to vector<8x32xf32>
    %394 = arith.addf %392, %393 : vector<8x32xf32>
    %395 = arith.negf %394 : vector<8x32xf32>
    %396 = math.exp %395 : vector<8x32xf32>
    %cst_228 = arith.constant 1.000000e+00 : f32
    %397 = vector.broadcast %cst_228 : f32 to vector<8x32xf32>
    %398 = arith.addf %397, %396 : vector<8x32xf32>
    %399 = arith.divf %397, %398 : vector<8x32xf32>
    %cst_229 = arith.constant dense<0.000000e+00> : vector<8x32xf32>
    %400 = tpu.matmul %379, %13, %cst_229 {dimension_numbers = #tpu.dot_dimension_numbers<[1], [0], [0], [1], [0, 0, 1, 1], [], []>} : vector<8x16xf32>, vector<16x32xf32>, vector<8x32xf32> -> vector<8x32xf32>
    %cst_230 = arith.constant dense<0.000000e+00> : vector<8x32xf32>
    %401 = tpu.matmul %328, %29, %cst_230 {dimension_numbers = #tpu.dot_dimension_numbers<[1], [0], [0], [1], [0, 0, 1, 1], [], []>} : vector<8x32xf32>, vector<32x32xf32>, vector<8x32xf32> -> vector<8x32xf32>
    %402 = arith.addf %400, %401 : vector<8x32xf32>
    %403 = vector.broadcast %45 : vector<1x32xf32> to vector<8x32xf32>
    %404 = arith.addf %402, %403 : vector<8x32xf32>
    %405 = math.tanh %404 : vector<8x32xf32>
    %cst_231 = arith.constant dense<0.000000e+00> : vector<8x32xf32>
    %406 = tpu.matmul %379, %15, %cst_231 {dimension_numbers = #tpu.dot_dimension_numbers<[1], [0], [0], [1], [0, 0, 1, 1], [], []>} : vector<8x16xf32>, vector<16x32xf32>, vector<8x32xf32> -> vector<8x32xf32>
    %cst_232 = arith.constant dense<0.000000e+00> : vector<8x32xf32>
    %407 = tpu.matmul %328, %31, %cst_232 {dimension_numbers = #tpu.dot_dimension_numbers<[1], [0], [0], [1], [0, 0, 1, 1], [], []>} : vector<8x32xf32>, vector<32x32xf32>, vector<8x32xf32> -> vector<8x32xf32>
    %408 = arith.addf %406, %407 : vector<8x32xf32>
    %409 = vector.broadcast %47 : vector<1x32xf32> to vector<8x32xf32>
    %410 = arith.addf %408, %409 : vector<8x32xf32>
    %411 = arith.negf %410 : vector<8x32xf32>
    %412 = math.exp %411 : vector<8x32xf32>
    %cst_233 = arith.constant 1.000000e+00 : f32
    %413 = vector.broadcast %cst_233 : f32 to vector<8x32xf32>
    %414 = arith.addf %413, %412 : vector<8x32xf32>
    %415 = arith.divf %413, %414 : vector<8x32xf32>
    %416 = arith.mulf %399, %326 : vector<8x32xf32>
    %417 = arith.mulf %389, %405 : vector<8x32xf32>
    %418 = arith.addf %416, %417 : vector<8x32xf32>
    %419 = math.tanh %418 : vector<8x32xf32>
    %420 = arith.mulf %415, %419 : vector<8x32xf32>
    %c3_234 = arith.constant 3 : index
    %c0_235 = arith.constant 0 : index
    %c0_236 = arith.constant 0 : index
    %421 = vector.load %arg8[%c3_234, %c0_235, %c0_236] : memref<8x8x32xf32, #tpu.memory_space<vmem>>, vector<1x8x32xf32>
    %422 = vector.shape_cast %421 : vector<1x8x32xf32> to vector<8x32xf32>
    %423 = vector.shape_cast %377 : vector<8x32xf32> to vector<1x8x32xf32>
    tpu.vector_store %arg8[%c3_234, %c0_235, %c0_236], %423 {strides = array<i32>} : memref<8x8x32xf32, #tpu.memory_space<vmem>>, vector<1x8x32xf32>,
    %c4_237 = arith.constant 4 : index
    %c0_238 = arith.constant 0 : index
    %c0_239 = arith.constant 0 : index
    %424 = vector.load %arg9[%c4_237, %c0_238, %c0_239] : memref<8x8x32xf32, #tpu.memory_space<vmem>>, vector<1x8x32xf32>
    %425 = vector.shape_cast %424 : vector<1x8x32xf32> to vector<8x32xf32>
    %426 = vector.shape_cast %420 : vector<8x32xf32> to vector<1x8x32xf32>
    tpu.vector_store %arg9[%c4_237, %c0_238, %c0_239], %426 {strides = array<i32>} : memref<8x8x32xf32, #tpu.memory_space<vmem>>, vector<1x8x32xf32>,
    %c4_240 = arith.constant 4 : index
    %c0_241 = arith.constant 0 : index
    %c0_242 = arith.constant 0 : index
    %427 = vector.load %arg0[%c4_240, %c0_241, %c0_242] : memref<8x8x16xf32, #tpu.memory_space<vmem>>, vector<1x8x16xf32>
    %428 = vector.shape_cast %427 : vector<1x8x16xf32> to vector<8x16xf32>
    %cst_243 = arith.constant dense<0.000000e+00> : vector<8x32xf32>
    %429 = tpu.matmul %428, %1, %cst_243 {dimension_numbers = #tpu.dot_dimension_numbers<[1], [0], [0], [1], [0, 0, 1, 1], [], []>} : vector<8x16xf32>, vector<16x32xf32>, vector<8x32xf32> -> vector<8x32xf32>
    %cst_244 = arith.constant dense<0.000000e+00> : vector<8x32xf32>
    %430 = tpu.matmul %377, %17, %cst_244 {dimension_numbers = #tpu.dot_dimension_numbers<[1], [0], [0], [1], [0, 0, 1, 1], [], []>} : vector<8x32xf32>, vector<32x32xf32>, vector<8x32xf32> -> vector<8x32xf32>
    %431 = arith.addf %429, %430 : vector<8x32xf32>
    %432 = vector.broadcast %33 : vector<1x32xf32> to vector<8x32xf32>
    %433 = arith.addf %431, %432 : vector<8x32xf32>
    %434 = arith.negf %433 : vector<8x32xf32>
    %435 = math.exp %434 : vector<8x32xf32>
    %cst_245 = arith.constant 1.000000e+00 : f32
    %436 = vector.broadcast %cst_245 : f32 to vector<8x32xf32>
    %437 = arith.addf %436, %435 : vector<8x32xf32>
    %438 = arith.divf %436, %437 : vector<8x32xf32>
    %cst_246 = arith.constant dense<0.000000e+00> : vector<8x32xf32>
    %439 = tpu.matmul %428, %3, %cst_246 {dimension_numbers = #tpu.dot_dimension_numbers<[1], [0], [0], [1], [0, 0, 1, 1], [], []>} : vector<8x16xf32>, vector<16x32xf32>, vector<8x32xf32> -> vector<8x32xf32>
    %cst_247 = arith.constant dense<0.000000e+00> : vector<8x32xf32>
    %440 = tpu.matmul %377, %19, %cst_247 {dimension_numbers = #tpu.dot_dimension_numbers<[1], [0], [0], [1], [0, 0, 1, 1], [], []>} : vector<8x32xf32>, vector<32x32xf32>, vector<8x32xf32> -> vector<8x32xf32>
    %441 = arith.addf %439, %440 : vector<8x32xf32>
    %442 = vector.broadcast %35 : vector<1x32xf32> to vector<8x32xf32>
    %443 = arith.addf %441, %442 : vector<8x32xf32>
    %444 = arith.negf %443 : vector<8x32xf32>
    %445 = math.exp %444 : vector<8x32xf32>
    %cst_248 = arith.constant 1.000000e+00 : f32
    %446 = vector.broadcast %cst_248 : f32 to vector<8x32xf32>
    %447 = arith.addf %446, %445 : vector<8x32xf32>
    %448 = arith.divf %446, %447 : vector<8x32xf32>
    %cst_249 = arith.constant dense<0.000000e+00> : vector<8x32xf32>
    %449 = tpu.matmul %428, %5, %cst_249 {dimension_numbers = #tpu.dot_dimension_numbers<[1], [0], [0], [1], [0, 0, 1, 1], [], []>} : vector<8x16xf32>, vector<16x32xf32>, vector<8x32xf32> -> vector<8x32xf32>
    %cst_250 = arith.constant dense<0.000000e+00> : vector<8x32xf32>
    %450 = tpu.matmul %377, %21, %cst_250 {dimension_numbers = #tpu.dot_dimension_numbers<[1], [0], [0], [1], [0, 0, 1, 1], [], []>} : vector<8x32xf32>, vector<32x32xf32>, vector<8x32xf32> -> vector<8x32xf32>
    %451 = arith.addf %449, %450 : vector<8x32xf32>
    %452 = vector.broadcast %37 : vector<1x32xf32> to vector<8x32xf32>
    %453 = arith.addf %451, %452 : vector<8x32xf32>
    %454 = math.tanh %453 : vector<8x32xf32>
    %cst_251 = arith.constant dense<0.000000e+00> : vector<8x32xf32>
    %455 = tpu.matmul %428, %7, %cst_251 {dimension_numbers = #tpu.dot_dimension_numbers<[1], [0], [0], [1], [0, 0, 1, 1], [], []>} : vector<8x16xf32>, vector<16x32xf32>, vector<8x32xf32> -> vector<8x32xf32>
    %cst_252 = arith.constant dense<0.000000e+00> : vector<8x32xf32>
    %456 = tpu.matmul %377, %23, %cst_252 {dimension_numbers = #tpu.dot_dimension_numbers<[1], [0], [0], [1], [0, 0, 1, 1], [], []>} : vector<8x32xf32>, vector<32x32xf32>, vector<8x32xf32> -> vector<8x32xf32>
    %457 = arith.addf %455, %456 : vector<8x32xf32>
    %458 = vector.broadcast %39 : vector<1x32xf32> to vector<8x32xf32>
    %459 = arith.addf %457, %458 : vector<8x32xf32>
    %460 = arith.negf %459 : vector<8x32xf32>
    %461 = math.exp %460 : vector<8x32xf32>
    %cst_253 = arith.constant 1.000000e+00 : f32
    %462 = vector.broadcast %cst_253 : f32 to vector<8x32xf32>
    %463 = arith.addf %462, %461 : vector<8x32xf32>
    %464 = arith.divf %462, %463 : vector<8x32xf32>
    %465 = arith.mulf %448, %375 : vector<8x32xf32>
    %466 = arith.mulf %438, %454 : vector<8x32xf32>
    %467 = arith.addf %465, %466 : vector<8x32xf32>
    %468 = math.tanh %467 : vector<8x32xf32>
    %469 = arith.mulf %464, %468 : vector<8x32xf32>
    %c3_254 = arith.constant 3 : index
    %c0_255 = arith.constant 0 : index
    %c0_256 = arith.constant 0 : index
    %470 = vector.load %arg0[%c3_254, %c0_255, %c0_256] : memref<8x8x16xf32, #tpu.memory_space<vmem>>, vector<1x8x16xf32>
    %471 = vector.shape_cast %470 : vector<1x8x16xf32> to vector<8x16xf32>
    %cst_257 = arith.constant dense<0.000000e+00> : vector<8x32xf32>
    %472 = tpu.matmul %471, %9, %cst_257 {dimension_numbers = #tpu.dot_dimension_numbers<[1], [0], [0], [1], [0, 0, 1, 1], [], []>} : vector<8x16xf32>, vector<16x32xf32>, vector<8x32xf32> -> vector<8x32xf32>
    %cst_258 = arith.constant dense<0.000000e+00> : vector<8x32xf32>
    %473 = tpu.matmul %420, %25, %cst_258 {dimension_numbers = #tpu.dot_dimension_numbers<[1], [0], [0], [1], [0, 0, 1, 1], [], []>} : vector<8x32xf32>, vector<32x32xf32>, vector<8x32xf32> -> vector<8x32xf32>
    %474 = arith.addf %472, %473 : vector<8x32xf32>
    %475 = vector.broadcast %41 : vector<1x32xf32> to vector<8x32xf32>
    %476 = arith.addf %474, %475 : vector<8x32xf32>
    %477 = arith.negf %476 : vector<8x32xf32>
    %478 = math.exp %477 : vector<8x32xf32>
    %cst_259 = arith.constant 1.000000e+00 : f32
    %479 = vector.broadcast %cst_259 : f32 to vector<8x32xf32>
    %480 = arith.addf %479, %478 : vector<8x32xf32>
    %481 = arith.divf %479, %480 : vector<8x32xf32>
    %cst_260 = arith.constant dense<0.000000e+00> : vector<8x32xf32>
    %482 = tpu.matmul %471, %11, %cst_260 {dimension_numbers = #tpu.dot_dimension_numbers<[1], [0], [0], [1], [0, 0, 1, 1], [], []>} : vector<8x16xf32>, vector<16x32xf32>, vector<8x32xf32> -> vector<8x32xf32>
    %cst_261 = arith.constant dense<0.000000e+00> : vector<8x32xf32>
    %483 = tpu.matmul %420, %27, %cst_261 {dimension_numbers = #tpu.dot_dimension_numbers<[1], [0], [0], [1], [0, 0, 1, 1], [], []>} : vector<8x32xf32>, vector<32x32xf32>, vector<8x32xf32> -> vector<8x32xf32>
    %484 = arith.addf %482, %483 : vector<8x32xf32>
    %485 = vector.broadcast %43 : vector<1x32xf32> to vector<8x32xf32>
    %486 = arith.addf %484, %485 : vector<8x32xf32>
    %487 = arith.negf %486 : vector<8x32xf32>
    %488 = math.exp %487 : vector<8x32xf32>
    %cst_262 = arith.constant 1.000000e+00 : f32
    %489 = vector.broadcast %cst_262 : f32 to vector<8x32xf32>
    %490 = arith.addf %489, %488 : vector<8x32xf32>
    %491 = arith.divf %489, %490 : vector<8x32xf32>
    %cst_263 = arith.constant dense<0.000000e+00> : vector<8x32xf32>
    %492 = tpu.matmul %471, %13, %cst_263 {dimension_numbers = #tpu.dot_dimension_numbers<[1], [0], [0], [1], [0, 0, 1, 1], [], []>} : vector<8x16xf32>, vector<16x32xf32>, vector<8x32xf32> -> vector<8x32xf32>
    %cst_264 = arith.constant dense<0.000000e+00> : vector<8x32xf32>
    %493 = tpu.matmul %420, %29, %cst_264 {dimension_numbers = #tpu.dot_dimension_numbers<[1], [0], [0], [1], [0, 0, 1, 1], [], []>} : vector<8x32xf32>, vector<32x32xf32>, vector<8x32xf32> -> vector<8x32xf32>
    %494 = arith.addf %492, %493 : vector<8x32xf32>
    %495 = vector.broadcast %45 : vector<1x32xf32> to vector<8x32xf32>
    %496 = arith.addf %494, %495 : vector<8x32xf32>
    %497 = math.tanh %496 : vector<8x32xf32>
    %cst_265 = arith.constant dense<0.000000e+00> : vector<8x32xf32>
    %498 = tpu.matmul %471, %15, %cst_265 {dimension_numbers = #tpu.dot_dimension_numbers<[1], [0], [0], [1], [0, 0, 1, 1], [], []>} : vector<8x16xf32>, vector<16x32xf32>, vector<8x32xf32> -> vector<8x32xf32>
    %cst_266 = arith.constant dense<0.000000e+00> : vector<8x32xf32>
    %499 = tpu.matmul %420, %31, %cst_266 {dimension_numbers = #tpu.dot_dimension_numbers<[1], [0], [0], [1], [0, 0, 1, 1], [], []>} : vector<8x32xf32>, vector<32x32xf32>, vector<8x32xf32> -> vector<8x32xf32>
    %500 = arith.addf %498, %499 : vector<8x32xf32>
    %501 = vector.broadcast %47 : vector<1x32xf32> to vector<8x32xf32>
    %502 = arith.addf %500, %501 : vector<8x32xf32>
    %503 = arith.negf %502 : vector<8x32xf32>
    %504 = math.exp %503 : vector<8x32xf32>
    %cst_267 = arith.constant 1.000000e+00 : f32
    %505 = vector.broadcast %cst_267 : f32 to vector<8x32xf32>
    %506 = arith.addf %505, %504 : vector<8x32xf32>
    %507 = arith.divf %505, %506 : vector<8x32xf32>
    %508 = arith.mulf %491, %418 : vector<8x32xf32>
    %509 = arith.mulf %481, %497 : vector<8x32xf32>
    %510 = arith.addf %508, %509 : vector<8x32xf32>
    %511 = math.tanh %510 : vector<8x32xf32>
    %512 = arith.mulf %507, %511 : vector<8x32xf32>
    %c4_268 = arith.constant 4 : index
    %c0_269 = arith.constant 0 : index
    %c0_270 = arith.constant 0 : index
    %513 = vector.load %arg8[%c4_268, %c0_269, %c0_270] : memref<8x8x32xf32, #tpu.memory_space<vmem>>, vector<1x8x32xf32>
    %514 = vector.shape_cast %513 : vector<1x8x32xf32> to vector<8x32xf32>
    %515 = vector.shape_cast %469 : vector<8x32xf32> to vector<1x8x32xf32>
    tpu.vector_store %arg8[%c4_268, %c0_269, %c0_270], %515 {strides = array<i32>} : memref<8x8x32xf32, #tpu.memory_space<vmem>>, vector<1x8x32xf32>,
    %c3_271 = arith.constant 3 : index
    %c0_272 = arith.constant 0 : index
    %c0_273 = arith.constant 0 : index
    %516 = vector.load %arg9[%c3_271, %c0_272, %c0_273] : memref<8x8x32xf32, #tpu.memory_space<vmem>>, vector<1x8x32xf32>
    %517 = vector.shape_cast %516 : vector<1x8x32xf32> to vector<8x32xf32>
    %518 = vector.shape_cast %512 : vector<8x32xf32> to vector<1x8x32xf32>
    tpu.vector_store %arg9[%c3_271, %c0_272, %c0_273], %518 {strides = array<i32>} : memref<8x8x32xf32, #tpu.memory_space<vmem>>, vector<1x8x32xf32>,
    %c5_274 = arith.constant 5 : index
    %c0_275 = arith.constant 0 : index
    %c0_276 = arith.constant 0 : index
    %519 = vector.load %arg0[%c5_274, %c0_275, %c0_276] : memref<8x8x16xf32, #tpu.memory_space<vmem>>, vector<1x8x16xf32>
    %520 = vector.shape_cast %519 : vector<1x8x16xf32> to vector<8x16xf32>
    %cst_277 = arith.constant dense<0.000000e+00> : vector<8x32xf32>
    %521 = tpu.matmul %520, %1, %cst_277 {dimension_numbers = #tpu.dot_dimension_numbers<[1], [0], [0], [1], [0, 0, 1, 1], [], []>} : vector<8x16xf32>, vector<16x32xf32>, vector<8x32xf32> -> vector<8x32xf32>
    %cst_278 = arith.constant dense<0.000000e+00> : vector<8x32xf32>
    %522 = tpu.matmul %469, %17, %cst_278 {dimension_numbers = #tpu.dot_dimension_numbers<[1], [0], [0], [1], [0, 0, 1, 1], [], []>} : vector<8x32xf32>, vector<32x32xf32>, vector<8x32xf32> -> vector<8x32xf32>
    %523 = arith.addf %521, %522 : vector<8x32xf32>
    %524 = vector.broadcast %33 : vector<1x32xf32> to vector<8x32xf32>
    %525 = arith.addf %523, %524 : vector<8x32xf32>
    %526 = arith.negf %525 : vector<8x32xf32>
    %527 = math.exp %526 : vector<8x32xf32>
    %cst_279 = arith.constant 1.000000e+00 : f32
    %528 = vector.broadcast %cst_279 : f32 to vector<8x32xf32>
    %529 = arith.addf %528, %527 : vector<8x32xf32>
    %530 = arith.divf %528, %529 : vector<8x32xf32>
    %cst_280 = arith.constant dense<0.000000e+00> : vector<8x32xf32>
    %531 = tpu.matmul %520, %3, %cst_280 {dimension_numbers = #tpu.dot_dimension_numbers<[1], [0], [0], [1], [0, 0, 1, 1], [], []>} : vector<8x16xf32>, vector<16x32xf32>, vector<8x32xf32> -> vector<8x32xf32>
    %cst_281 = arith.constant dense<0.000000e+00> : vector<8x32xf32>
    %532 = tpu.matmul %469, %19, %cst_281 {dimension_numbers = #tpu.dot_dimension_numbers<[1], [0], [0], [1], [0, 0, 1, 1], [], []>} : vector<8x32xf32>, vector<32x32xf32>, vector<8x32xf32> -> vector<8x32xf32>
    %533 = arith.addf %531, %532 : vector<8x32xf32>
    %534 = vector.broadcast %35 : vector<1x32xf32> to vector<8x32xf32>
    %535 = arith.addf %533, %534 : vector<8x32xf32>
    %536 = arith.negf %535 : vector<8x32xf32>
    %537 = math.exp %536 : vector<8x32xf32>
    %cst_282 = arith.constant 1.000000e+00 : f32
    %538 = vector.broadcast %cst_282 : f32 to vector<8x32xf32>
    %539 = arith.addf %538, %537 : vector<8x32xf32>
    %540 = arith.divf %538, %539 : vector<8x32xf32>
    %cst_283 = arith.constant dense<0.000000e+00> : vector<8x32xf32>
    %541 = tpu.matmul %520, %5, %cst_283 {dimension_numbers = #tpu.dot_dimension_numbers<[1], [0], [0], [1], [0, 0, 1, 1], [], []>} : vector<8x16xf32>, vector<16x32xf32>, vector<8x32xf32> -> vector<8x32xf32>
    %cst_284 = arith.constant dense<0.000000e+00> : vector<8x32xf32>
    %542 = tpu.matmul %469, %21, %cst_284 {dimension_numbers = #tpu.dot_dimension_numbers<[1], [0], [0], [1], [0, 0, 1, 1], [], []>} : vector<8x32xf32>, vector<32x32xf32>, vector<8x32xf32> -> vector<8x32xf32>
    %543 = arith.addf %541, %542 : vector<8x32xf32>
    %544 = vector.broadcast %37 : vector<1x32xf32> to vector<8x32xf32>
    %545 = arith.addf %543, %544 : vector<8x32xf32>
    %546 = math.tanh %545 : vector<8x32xf32>
    %cst_285 = arith.constant dense<0.000000e+00> : vector<8x32xf32>
    %547 = tpu.matmul %520, %7, %cst_285 {dimension_numbers = #tpu.dot_dimension_numbers<[1], [0], [0], [1], [0, 0, 1, 1], [], []>} : vector<8x16xf32>, vector<16x32xf32>, vector<8x32xf32> -> vector<8x32xf32>
    %cst_286 = arith.constant dense<0.000000e+00> : vector<8x32xf32>
    %548 = tpu.matmul %469, %23, %cst_286 {dimension_numbers = #tpu.dot_dimension_numbers<[1], [0], [0], [1], [0, 0, 1, 1], [], []>} : vector<8x32xf32>, vector<32x32xf32>, vector<8x32xf32> -> vector<8x32xf32>
    %549 = arith.addf %547, %548 : vector<8x32xf32>
    %550 = vector.broadcast %39 : vector<1x32xf32> to vector<8x32xf32>
    %551 = arith.addf %549, %550 : vector<8x32xf32>
    %552 = arith.negf %551 : vector<8x32xf32>
    %553 = math.exp %552 : vector<8x32xf32>
    %cst_287 = arith.constant 1.000000e+00 : f32
    %554 = vector.broadcast %cst_287 : f32 to vector<8x32xf32>
    %555 = arith.addf %554, %553 : vector<8x32xf32>
    %556 = arith.divf %554, %555 : vector<8x32xf32>
    %557 = arith.mulf %540, %467 : vector<8x32xf32>
    %558 = arith.mulf %530, %546 : vector<8x32xf32>
    %559 = arith.addf %557, %558 : vector<8x32xf32>
    %560 = math.tanh %559 : vector<8x32xf32>
    %561 = arith.mulf %556, %560 : vector<8x32xf32>
    %c2_288 = arith.constant 2 : index
    %c0_289 = arith.constant 0 : index
    %c0_290 = arith.constant 0 : index
    %562 = vector.load %arg0[%c2_288, %c0_289, %c0_290] : memref<8x8x16xf32, #tpu.memory_space<vmem>>, vector<1x8x16xf32>
    %563 = vector.shape_cast %562 : vector<1x8x16xf32> to vector<8x16xf32>
    %cst_291 = arith.constant dense<0.000000e+00> : vector<8x32xf32>
    %564 = tpu.matmul %563, %9, %cst_291 {dimension_numbers = #tpu.dot_dimension_numbers<[1], [0], [0], [1], [0, 0, 1, 1], [], []>} : vector<8x16xf32>, vector<16x32xf32>, vector<8x32xf32> -> vector<8x32xf32>
    %cst_292 = arith.constant dense<0.000000e+00> : vector<8x32xf32>
    %565 = tpu.matmul %512, %25, %cst_292 {dimension_numbers = #tpu.dot_dimension_numbers<[1], [0], [0], [1], [0, 0, 1, 1], [], []>} : vector<8x32xf32>, vector<32x32xf32>, vector<8x32xf32> -> vector<8x32xf32>
    %566 = arith.addf %564, %565 : vector<8x32xf32>
    %567 = vector.broadcast %41 : vector<1x32xf32> to vector<8x32xf32>
    %568 = arith.addf %566, %567 : vector<8x32xf32>
    %569 = arith.negf %568 : vector<8x32xf32>
    %570 = math.exp %569 : vector<8x32xf32>
    %cst_293 = arith.constant 1.000000e+00 : f32
    %571 = vector.broadcast %cst_293 : f32 to vector<8x32xf32>
    %572 = arith.addf %571, %570 : vector<8x32xf32>
    %573 = arith.divf %571, %572 : vector<8x32xf32>
    %cst_294 = arith.constant dense<0.000000e+00> : vector<8x32xf32>
    %574 = tpu.matmul %563, %11, %cst_294 {dimension_numbers = #tpu.dot_dimension_numbers<[1], [0], [0], [1], [0, 0, 1, 1], [], []>} : vector<8x16xf32>, vector<16x32xf32>, vector<8x32xf32> -> vector<8x32xf32>
    %cst_295 = arith.constant dense<0.000000e+00> : vector<8x32xf32>
    %575 = tpu.matmul %512, %27, %cst_295 {dimension_numbers = #tpu.dot_dimension_numbers<[1], [0], [0], [1], [0, 0, 1, 1], [], []>} : vector<8x32xf32>, vector<32x32xf32>, vector<8x32xf32> -> vector<8x32xf32>
    %576 = arith.addf %574, %575 : vector<8x32xf32>
    %577 = vector.broadcast %43 : vector<1x32xf32> to vector<8x32xf32>
    %578 = arith.addf %576, %577 : vector<8x32xf32>
    %579 = arith.negf %578 : vector<8x32xf32>
    %580 = math.exp %579 : vector<8x32xf32>
    %cst_296 = arith.constant 1.000000e+00 : f32
    %581 = vector.broadcast %cst_296 : f32 to vector<8x32xf32>
    %582 = arith.addf %581, %580 : vector<8x32xf32>
    %583 = arith.divf %581, %582 : vector<8x32xf32>
    %cst_297 = arith.constant dense<0.000000e+00> : vector<8x32xf32>
    %584 = tpu.matmul %563, %13, %cst_297 {dimension_numbers = #tpu.dot_dimension_numbers<[1], [0], [0], [1], [0, 0, 1, 1], [], []>} : vector<8x16xf32>, vector<16x32xf32>, vector<8x32xf32> -> vector<8x32xf32>
    %cst_298 = arith.constant dense<0.000000e+00> : vector<8x32xf32>
    %585 = tpu.matmul %512, %29, %cst_298 {dimension_numbers = #tpu.dot_dimension_numbers<[1], [0], [0], [1], [0, 0, 1, 1], [], []>} : vector<8x32xf32>, vector<32x32xf32>, vector<8x32xf32> -> vector<8x32xf32>
    %586 = arith.addf %584, %585 : vector<8x32xf32>
    %587 = vector.broadcast %45 : vector<1x32xf32> to vector<8x32xf32>
    %588 = arith.addf %586, %587 : vector<8x32xf32>
    %589 = math.tanh %588 : vector<8x32xf32>
    %cst_299 = arith.constant dense<0.000000e+00> : vector<8x32xf32>
    %590 = tpu.matmul %563, %15, %cst_299 {dimension_numbers = #tpu.dot_dimension_numbers<[1], [0], [0], [1], [0, 0, 1, 1], [], []>} : vector<8x16xf32>, vector<16x32xf32>, vector<8x32xf32> -> vector<8x32xf32>
    %cst_300 = arith.constant dense<0.000000e+00> : vector<8x32xf32>
    %591 = tpu.matmul %512, %31, %cst_300 {dimension_numbers = #tpu.dot_dimension_numbers<[1], [0], [0], [1], [0, 0, 1, 1], [], []>} : vector<8x32xf32>, vector<32x32xf32>, vector<8x32xf32> -> vector<8x32xf32>
    %592 = arith.addf %590, %591 : vector<8x32xf32>
    %593 = vector.broadcast %47 : vector<1x32xf32> to vector<8x32xf32>
    %594 = arith.addf %592, %593 : vector<8x32xf32>
    %595 = arith.negf %594 : vector<8x32xf32>
    %596 = math.exp %595 : vector<8x32xf32>
    %cst_301 = arith.constant 1.000000e+00 : f32
    %597 = vector.broadcast %cst_301 : f32 to vector<8x32xf32>
    %598 = arith.addf %597, %596 : vector<8x32xf32>
    %599 = arith.divf %597, %598 : vector<8x32xf32>
    %600 = arith.mulf %583, %510 : vector<8x32xf32>
    %601 = arith.mulf %573, %589 : vector<8x32xf32>
    %602 = arith.addf %600, %601 : vector<8x32xf32>
    %603 = math.tanh %602 : vector<8x32xf32>
    %604 = arith.mulf %599, %603 : vector<8x32xf32>
    %c5_302 = arith.constant 5 : index
    %c0_303 = arith.constant 0 : index
    %c0_304 = arith.constant 0 : index
    %605 = vector.load %arg8[%c5_302, %c0_303, %c0_304] : memref<8x8x32xf32, #tpu.memory_space<vmem>>, vector<1x8x32xf32>
    %606 = vector.shape_cast %605 : vector<1x8x32xf32> to vector<8x32xf32>
    %607 = vector.shape_cast %561 : vector<8x32xf32> to vector<1x8x32xf32>
    tpu.vector_store %arg8[%c5_302, %c0_303, %c0_304], %607 {strides = array<i32>} : memref<8x8x32xf32, #tpu.memory_space<vmem>>, vector<1x8x32xf32>,
    %c2_305 = arith.constant 2 : index
    %c0_306 = arith.constant 0 : index
    %c0_307 = arith.constant 0 : index
    %608 = vector.load %arg9[%c2_305, %c0_306, %c0_307] : memref<8x8x32xf32, #tpu.memory_space<vmem>>, vector<1x8x32xf32>
    %609 = vector.shape_cast %608 : vector<1x8x32xf32> to vector<8x32xf32>
    %610 = vector.shape_cast %604 : vector<8x32xf32> to vector<1x8x32xf32>
    tpu.vector_store %arg9[%c2_305, %c0_306, %c0_307], %610 {strides = array<i32>} : memref<8x8x32xf32, #tpu.memory_space<vmem>>, vector<1x8x32xf32>,
    %c6_308 = arith.constant 6 : index
    %c0_309 = arith.constant 0 : index
    %c0_310 = arith.constant 0 : index
    %611 = vector.load %arg0[%c6_308, %c0_309, %c0_310] : memref<8x8x16xf32, #tpu.memory_space<vmem>>, vector<1x8x16xf32>
    %612 = vector.shape_cast %611 : vector<1x8x16xf32> to vector<8x16xf32>
    %cst_311 = arith.constant dense<0.000000e+00> : vector<8x32xf32>
    %613 = tpu.matmul %612, %1, %cst_311 {dimension_numbers = #tpu.dot_dimension_numbers<[1], [0], [0], [1], [0, 0, 1, 1], [], []>} : vector<8x16xf32>, vector<16x32xf32>, vector<8x32xf32> -> vector<8x32xf32>
    %cst_312 = arith.constant dense<0.000000e+00> : vector<8x32xf32>
    %614 = tpu.matmul %561, %17, %cst_312 {dimension_numbers = #tpu.dot_dimension_numbers<[1], [0], [0], [1], [0, 0, 1, 1], [], []>} : vector<8x32xf32>, vector<32x32xf32>, vector<8x32xf32> -> vector<8x32xf32>
    %615 = arith.addf %613, %614 : vector<8x32xf32>
    %616 = vector.broadcast %33 : vector<1x32xf32> to vector<8x32xf32>
    %617 = arith.addf %615, %616 : vector<8x32xf32>
    %618 = arith.negf %617 : vector<8x32xf32>
    %619 = math.exp %618 : vector<8x32xf32>
    %cst_313 = arith.constant 1.000000e+00 : f32
    %620 = vector.broadcast %cst_313 : f32 to vector<8x32xf32>
    %621 = arith.addf %620, %619 : vector<8x32xf32>
    %622 = arith.divf %620, %621 : vector<8x32xf32>
    %cst_314 = arith.constant dense<0.000000e+00> : vector<8x32xf32>
    %623 = tpu.matmul %612, %3, %cst_314 {dimension_numbers = #tpu.dot_dimension_numbers<[1], [0], [0], [1], [0, 0, 1, 1], [], []>} : vector<8x16xf32>, vector<16x32xf32>, vector<8x32xf32> -> vector<8x32xf32>
    %cst_315 = arith.constant dense<0.000000e+00> : vector<8x32xf32>
    %624 = tpu.matmul %561, %19, %cst_315 {dimension_numbers = #tpu.dot_dimension_numbers<[1], [0], [0], [1], [0, 0, 1, 1], [], []>} : vector<8x32xf32>, vector<32x32xf32>, vector<8x32xf32> -> vector<8x32xf32>
    %625 = arith.addf %623, %624 : vector<8x32xf32>
    %626 = vector.broadcast %35 : vector<1x32xf32> to vector<8x32xf32>
    %627 = arith.addf %625, %626 : vector<8x32xf32>
    %628 = arith.negf %627 : vector<8x32xf32>
    %629 = math.exp %628 : vector<8x32xf32>
    %cst_316 = arith.constant 1.000000e+00 : f32
    %630 = vector.broadcast %cst_316 : f32 to vector<8x32xf32>
    %631 = arith.addf %630, %629 : vector<8x32xf32>
    %632 = arith.divf %630, %631 : vector<8x32xf32>
    %cst_317 = arith.constant dense<0.000000e+00> : vector<8x32xf32>
    %633 = tpu.matmul %612, %5, %cst_317 {dimension_numbers = #tpu.dot_dimension_numbers<[1], [0], [0], [1], [0, 0, 1, 1], [], []>} : vector<8x16xf32>, vector<16x32xf32>, vector<8x32xf32> -> vector<8x32xf32>
    %cst_318 = arith.constant dense<0.000000e+00> : vector<8x32xf32>
    %634 = tpu.matmul %561, %21, %cst_318 {dimension_numbers = #tpu.dot_dimension_numbers<[1], [0], [0], [1], [0, 0, 1, 1], [], []>} : vector<8x32xf32>, vector<32x32xf32>, vector<8x32xf32> -> vector<8x32xf32>
    %635 = arith.addf %633, %634 : vector<8x32xf32>
    %636 = vector.broadcast %37 : vector<1x32xf32> to vector<8x32xf32>
    %637 = arith.addf %635, %636 : vector<8x32xf32>
    %638 = math.tanh %637 : vector<8x32xf32>
    %cst_319 = arith.constant dense<0.000000e+00> : vector<8x32xf32>
    %639 = tpu.matmul %612, %7, %cst_319 {dimension_numbers = #tpu.dot_dimension_numbers<[1], [0], [0], [1], [0, 0, 1, 1], [], []>} : vector<8x16xf32>, vector<16x32xf32>, vector<8x32xf32> -> vector<8x32xf32>
    %cst_320 = arith.constant dense<0.000000e+00> : vector<8x32xf32>
    %640 = tpu.matmul %561, %23, %cst_320 {dimension_numbers = #tpu.dot_dimension_numbers<[1], [0], [0], [1], [0, 0, 1, 1], [], []>} : vector<8x32xf32>, vector<32x32xf32>, vector<8x32xf32> -> vector<8x32xf32>
    %641 = arith.addf %639, %640 : vector<8x32xf32>
    %642 = vector.broadcast %39 : vector<1x32xf32> to vector<8x32xf32>
    %643 = arith.addf %641, %642 : vector<8x32xf32>
    %644 = arith.negf %643 : vector<8x32xf32>
    %645 = math.exp %644 : vector<8x32xf32>
    %cst_321 = arith.constant 1.000000e+00 : f32
    %646 = vector.broadcast %cst_321 : f32 to vector<8x32xf32>
    %647 = arith.addf %646, %645 : vector<8x32xf32>
    %648 = arith.divf %646, %647 : vector<8x32xf32>
    %649 = arith.mulf %632, %559 : vector<8x32xf32>
    %650 = arith.mulf %622, %638 : vector<8x32xf32>
    %651 = arith.addf %649, %650 : vector<8x32xf32>
    %652 = math.tanh %651 : vector<8x32xf32>
    %653 = arith.mulf %648, %652 : vector<8x32xf32>
    %c1_322 = arith.constant 1 : index
    %c0_323 = arith.constant 0 : index
    %c0_324 = arith.constant 0 : index
    %654 = vector.load %arg0[%c1_322, %c0_323, %c0_324] : memref<8x8x16xf32, #tpu.memory_space<vmem>>, vector<1x8x16xf32>
    %655 = vector.shape_cast %654 : vector<1x8x16xf32> to vector<8x16xf32>
    %cst_325 = arith.constant dense<0.000000e+00> : vector<8x32xf32>
    %656 = tpu.matmul %655, %9, %cst_325 {dimension_numbers = #tpu.dot_dimension_numbers<[1], [0], [0], [1], [0, 0, 1, 1], [], []>} : vector<8x16xf32>, vector<16x32xf32>, vector<8x32xf32> -> vector<8x32xf32>
    %cst_326 = arith.constant dense<0.000000e+00> : vector<8x32xf32>
    %657 = tpu.matmul %604, %25, %cst_326 {dimension_numbers = #tpu.dot_dimension_numbers<[1], [0], [0], [1], [0, 0, 1, 1], [], []>} : vector<8x32xf32>, vector<32x32xf32>, vector<8x32xf32> -> vector<8x32xf32>
    %658 = arith.addf %656, %657 : vector<8x32xf32>
    %659 = vector.broadcast %41 : vector<1x32xf32> to vector<8x32xf32>
    %660 = arith.addf %658, %659 : vector<8x32xf32>
    %661 = arith.negf %660 : vector<8x32xf32>
    %662 = math.exp %661 : vector<8x32xf32>
    %cst_327 = arith.constant 1.000000e+00 : f32
    %663 = vector.broadcast %cst_327 : f32 to vector<8x32xf32>
    %664 = arith.addf %663, %662 : vector<8x32xf32>
    %665 = arith.divf %663, %664 : vector<8x32xf32>
    %cst_328 = arith.constant dense<0.000000e+00> : vector<8x32xf32>
    %666 = tpu.matmul %655, %11, %cst_328 {dimension_numbers = #tpu.dot_dimension_numbers<[1], [0], [0], [1], [0, 0, 1, 1], [], []>} : vector<8x16xf32>, vector<16x32xf32>, vector<8x32xf32> -> vector<8x32xf32>
    %cst_329 = arith.constant dense<0.000000e+00> : vector<8x32xf32>
    %667 = tpu.matmul %604, %27, %cst_329 {dimension_numbers = #tpu.dot_dimension_numbers<[1], [0], [0], [1], [0, 0, 1, 1], [], []>} : vector<8x32xf32>, vector<32x32xf32>, vector<8x32xf32> -> vector<8x32xf32>
    %668 = arith.addf %666, %667 : vector<8x32xf32>
    %669 = vector.broadcast %43 : vector<1x32xf32> to vector<8x32xf32>
    %670 = arith.addf %668, %669 : vector<8x32xf32>
    %671 = arith.negf %670 : vector<8x32xf32>
    %672 = math.exp %671 : vector<8x32xf32>
    %cst_330 = arith.constant 1.000000e+00 : f32
    %673 = vector.broadcast %cst_330 : f32 to vector<8x32xf32>
    %674 = arith.addf %673, %672 : vector<8x32xf32>
    %675 = arith.divf %673, %674 : vector<8x32xf32>
    %cst_331 = arith.constant dense<0.000000e+00> : vector<8x32xf32>
    %676 = tpu.matmul %655, %13, %cst_331 {dimension_numbers = #tpu.dot_dimension_numbers<[1], [0], [0], [1], [0, 0, 1, 1], [], []>} : vector<8x16xf32>, vector<16x32xf32>, vector<8x32xf32> -> vector<8x32xf32>
    %cst_332 = arith.constant dense<0.000000e+00> : vector<8x32xf32>
    %677 = tpu.matmul %604, %29, %cst_332 {dimension_numbers = #tpu.dot_dimension_numbers<[1], [0], [0], [1], [0, 0, 1, 1], [], []>} : vector<8x32xf32>, vector<32x32xf32>, vector<8x32xf32> -> vector<8x32xf32>
    %678 = arith.addf %676, %677 : vector<8x32xf32>
    %679 = vector.broadcast %45 : vector<1x32xf32> to vector<8x32xf32>
    %680 = arith.addf %678, %679 : vector<8x32xf32>
    %681 = math.tanh %680 : vector<8x32xf32>
    %cst_333 = arith.constant dense<0.000000e+00> : vector<8x32xf32>
    %682 = tpu.matmul %655, %15, %cst_333 {dimension_numbers = #tpu.dot_dimension_numbers<[1], [0], [0], [1], [0, 0, 1, 1], [], []>} : vector<8x16xf32>, vector<16x32xf32>, vector<8x32xf32> -> vector<8x32xf32>
    %cst_334 = arith.constant dense<0.000000e+00> : vector<8x32xf32>
    %683 = tpu.matmul %604, %31, %cst_334 {dimension_numbers = #tpu.dot_dimension_numbers<[1], [0], [0], [1], [0, 0, 1, 1], [], []>} : vector<8x32xf32>, vector<32x32xf32>, vector<8x32xf32> -> vector<8x32xf32>
    %684 = arith.addf %682, %683 : vector<8x32xf32>
    %685 = vector.broadcast %47 : vector<1x32xf32> to vector<8x32xf32>
    %686 = arith.addf %684, %685 : vector<8x32xf32>
    %687 = arith.negf %686 : vector<8x32xf32>
    %688 = math.exp %687 : vector<8x32xf32>
    %cst_335 = arith.constant 1.000000e+00 : f32
    %689 = vector.broadcast %cst_335 : f32 to vector<8x32xf32>
    %690 = arith.addf %689, %688 : vector<8x32xf32>
    %691 = arith.divf %689, %690 : vector<8x32xf32>
    %692 = arith.mulf %675, %602 : vector<8x32xf32>
    %693 = arith.mulf %665, %681 : vector<8x32xf32>
    %694 = arith.addf %692, %693 : vector<8x32xf32>
    %695 = math.tanh %694 : vector<8x32xf32>
    %696 = arith.mulf %691, %695 : vector<8x32xf32>
    %c6_336 = arith.constant 6 : index
    %c0_337 = arith.constant 0 : index
    %c0_338 = arith.constant 0 : index
    %697 = vector.load %arg8[%c6_336, %c0_337, %c0_338] : memref<8x8x32xf32, #tpu.memory_space<vmem>>, vector<1x8x32xf32>
    %698 = vector.shape_cast %697 : vector<1x8x32xf32> to vector<8x32xf32>
    %699 = vector.shape_cast %653 : vector<8x32xf32> to vector<1x8x32xf32>
    tpu.vector_store %arg8[%c6_336, %c0_337, %c0_338], %699 {strides = array<i32>} : memref<8x8x32xf32, #tpu.memory_space<vmem>>, vector<1x8x32xf32>,
    %c1_339 = arith.constant 1 : index
    %c0_340 = arith.constant 0 : index
    %c0_341 = arith.constant 0 : index
    %700 = vector.load %arg9[%c1_339, %c0_340, %c0_341] : memref<8x8x32xf32, #tpu.memory_space<vmem>>, vector<1x8x32xf32>
    %701 = vector.shape_cast %700 : vector<1x8x32xf32> to vector<8x32xf32>
    %702 = vector.shape_cast %696 : vector<8x32xf32> to vector<1x8x32xf32>
    tpu.vector_store %arg9[%c1_339, %c0_340, %c0_341], %702 {strides = array<i32>} : memref<8x8x32xf32, #tpu.memory_space<vmem>>, vector<1x8x32xf32>,
    %c7_342 = arith.constant 7 : index
    %c0_343 = arith.constant 0 : index
    %c0_344 = arith.constant 0 : index
    %703 = vector.load %arg0[%c7_342, %c0_343, %c0_344] : memref<8x8x16xf32, #tpu.memory_space<vmem>>, vector<1x8x16xf32>
    %704 = vector.shape_cast %703 : vector<1x8x16xf32> to vector<8x16xf32>
    %cst_345 = arith.constant dense<0.000000e+00> : vector<8x32xf32>
    %705 = tpu.matmul %704, %1, %cst_345 {dimension_numbers = #tpu.dot_dimension_numbers<[1], [0], [0], [1], [0, 0, 1, 1], [], []>} : vector<8x16xf32>, vector<16x32xf32>, vector<8x32xf32> -> vector<8x32xf32>
    %cst_346 = arith.constant dense<0.000000e+00> : vector<8x32xf32>
    %706 = tpu.matmul %653, %17, %cst_346 {dimension_numbers = #tpu.dot_dimension_numbers<[1], [0], [0], [1], [0, 0, 1, 1], [], []>} : vector<8x32xf32>, vector<32x32xf32>, vector<8x32xf32> -> vector<8x32xf32>
    %707 = arith.addf %705, %706 : vector<8x32xf32>
    %708 = vector.broadcast %33 : vector<1x32xf32> to vector<8x32xf32>
    %709 = arith.addf %707, %708 : vector<8x32xf32>
    %710 = arith.negf %709 : vector<8x32xf32>
    %711 = math.exp %710 : vector<8x32xf32>
    %cst_347 = arith.constant 1.000000e+00 : f32
    %712 = vector.broadcast %cst_347 : f32 to vector<8x32xf32>
    %713 = arith.addf %712, %711 : vector<8x32xf32>
    %714 = arith.divf %712, %713 : vector<8x32xf32>
    %cst_348 = arith.constant dense<0.000000e+00> : vector<8x32xf32>
    %715 = tpu.matmul %704, %3, %cst_348 {dimension_numbers = #tpu.dot_dimension_numbers<[1], [0], [0], [1], [0, 0, 1, 1], [], []>} : vector<8x16xf32>, vector<16x32xf32>, vector<8x32xf32> -> vector<8x32xf32>
    %cst_349 = arith.constant dense<0.000000e+00> : vector<8x32xf32>
    %716 = tpu.matmul %653, %19, %cst_349 {dimension_numbers = #tpu.dot_dimension_numbers<[1], [0], [0], [1], [0, 0, 1, 1], [], []>} : vector<8x32xf32>, vector<32x32xf32>, vector<8x32xf32> -> vector<8x32xf32>
    %717 = arith.addf %715, %716 : vector<8x32xf32>
    %718 = vector.broadcast %35 : vector<1x32xf32> to vector<8x32xf32>
    %719 = arith.addf %717, %718 : vector<8x32xf32>
    %720 = arith.negf %719 : vector<8x32xf32>
    %721 = math.exp %720 : vector<8x32xf32>
    %cst_350 = arith.constant 1.000000e+00 : f32
    %722 = vector.broadcast %cst_350 : f32 to vector<8x32xf32>
    %723 = arith.addf %722, %721 : vector<8x32xf32>
    %724 = arith.divf %722, %723 : vector<8x32xf32>
    %cst_351 = arith.constant dense<0.000000e+00> : vector<8x32xf32>
    %725 = tpu.matmul %704, %5, %cst_351 {dimension_numbers = #tpu.dot_dimension_numbers<[1], [0], [0], [1], [0, 0, 1, 1], [], []>} : vector<8x16xf32>, vector<16x32xf32>, vector<8x32xf32> -> vector<8x32xf32>
    %cst_352 = arith.constant dense<0.000000e+00> : vector<8x32xf32>
    %726 = tpu.matmul %653, %21, %cst_352 {dimension_numbers = #tpu.dot_dimension_numbers<[1], [0], [0], [1], [0, 0, 1, 1], [], []>} : vector<8x32xf32>, vector<32x32xf32>, vector<8x32xf32> -> vector<8x32xf32>
    %727 = arith.addf %725, %726 : vector<8x32xf32>
    %728 = vector.broadcast %37 : vector<1x32xf32> to vector<8x32xf32>
    %729 = arith.addf %727, %728 : vector<8x32xf32>
    %730 = math.tanh %729 : vector<8x32xf32>
    %cst_353 = arith.constant dense<0.000000e+00> : vector<8x32xf32>
    %731 = tpu.matmul %704, %7, %cst_353 {dimension_numbers = #tpu.dot_dimension_numbers<[1], [0], [0], [1], [0, 0, 1, 1], [], []>} : vector<8x16xf32>, vector<16x32xf32>, vector<8x32xf32> -> vector<8x32xf32>
    %cst_354 = arith.constant dense<0.000000e+00> : vector<8x32xf32>
    %732 = tpu.matmul %653, %23, %cst_354 {dimension_numbers = #tpu.dot_dimension_numbers<[1], [0], [0], [1], [0, 0, 1, 1], [], []>} : vector<8x32xf32>, vector<32x32xf32>, vector<8x32xf32> -> vector<8x32xf32>
    %733 = arith.addf %731, %732 : vector<8x32xf32>
    %734 = vector.broadcast %39 : vector<1x32xf32> to vector<8x32xf32>
    %735 = arith.addf %733, %734 : vector<8x32xf32>
    %736 = arith.negf %735 : vector<8x32xf32>
    %737 = math.exp %736 : vector<8x32xf32>
    %cst_355 = arith.constant 1.000000e+00 : f32
    %738 = vector.broadcast %cst_355 : f32 to vector<8x32xf32>
    %739 = arith.addf %738, %737 : vector<8x32xf32>
    %740 = arith.divf %738, %739 : vector<8x32xf32>
    %741 = arith.mulf %724, %651 : vector<8x32xf32>
    %742 = arith.mulf %714, %730 : vector<8x32xf32>
    %743 = arith.addf %741, %742 : vector<8x32xf32>
    %744 = math.tanh %743 : vector<8x32xf32>
    %745 = arith.mulf %740, %744 : vector<8x32xf32>
    %c0_356 = arith.constant 0 : index
    %c0_357 = arith.constant 0 : index
    %c0_358 = arith.constant 0 : index
    %746 = vector.load %arg0[%c0_356, %c0_357, %c0_358] : memref<8x8x16xf32, #tpu.memory_space<vmem>>, vector<1x8x16xf32>
    %747 = vector.shape_cast %746 : vector<1x8x16xf32> to vector<8x16xf32>
    %cst_359 = arith.constant dense<0.000000e+00> : vector<8x32xf32>
    %748 = tpu.matmul %747, %9, %cst_359 {dimension_numbers = #tpu.dot_dimension_numbers<[1], [0], [0], [1], [0, 0, 1, 1], [], []>} : vector<8x16xf32>, vector<16x32xf32>, vector<8x32xf32> -> vector<8x32xf32>
    %cst_360 = arith.constant dense<0.000000e+00> : vector<8x32xf32>
    %749 = tpu.matmul %696, %25, %cst_360 {dimension_numbers = #tpu.dot_dimension_numbers<[1], [0], [0], [1], [0, 0, 1, 1], [], []>} : vector<8x32xf32>, vector<32x32xf32>, vector<8x32xf32> -> vector<8x32xf32>
    %750 = arith.addf %748, %749 : vector<8x32xf32>
    %751 = vector.broadcast %41 : vector<1x32xf32> to vector<8x32xf32>
    %752 = arith.addf %750, %751 : vector<8x32xf32>
    %753 = arith.negf %752 : vector<8x32xf32>
    %754 = math.exp %753 : vector<8x32xf32>
    %cst_361 = arith.constant 1.000000e+00 : f32
    %755 = vector.broadcast %cst_361 : f32 to vector<8x32xf32>
    %756 = arith.addf %755, %754 : vector<8x32xf32>
    %757 = arith.divf %755, %756 : vector<8x32xf32>
    %cst_362 = arith.constant dense<0.000000e+00> : vector<8x32xf32>
    %758 = tpu.matmul %747, %11, %cst_362 {dimension_numbers = #tpu.dot_dimension_numbers<[1], [0], [0], [1], [0, 0, 1, 1], [], []>} : vector<8x16xf32>, vector<16x32xf32>, vector<8x32xf32> -> vector<8x32xf32>
    %cst_363 = arith.constant dense<0.000000e+00> : vector<8x32xf32>
    %759 = tpu.matmul %696, %27, %cst_363 {dimension_numbers = #tpu.dot_dimension_numbers<[1], [0], [0], [1], [0, 0, 1, 1], [], []>} : vector<8x32xf32>, vector<32x32xf32>, vector<8x32xf32> -> vector<8x32xf32>
    %760 = arith.addf %758, %759 : vector<8x32xf32>
    %761 = vector.broadcast %43 : vector<1x32xf32> to vector<8x32xf32>
    %762 = arith.addf %760, %761 : vector<8x32xf32>
    %763 = arith.negf %762 : vector<8x32xf32>
    %764 = math.exp %763 : vector<8x32xf32>
    %cst_364 = arith.constant 1.000000e+00 : f32
    %765 = vector.broadcast %cst_364 : f32 to vector<8x32xf32>
    %766 = arith.addf %765, %764 : vector<8x32xf32>
    %767 = arith.divf %765, %766 : vector<8x32xf32>
    %cst_365 = arith.constant dense<0.000000e+00> : vector<8x32xf32>
    %768 = tpu.matmul %747, %13, %cst_365 {dimension_numbers = #tpu.dot_dimension_numbers<[1], [0], [0], [1], [0, 0, 1, 1], [], []>} : vector<8x16xf32>, vector<16x32xf32>, vector<8x32xf32> -> vector<8x32xf32>
    %cst_366 = arith.constant dense<0.000000e+00> : vector<8x32xf32>
    %769 = tpu.matmul %696, %29, %cst_366 {dimension_numbers = #tpu.dot_dimension_numbers<[1], [0], [0], [1], [0, 0, 1, 1], [], []>} : vector<8x32xf32>, vector<32x32xf32>, vector<8x32xf32> -> vector<8x32xf32>
    %770 = arith.addf %768, %769 : vector<8x32xf32>
    %771 = vector.broadcast %45 : vector<1x32xf32> to vector<8x32xf32>
    %772 = arith.addf %770, %771 : vector<8x32xf32>
    %773 = math.tanh %772 : vector<8x32xf32>
    %cst_367 = arith.constant dense<0.000000e+00> : vector<8x32xf32>
    %774 = tpu.matmul %747, %15, %cst_367 {dimension_numbers = #tpu.dot_dimension_numbers<[1], [0], [0], [1], [0, 0, 1, 1], [], []>} : vector<8x16xf32>, vector<16x32xf32>, vector<8x32xf32> -> vector<8x32xf32>
    %cst_368 = arith.constant dense<0.000000e+00> : vector<8x32xf32>
    %775 = tpu.matmul %696, %31, %cst_368 {dimension_numbers = #tpu.dot_dimension_numbers<[1], [0], [0], [1], [0, 0, 1, 1], [], []>} : vector<8x32xf32>, vector<32x32xf32>, vector<8x32xf32> -> vector<8x32xf32>
    %776 = arith.addf %774, %775 : vector<8x32xf32>
    %777 = vector.broadcast %47 : vector<1x32xf32> to vector<8x32xf32>
    %778 = arith.addf %776, %777 : vector<8x32xf32>
    %779 = arith.negf %778 : vector<8x32xf32>
    %780 = math.exp %779 : vector<8x32xf32>
    %cst_369 = arith.constant 1.000000e+00 : f32
    %781 = vector.broadcast %cst_369 : f32 to vector<8x32xf32>
    %782 = arith.addf %781, %780 : vector<8x32xf32>
    %783 = arith.divf %781, %782 : vector<8x32xf32>
    %784 = arith.mulf %767, %694 : vector<8x32xf32>
    %785 = arith.mulf %757, %773 : vector<8x32xf32>
    %786 = arith.addf %784, %785 : vector<8x32xf32>
    %787 = math.tanh %786 : vector<8x32xf32>
    %788 = arith.mulf %783, %787 : vector<8x32xf32>
    %c7_370 = arith.constant 7 : index
    %c0_371 = arith.constant 0 : index
    %c0_372 = arith.constant 0 : index
    %789 = vector.load %arg8[%c7_370, %c0_371, %c0_372] : memref<8x8x32xf32, #tpu.memory_space<vmem>>, vector<1x8x32xf32>
    %790 = vector.shape_cast %789 : vector<1x8x32xf32> to vector<8x32xf32>
    %791 = vector.shape_cast %745 : vector<8x32xf32> to vector<1x8x32xf32>
    tpu.vector_store %arg8[%c7_370, %c0_371, %c0_372], %791 {strides = array<i32>} : memref<8x8x32xf32, #tpu.memory_space<vmem>>, vector<1x8x32xf32>,
    %c0_373 = arith.constant 0 : index
    %c0_374 = arith.constant 0 : index
    %c0_375 = arith.constant 0 : index
    %792 = vector.load %arg9[%c0_373, %c0_374, %c0_375] : memref<8x8x32xf32, #tpu.memory_space<vmem>>, vector<1x8x32xf32>
    %793 = vector.shape_cast %792 : vector<1x8x32xf32> to vector<8x32xf32>
    %794 = vector.shape_cast %788 : vector<8x32xf32> to vector<1x8x32xf32>
    tpu.vector_store %arg9[%c0_373, %c0_374, %c0_375], %794 {strides = array<i32>} : memref<8x8x32xf32, #tpu.memory_space<vmem>>, vector<1x8x32xf32>,
    %cst_376 = arith.constant dense<0.000000e+00> : vector<8x32xf32>
    %795 = tpu.matmul %745, %49, %cst_376 {dimension_numbers = #tpu.dot_dimension_numbers<[1], [0], [0], [1], [0, 0, 1, 1], [], []>} : vector<8x32xf32>, vector<32x32xf32>, vector<8x32xf32> -> vector<8x32xf32>
    %cst_377 = arith.constant dense<0.000000e+00> : vector<8x32xf32>
    %796 = tpu.matmul %788, %51, %cst_377 {dimension_numbers = #tpu.dot_dimension_numbers<[1], [0], [0], [1], [0, 0, 1, 1], [], []>} : vector<8x32xf32>, vector<32x32xf32>, vector<8x32xf32> -> vector<8x32xf32>
    %797 = arith.addf %795, %796 : vector<8x32xf32>
    %798 = vector.broadcast %56 : vector<1x32xf32> to vector<8x32xf32>
    %799 = arith.addf %797, %798 : vector<8x32xf32>
    %800 = math.tanh %799 : vector<8x32xf32>
    %c0_378 = arith.constant 0 : index
    %c0_379 = arith.constant 0 : index
    %801 = vector.load %arg10[%c0_378, %c0_379] : memref<8x32xf32, #tpu.memory_space<vmem>>, vector<8x32xf32>
    tpu.vector_store %arg10[%c0_378, %c0_379], %800 {strides = array<i32>} : memref<8x32xf32, #tpu.memory_space<vmem>>, vector<8x32xf32>,
    %cst_380 = arith.constant dense<0.000000e+00> : vector<8x32xf32>
    %802 = tpu.matmul %743, %53, %cst_380 {dimension_numbers = #tpu.dot_dimension_numbers<[1], [0], [0], [1], [0, 0, 1, 1], [], []>} : vector<8x32xf32>, vector<32x32xf32>, vector<8x32xf32> -> vector<8x32xf32>
    %cst_381 = arith.constant dense<0.000000e+00> : vector<8x32xf32>
    %803 = tpu.matmul %786, %55, %cst_381 {dimension_numbers = #tpu.dot_dimension_numbers<[1], [0], [0], [1], [0, 0, 1, 1], [], []>} : vector<8x32xf32>, vector<32x32xf32>, vector<8x32xf32> -> vector<8x32xf32>
    %804 = arith.addf %802, %803 : vector<8x32xf32>
    %805 = vector.broadcast %57 : vector<1x32xf32> to vector<8x32xf32>
    %806 = arith.addf %804, %805 : vector<8x32xf32>
    %807 = math.tanh %806 : vector<8x32xf32>
    %c0_382 = arith.constant 0 : index
    %c0_383 = arith.constant 0 : index
    %808 = vector.load %arg11[%c0_382, %c0_383] : memref<8x32xf32, #tpu.memory_space<vmem>>, vector<8x32xf32>
    tpu.vector_store %arg11[%c0_382, %c0_383], %807 {strides = array<i32>} : memref<8x32xf32, #tpu.memory_space<vmem>>, vector<8x32xf32>,
    return
  }
}

</mosaic_0001>

<bundles_post_ra>
// kernel: encoder_forward.1
= control target key start
LH: loop header
LB: loop body
LE: loop exit
PB: predicated region body
PF: predicated region fallthrough
CT: control target
= control target key end

     0   :  { %17 = vsyncpa [#allocation3], 0  ;;  %s14566_s0 = inlined_call_operand.hbm [shape: f32[8,8,16], index: 0, kind: input, shape index: {}]   ;;  %s14567_s1 = inlined_call_operand.hbm [shape: f32[2,4,16,32], index: 1, kind: input, shape index: {}]   ;;  %s14568_s2 = inlined_call_operand.hbm [shape: f32[2,4,32,32], index: 2, kind: input, shape index: {}]   ;;  %s14569_s3 = inlined_call_operand.hbm [shape: f32[2,4,1,32], index: 3, kind: input, shape index: {}]   ;;  %s14570_s4 = inlined_call_operand.hbm [shape: f32[2,32,32], index: 4, kind: input, shape index: {}]   ;;  %s14571_s5 = inlined_call_operand.vmem [shape: f32[1,32], index: 5, kind: input, shape index: {}]   ;;  %s14572_s6 = inlined_call_operand.hbm [shape: f32[2,32,32], index: 6, kind: input, shape index: {}]   ;;  %s14573_s7 = inlined_call_operand.vmem [shape: f32[1,32], index: 7, kind: input, shape index: {}]   ;;  %s14574_s8 = inlined_call_operand.vmem [shape: f32[8,8,32], index: 8, kind: output, shape index: {0}]   ;;  %s14575_s9 = inlined_call_operand.vmem [shape: f32[8,8,32], index: 9, kind: output, shape index: {1}]   ;;  %s14576_s10 = inlined_call_operand.hbm [shape: f32[8,32], index: 10, kind: output, shape index: {2}]   ;;  %s14577_s11 = inlined_call_operand.hbm [shape: f32[8,32], index: 11, kind: output, shape index: {3}]  }
   0x1   :  { %18 = vsyncpa [#allocation6], 0 }
   0x2   :  { %19 = vsyncpa [#allocation9], 0 }
   0x3   :  { %20 = vsyncpa [#allocation12], 0 }
   0x4   :  { %21 = vsyncpa [#allocation4], 0 }
   0x5   :  { %22 = vsyncpa [#allocation15], 0  ;;  %s12650_s17 = smov [#allocation5]   ;;  %s12651_s19 = smov [#allocation8]  }
   0x6   :  { %s40_s18 = sshll.u32 %s12650_s17, 4  ;;  %s64_s20 = sshll.u32 %s12651_s19, 4  ;;  %s41_s18 = int_to_ptr.vmem [resolvable:$true] %s40_s18  ;;  %s65_s20 = int_to_ptr.vmem [resolvable:$true] %s64_s20 }
   0x7   :  { %s12486_s21 = scalar_lea.vmem %s41_s18, 2048  ;;  %p12491_p1 = scmp.lt.s32.totalorder %s41_s18, %s41_s18 }
   0x8   :  { %p12487_p0 = scmp.ne.s32.totalorder %s41_s18, %s12486_s21  ;;  %p12492_p2 = scmp.lt.s32.totalorder %s12486_s21, %s12486_s21 }
   0xa   :  { %p12493_p3 = por %p12492_p2, %p12491_p1 }
   0xc   :  { %p12494_p4 = pnand %p12493_p3, %p12487_p0 }
   0xe   :  { %12497 = shalt.err (!%p12494_p4)
}
   0xf   :  { %s12652_s22 = smov 128   ;;  %s12653_s23 = smov 8  }
  0x10   :  { %46 = dma.hbm_to_vmem [thread:$0]  %s14567_s1, 2048, %s41_s18, [#allocation6], %s12652_s22, %s12652_s22, %s12653_s23  }
  0x11   :  { %s12506_s26 = scalar_lea.vmem %s65_s20, 128  ;;  %p12511_p6 = scmp.lt.s32.totalorder %s65_s20, %s65_s20 }
  0x12   :  { %p12507_p5 = scmp.ne.s32.totalorder %s65_s20, %s12506_s26  ;;  %p12512_p7 = scmp.lt.s32.totalorder %s12506_s26, %s12506_s26 }
  0x14   :  { %p12513_p8 = por %p12512_p7, %p12511_p6 }
  0x16   :  { %p12514_p9 = pnand %p12513_p8, %p12507_p5 }
  0x18   :  { %12517 = shalt.err (!%p12514_p9)
}
  0x19   :  { %s12654_s27 = smov 16   ;;  %s12655_s28 = smov 1  }
  0x1a   :  { %70 = dma.hbm_to_vmem [thread:$0]  %s14569_s3, 128, %s65_s20, [#allocation9], %s12654_s27, %s12654_s27, %s12655_s28  }
  0x1b   :  { %s12656_s12 = smov [#allocation2]   ;;  %s12657_s14 = smov [#allocation7]  }
  0x1c   :  { %s28_s13 = sshll.u32 %s12656_s12, 4  ;;  %s52_s15 = sshll.u32 %s12657_s14, 4  ;;  %s29_s13 = int_to_ptr.vmem [resolvable:$true] %s28_s13  ;;  %s53_s15 = int_to_ptr.vmem [resolvable:$true] %s52_s15 }
  0x1d   :  { %s12526_s1 = scalar_lea.vmem %s29_s13, 1024  ;;  %p12531_p11 = scmp.lt.s32.totalorder %s29_s13, %s29_s13 }
  0x1e   :  { %p12527_p10 = scmp.ne.s32.totalorder %s29_s13, %s12526_s1  ;;  %p12532_p12 = scmp.lt.s32.totalorder %s12526_s1, %s12526_s1 }
  0x20   :  { %p12533_p13 = por %p12532_p12, %p12531_p11 }
  0x22   :  { %p12534_p0 = pnand %p12533_p13, %p12527_p10 }
  0x24   :  { %12537 = shalt.err (!%p12534_p0)
}
  0x25   :  { %34 = dma.hbm_to_vmem [thread:$0]  %s14566_s0, 1024, %s29_s13, [#allocation3], %s12652_s22, %s12652_s22, %s12653_s23  }
  0x26   :  { %s12546_s3 = scalar_lea.vmem %s53_s15, 4096  ;;  %p12551_p2 = scmp.lt.s32.totalorder %s53_s15, %s53_s15 }
  0x27   :  { %p12547_p1 = scmp.ne.s32.totalorder %s53_s15, %s12546_s3  ;;  %p12552_p3 = scmp.lt.s32.totalorder %s12546_s3, %s12546_s3 }
  0x29   :  { %p12553_p4 = por %p12552_p3, %p12551_p2 }
  0x2b   :  { %p12554_p5 = pnand %p12553_p4, %p12547_p1 }
  0x2d   :  { %12557 = shalt.err (!%p12554_p5)
}
  0x2e   :  { %58 = dma.hbm_to_vmem [thread:$0]  %s14568_s2, 4096, %s53_s15, [#allocation6], %s12652_s22, %s12652_s22, %s12653_s23  }
  0x2f   :  { %s12658_s20 = smov [#allocation10]   ;;  %s12659_s24 = smov [#allocation11]  }
  0x30   :  { %s76_s21 = sshll.u32 %s12658_s20, 4  ;;  %s90_s25 = sshll.u32 %s12659_s24, 4  ;;  %s77_s21 = int_to_ptr.vmem [resolvable:$true] %s76_s21  ;;  %s91_s25 = int_to_ptr.vmem [resolvable:$true] %s90_s25 }
  0x31   :  { %s12566_s0 = scalar_lea.vmem %s77_s21, 1024  ;;  %p12571_p7 = scmp.lt.s32.totalorder %s77_s21, %s77_s21 }
  0x32   :  { %p12567_p6 = scmp.ne.s32.totalorder %s77_s21, %s12566_s0  ;;  %p12572_p8 = scmp.lt.s32.totalorder %s12566_s0, %s12566_s0 }
  0x34   :  { %p12573_p9 = por %p12572_p8, %p12571_p7 }
  0x36   :  { %p12574_p10 = pnand %p12573_p9, %p12567_p6 }
  0x38   :  { %12577 = shalt.err (!%p12574_p10)
}
  0x39   :  { %82 = dma.hbm_to_vmem [thread:$0]  %s14570_s4, 1024, %s77_s21, [#allocation9], %s12652_s22, %s12652_s22, %s12653_s23  }
  0x3a   :  { %s12586_s2 = scalar_lea.vmem %s91_s25, 1024  ;;  %p12591_p12 = scmp.lt.s32.totalorder %s91_s25, %s91_s25 }
  0x3b   :  { %p12587_p11 = scmp.ne.s32.totalorder %s91_s25, %s12586_s2  ;;  %p12592_p13 = scmp.lt.s32.totalorder %s12586_s2, %s12586_s2 }
  0x3d   :  { %p12593_p0 = por %p12592_p13, %p12591_p12 }
  0x3f   :  { %p12594_p1 = pnand %p12593_p0, %p12587_p11 }
  0x41   :  { %12597 = shalt.err (!%p12594_p1)
}
  0x42   :  { %96 = dma.hbm_to_vmem [thread:$0]  %s14572_s6, 1024, %s91_s25, [#allocation12], %s12652_s22, %s12652_s22, %s12653_s23  }
  0x43   :  { %12638 = dma.done.wait [#allocation3], 1024  }
  0x44   :  { %12639 = vsyncadd [#allocation3], 4294966272 }
  0x45   :  { %12640 = dma.done.wait [#allocation6], 6144  }
  0x46   :  { %12641 = vsyncadd [#allocation6], 4294961152 }
  0x47   :  { %12642 = dma.done.wait [#allocation9], 1152  }
  0x48   :  { %12643 = vsyncadd [#allocation9], 4294966144 }
  0x49   :  { %12644 = dma.done.wait [#allocation12], 1024  }
  0x4a   :  { %12645 = vsyncadd [#allocation12], 4294966272  ;;  %v14578_v0 = vmov 0.0   ;;  %vm12661_vm0 = vmmov 0   ;;  %v12763_v1 = vld [vmem:[#allocation7 + $0x18] sm:$0xff]  ;;  %v12765_v2 = vld [vmem:[#allocation5 + $0x8] sm:$0xff] }
  0x4b   :  { %10896 = vmatprep.subr.mxu0 %v14578_v0  ;;  %10907 = vmatprep.subr.mxu1 %v14578_v0  ;;  %v12767_v3 = vld [vmem:[#allocation7 + $0x10] sm:$0xff]  ;;  %v12771_v4 = vld [vmem:[#allocation5] sm:$0xff]  ;;  %vm289_vm1 = vcmask 130048   ;;  %v12777_v6 = vld [vmem:[#allocation7 + $0x8] sm:$0xff]  ;;  %vm215_vm2 = vcmask 261120   ;;  %s12662_s1 = smov [#allocation13]  }
  0x4c   :  { %10911 = vmatprep.mubr.msk.f32.mxu1 %vm12661_vm0, %v14578_v0  ;;  %10904 = vmatprep.mubr.msk.f32.mxu0 %vm12661_vm0, %v14578_v0  ;;  %v12773_v5 = vld [vmem:[#allocation2] sm:$0xff]  ;;  %v12781_v7 = vld [vmem:[#allocation7 + $0x38] sm:$0xff]  ;;  %v12790_v9 = vld [vmem:[#allocation7 + $0x30] sm:$0xff]  ;;  %s10138_s16 = sshll.u32 %s12662_s1, 4  ;;  %s10139_s16 = int_to_ptr.vmem [resolvable:$true] %s10138_s16 }
  0x4d   :  { %10897 = vmatpush3.msra.mxu0 %v12763_v1  ;;  %10908 = vmatpush3.msra.mxu1 %v12765_v2  ;;  %14627 = vst [vmem:[#allocation22_spill] sm:$0xff] %v12781_v7  ;;  %v12786_v8 = vld [vmem:[#allocation7] sm:$0xff]  ;;  %14628 = vst [vmem:[#allocation23_spill] sm:$0xff] %v12790_v9  ;;  %v12796_v10 = vld [vmem:[#allocation7 + $0x28] sm:$0xff]  ;;  %p12603_p3 = scmp.lt.s32.totalorder %s10139_s16, %s10139_s16 }
  0x4e   :  { %10898 = vmatprep.subr.mxu0 %v14578_v0  ;;  %10909 = vmatprep.subr.mxu1 %v14578_v0  ;;  %14629 = vst [vmem:[#allocation24_spill] sm:$0xff] %v12796_v10  ;;  %v12798_v11 = vld [vmem:[#allocation5 + $0x18] sm:$0xff]  ;;  %v12804_v12 = vld [vmem:[#allocation7 + $0x20] sm:$0xff]  ;;  %v12808_v13 = vld [vmem:[#allocation5 + $0x10] sm:$0xff] }
  0x4f   :  { %10899 = vmatpush3.msra.mxu0 %v12767_v3  ;;  %10910 = vmatpush3.msra.mxu1 %v12771_v4  ;;  %14630 = vst [vmem:[#allocation25_spill] sm:$0xff] %v12804_v12  ;;  %v12818_v14 = vld [vmem:[#allocation7 + $0x58] sm:$0xff]  ;;  %v12820_v15 = vld [vmem:[#allocation5 + $0x28] sm:$0xff]  ;;  %v12827_v16 = vld [vmem:[#allocation7 + $0x50] sm:$0xff] }
  0x50   :  { %10900 = vmatprep.subr.mxu0 %v14578_v0  ;;  %10912 = vmatmul.mubr.msk.f32.vlgmr.msra.gmra.mxu1 %vm289_vm1, %v12773_v5  ;;  %v12829_v17 = vld [vmem:[#allocation5 + $0x20] sm:$0xff]  ;;  %v12837_v18 = vld [vmem:[#allocation7 + $0x48] sm:$0xff]  ;;  %v12839_v19 = vld [vmem:[#allocation7 + $0x78] sm:$0xff] }
  0x51   :  { %10914 = vmatprep.subr.mxu1 %v14578_v0  ;;  %10901 = vmatpush3.msra.mxu0 %v12777_v6  ;;  %v12847_v20 = vld [vmem:[#allocation7 + $0x40] sm:$0xff]  ;;  %v12851_v21 = vld [vmem:[#allocation7 + $0x70] sm:$0xff]  ;;  %v12858_v22 = vld [vmem:[#allocation7 + $0x68] sm:$0xff] }
  0x52   :  { %10915 = vmatpush3.msra.mxu1 %v12781_v7  ;;  %10902 = vmatprep.subr.mxu0 %v14578_v0  ;;  %v12860_v23 = vld [vmem:[#allocation5 + $0x38] sm:$0xff]  ;;  %v12866_v24 = vld [vmem:[#allocation7 + $0x60] sm:$0xff]  ;;  %v12870_v25 = vld [vmem:[#allocation5 + $0x30] sm:$0xff] }
  0x53   :  { %10916 = vmatprep.subr.mxu1 %v14578_v0  ;;  %10903 = vmatpush3.msra.mxu0 %v12786_v8  ;;  %v12880_v26 = vld [vmem:[#allocation7 + $0x98] sm:$0xff]  ;;  %v12882_v27 = vld [vmem:[#allocation5 + $0x48] sm:$0xff]  ;;  %v12889_v28 = vld [vmem:[#allocation7 + $0x90] sm:$0xff] }
  0x54   :  { %10917 = vmatpush3.msra.mxu1 %v12790_v9  ;;  %10905 = vmatmul.mubr.f32.vlgmr.msra.gmra.mxu0 %v14578_v0  ;;  %v12891_v29 = vld [vmem:[#allocation5 + $0x40] sm:$0xff]  ;;  %v12897_v30 = vld [vmem:[#allocation2 + $0x38] sm:$0xff]  ;;  %v12901_v31 = vld [vmem:[#allocation7 + $0x88] sm:$0xff] }
  0x55   :  { %10918 = vmatprep.subr.mxu1 %v14578_v0  ;;  %10925 = vmatprep.subr.mxu0 %v14578_v0  ;;  %v12903_v32 = vld [vmem:[#allocation7 + $0xb8] sm:$0xff]  ;;  %v12911_v33 = vld [vmem:[#allocation7 + $0x80] sm:$0xff]  ;;  %v12915_v34 = vld [vmem:[#allocation7 + $0xb0] sm:$0xff] }
  0x56   :  { %10919 = vmatpush3.msra.mxu1 %v12796_v10  ;;  %10926 = vmatpush3.msra.mxu0 %v12798_v11  ;;  %v12922_v35 = vld [vmem:[#allocation7 + $0xa8] sm:$0xff]  ;;  %v12924_v36 = vld [vmem:[#allocation5 + $0x58] sm:$0xff]  ;;  %v12930_v37 = vld [vmem:[#allocation7 + $0xa0] sm:$0xff] }
  0x57   :  { %10920 = vmatprep.subr.mxu1 %v14578_v0  ;;  %10927 = vmatprep.subr.mxu0 %v14578_v0  ;;  %v12934_v38 = vld [vmem:[#allocation5 + $0x50] sm:$0xff]  ;;  %v12944_v39 = vld [vmem:[#allocation7 + $0xd8] sm:$0xff]  ;;  %v12946_v40 = vld [vmem:[#allocation5 + $0x68] sm:$0xff] }
  0x58   :  { %10921 = vmatpush3.msra.mxu1 %v12804_v12  ;;  %10922 = vmatprep.mubr.msk.f32.mxu1 %vm12661_vm0, %v14578_v0  ;;  %v12953_v41 = vld [vmem:[#allocation7 + $0xd0] sm:$0xff]  ;;  %v12955_v42 = vld [vmem:[#allocation5 + $0x60] sm:$0xff]  ;;  %v12961_v43 = vld [vmem:[#allocation7 + $0xc8] sm:$0xff] }
  0x59   :  { %10928 = vmatpush3.msra.mxu0 %v12808_v13  ;;  %10929 = vmatprep.mubr.msk.f32.mxu0 %vm12661_vm0, %v14578_v0  ;;  %v12968_v44 = vld [vmem:[#allocation7 + $0xf8] sm:$0xff]  ;;  %v12970_v45 = vld [vmem:[#allocation7 + $0xc0] sm:$0xff]  ;;  %v12977_v46 = vld [vmem:[#allocation7 + $0xf0] sm:$0xff] }
  0x5a   :  { %10923 = vmatmul.mubr.f32.vlgmr.msra.gmra.mxu1 %v14578_v0  ;;  %10930 = vmatmul.mubr.msk.f32.vlgmr.msra.gmra.mxu0 %vm289_vm1, %v12773_v5  ;;  %v12984_v47 = vld [vmem:[#allocation7 + $0xe8] sm:$0xff]  ;;  %v12986_v48 = vld [vmem:[#allocation5 + $0x78] sm:$0xff]  ;;  %v12992_v49 = vld [vmem:[#allocation7 + $0xe0] sm:$0xff] }
  0x5b   :  { %10932 = vmatprep.subr.mxu0 %v14578_v0  ;;  %10943 = vmatprep.subr.mxu1 %v14578_v0  ;;  %14631 = vst [vmem:[#allocation26_spill] sm:$0xff] %v12986_v48  ;;  %v12996_v50 = vld [vmem:[#allocation5 + $0x70] sm:$0xff]  ;;  %v13027_v51 = vld [vmem:[#allocation2 + $0x8] sm:$0xff]  ;;  %v13041_v54 = vld [vmem:[#allocation8] ss:$0 sm:$0xff] }
  0x5c   :  { %10933 = vmatpush3.msra.mxu0 %v12818_v14  ;;  %10944 = vmatpush3.msra.mxu1 %v12820_v15  ;;  %14632 = vst [vmem:[#allocation27_spill] sm:$0xff] %v12996_v50  ;;  %14633 = vst [vmem:[#allocation28_spill] sm:$0xff] %v13041_v54  ;;  %v13044_v61 = vld [vmem:[#allocation8 + $0x1] ss:$0 sm:$0xff] }
  0x5d   :  { %10934 = vmatprep.subr.mxu0 %v14578_v0  ;;  %10945 = vmatprep.subr.mxu1 %v14578_v0  ;;  %14634 = vst [vmem:[#allocation29_spill] sm:$0xff] %v13044_v61 }
  0x5e   :  { %10935 = vmatpush3.msra.mxu0 %v12827_v16  ;;  %10946 = vmatpush3.msra.mxu1 %v12829_v17 }
  0x5f   :  { %10947 = vmatprep.mubr.msk.f32.mxu1 %vm12661_vm0, %v14578_v0  ;;  %10936 = vmatprep.subr.mxu0 %v14578_v0 }
  0x60   :  { %10948 = vmatmul.mubr.msk.f32.vlgmr.msra.gmra.mxu1 %vm289_vm1, %v12773_v5  ;;  %10950 = vmatprep.subr.mxu1 %v14578_v0 }
  0x61   :  { %10937 = vmatpush3.msra.mxu0 %v12837_v18  ;;  %10951 = vmatpush3.msra.mxu1 %v12839_v19 }
  0x62   :  { %10938 = vmatprep.subr.mxu0 %v14578_v0  ;;  %10952 = vmatprep.subr.mxu1 %v14578_v0 }
  0x63   :  { %10939 = vmatpush3.msra.mxu0 %v12847_v20  ;;  %10940 = vmatprep.mubr.msk.f32.mxu0 %vm12661_vm0, %v14578_v0 }
  0x64   :  { %10953 = vmatpush3.msra.mxu1 %v12851_v21  ;;  %10941 = vmatmul.mubr.f32.vlgmr.msra.gmra.mxu0 %v14578_v0 }
  0x65   :  { %10954 = vmatprep.subr.mxu1 %v14578_v0  ;;  %10961 = vmatprep.subr.mxu0 %v14578_v0 }
  0x66   :  { %10955 = vmatpush3.msra.mxu1 %v12858_v22  ;;  %10962 = vmatpush3.msra.mxu0 %v12860_v23 }
  0x67   :  { %10956 = vmatprep.subr.mxu1 %v14578_v0  ;;  %10963 = vmatprep.subr.mxu0 %v14578_v0 }
  0x68   :  { %10957 = vmatpush3.msra.mxu1 %v12866_v24  ;;  %10958 = vmatprep.mubr.msk.f32.mxu1 %vm12661_vm0, %v14578_v0 }
  0x69   :  { %10964 = vmatpush3.msra.mxu0 %v12870_v25  ;;  %10965 = vmatprep.mubr.msk.f32.mxu0 %vm12661_vm0, %v14578_v0 }
  0x6a   :  { %10959 = vmatmul.mubr.f32.vlgmr.msra.gmra.mxu1 %v14578_v0  ;;  %10966 = vmatmul.mubr.msk.f32.vlgmr.msra.gmra.mxu0 %vm289_vm1, %v12773_v5 }
  0x6b   :  { %10968 = vmatprep.subr.mxu0 %v14578_v0  ;;  %10979 = vmatprep.subr.mxu1 %v14578_v0 }
  0x6c   :  { %10969 = vmatpush3.msra.mxu0 %v12880_v26  ;;  %10980 = vmatpush3.msra.mxu1 %v12882_v27 }
  0x6d   :  { %10970 = vmatprep.subr.mxu0 %v14578_v0  ;;  %10981 = vmatprep.subr.mxu1 %v14578_v0 }
  0x6e   :  { %10971 = vmatpush3.msra.mxu0 %v12889_v28  ;;  %10982 = vmatpush3.msra.mxu1 %v12891_v29 }
  0x6f   :  { %10983 = vmatprep.mubr.msk.f32.mxu1 %vm12661_vm0, %v14578_v0  ;;  %10972 = vmatprep.subr.mxu0 %v14578_v0 }
  0x70   :  { %10984 = vmatmul.mubr.msk.f32.vlgmr.msra.gmra.mxu1 %vm289_vm1, %v12897_v30  ;;  %10986 = vmatprep.subr.mxu1 %v14578_v0 }
  0x71   :  { %10973 = vmatpush3.msra.mxu0 %v12901_v31  ;;  %10987 = vmatpush3.msra.mxu1 %v12903_v32 }
  0x72   :  { %10974 = vmatprep.subr.mxu0 %v14578_v0  ;;  %10988 = vmatprep.subr.mxu1 %v14578_v0 }
  0x73   :  { %10975 = vmatpush3.msra.mxu0 %v12911_v33  ;;  %10976 = vmatprep.mubr.msk.f32.mxu0 %vm12661_vm0, %v14578_v0 }
  0x74   :  { %10989 = vmatpush3.msra.mxu1 %v12915_v34  ;;  %10977 = vmatmul.mubr.f32.vlgmr.msra.gmra.mxu0 %v14578_v0 }
  0x75   :  { %10990 = vmatprep.subr.mxu1 %v14578_v0  ;;  %10997 = vmatprep.subr.mxu0 %v14578_v0 }
  0x76   :  { %10991 = vmatpush3.msra.mxu1 %v12922_v35  ;;  %10998 = vmatpush3.msra.mxu0 %v12924_v36 }
  0x77   :  { %10992 = vmatprep.subr.mxu1 %v14578_v0  ;;  %10999 = vmatprep.subr.mxu0 %v14578_v0 }
  0x78   :  { %10993 = vmatpush3.msra.mxu1 %v12930_v37  ;;  %10994 = vmatprep.mubr.msk.f32.mxu1 %vm12661_vm0, %v14578_v0 }
  0x79   :  { %11000 = vmatpush3.msra.mxu0 %v12934_v38  ;;  %11001 = vmatprep.mubr.msk.f32.mxu0 %vm12661_vm0, %v14578_v0 }
  0x7a   :  { %10995 = vmatmul.mubr.f32.vlgmr.msra.gmra.mxu1 %v14578_v0  ;;  %11002 = vmatmul.mubr.msk.f32.vlgmr.msra.gmra.mxu0 %vm289_vm1, %v12897_v30 }
  0x7b   :  { %11004 = vmatprep.subr.mxu0 %v14578_v0  ;;  %11015 = vmatprep.subr.mxu1 %v14578_v0 }
  0x7c   :  { %11005 = vmatpush3.msra.mxu0 %v12944_v39  ;;  %11016 = vmatpush3.msra.mxu1 %v12946_v40 }
  0x7d   :  { %11006 = vmatprep.subr.mxu0 %v14578_v0  ;;  %11017 = vmatprep.subr.mxu1 %v14578_v0 }
  0x7e   :  { %11007 = vmatpush3.msra.mxu0 %v12953_v41  ;;  %11018 = vmatpush3.msra.mxu1 %v12955_v42 }
  0x7f   :  { %11008 = vmatprep.subr.mxu0 %v14578_v0  ;;  %11019 = vmatprep.mubr.msk.f32.mxu1 %vm12661_vm0, %v14578_v0 }
  0x80   :  { %11009 = vmatpush3.msra.mxu0 %v12961_v43  ;;  %11022 = vmatprep.subr.mxu1 %v14578_v0 }
  0x81   :  { %11010 = vmatprep.subr.mxu0 %v14578_v0  ;;  %11020 = vmatmul.mubr.msk.f32.vlgmr.msra.gmra.mxu1 %vm289_vm1, %v12897_v30 }
  0x82   :  { %11023 = vmatpush3.msra.mxu1 %v12968_v44  ;;  %11011 = vmatpush3.msra.mxu0 %v12970_v45 }
  0x83   :  { %11012 = vmatprep.mubr.msk.f32.mxu0 %vm12661_vm0, %v14578_v0  ;;  %11024 = vmatprep.subr.mxu1 %v14578_v0 }
  0x84   :  { %11013 = vmatmul.mubr.f32.vlgmr.msra.gmra.mxu0 %v14578_v0  ;;  %11025 = vmatpush3.msra.mxu1 %v12977_v46 }
  0x85   :  { %11026 = vmatprep.subr.mxu1 %v14578_v0  ;;  %11033 = vmatprep.subr.mxu0 %v14578_v0 }
  0x86   :  { %11027 = vmatpush3.msra.mxu1 %v12984_v47  ;;  %11034 = vmatpush3.msra.mxu0 %v12986_v48 }
  0x87   :  { %11028 = vmatprep.subr.mxu1 %v14578_v0  ;;  %11035 = vmatprep.subr.mxu0 %v14578_v0 }
  0x88   :  { %11029 = vmatpush3.msra.mxu1 %v12992_v49  ;;  %11030 = vmatprep.mubr.msk.f32.mxu1 %vm12661_vm0, %v14578_v0 }
  0x89   :  { %11036 = vmatpush3.msra.mxu0 %v12996_v50  ;;  %11037 = vmatprep.mubr.msk.f32.mxu0 %vm12661_vm0, %v14578_v0 }
  0x8a   :  { %11031 = vmatmul.mubr.f32.vlgmr.msra.gmra.mxu1 %v14578_v0  ;;  %11038 = vmatmul.mubr.msk.f32.vlgmr.msra.gmra.mxu0 %vm289_vm1, %v12897_v30 }
  0x8b   :  { %11051 = vmatprep.subr.mxu1 %v14578_v0  ;;  %11040 = vmatprep.subr.mxu0 %v14578_v0 }
  0x8c   :  { %11052 = vmatpush3.msra.mxu1 %v12765_v2  ;;  %11055 = vmatprep.mubr.msk.f32.mxu1 %vm12661_vm0, %v14578_v0 }
  0x8d   :  { %11053 = vmatprep.subr.mxu1 %v14578_v0  ;;  %11041 = vmatpush3.msra.mxu0 %v12763_v1 }
  0x8e   :  { %11054 = vmatpush3.msra.mxu1 %v12771_v4  ;;  %11042 = vmatprep.subr.mxu0 %v14578_v0 }
  0x8f   :  { %11058 = vmatprep.subr.mxu1 %v14578_v0  ;;  %11043 = vmatpush3.msra.mxu0 %v12767_v3 }
  0x90   :  { %11044 = vmatprep.subr.mxu0 %v14578_v0  ;;  %11048 = vmatprep.mubr.msk.f32.mxu0 %vm12661_vm0, %v14578_v0 }
  0x91   :  { %11045 = vmatpush3.msra.mxu0 %v12777_v6  ;;  %11056 = vmatmul.mubr.msk.f32.vlgmr.msra.gmra.mxu1 %vm289_vm1, %v13027_v51 }
  0x92   :  { %11046 = vmatprep.subr.mxu0 %v14578_v0  ;;  %11059 = vmatpush3.msra.mxu1 %v12781_v7 }
  0x93   :  { %11047 = vmatpush3.msra.mxu0 %v12786_v8  ;;  %11066 = vmatprep.mubr.msk.f32.mxu1 %vm12661_vm0, %v14578_v0 }
  0x94   :  { %11069 = vmatprep.subr.mxu0 %v14578_v0  ;;  %11060 = vmatprep.subr.mxu1 %v14578_v0 }
  0x95   :  { %11061 = vmatpush3.msra.mxu1 %v12790_v9 }
  0x96   :  { %11062 = vmatprep.subr.mxu1 %v14578_v0 }
  0x97   :  { %11063 = vmatpush3.msra.mxu1 %v12796_v10 }
  0x98   :  { %11064 = vmatprep.subr.mxu1 %v14578_v0 }
  0x99   :  { %11065 = vmatpush3.msra.mxu1 %v12804_v12 }
  0x9a   :  { %11087 = vmatprep.subr.mxu1 %v14578_v0 }
 0x110   :  { %v359_v52 = vpop.f32.mrf.mxu1 }
 0x112   :  { %v10913_v53 = vpop.f32.mrf.mxu1 }
 0x114   :  { %v285_v55 = vpop.f32.mrf.mxu0 }
 0x115   :  { %v360_v56 = vadd.f32 %v359_v52, %v285_v55 }
 0x116   :  { %v10906_v57 = vpop.f32.mrf.mxu0 }
 0x117   :  { %v369_v58 = vadd.f32 %v13041_v54, %v360_v56  ;;  %v13047_v56 = vld [vmem:[#allocation8 + $0x2] ss:$0 sm:$0xff]  ;;  %v13049_v54 = vld [vmem:[#allocation8 + $0x3] ss:$0 sm:$0xff] }
 0x118   :  { %14635 = vst [vmem:[#allocation30_spill] sm:$0xff] %v13047_v56  ;;  %14636 = vst [vmem:[#allocation31_spill] sm:$0xff] %v13049_v54 }
 0x119   :  { %v10170_v59 = vmul.f32 -1.442695, %v369_v58 }
 0x11a   :  { %v442_v60 = vpop.f32.mrf.mxu1  ;;  %v512_v62 = vpop.f32.mrf.mxu0 }
 0x11b   :  { %12106 = vpow2.f32 %v10170_v59  ;;  %v513_v63 = vadd.f32 %v512_v62, %v442_v60 }
 0x11c   :  { %v10924_v5 = vpop.f32.mrf.mxu1  ;;  %v10931_v30 = vpop.f32.mrf.mxu0 }
 0x11d   :  { %v522_v0 = vadd.f32 %v13044_v61, %v513_v63 }
 0x11f   :  { %v10173_v12 = vmul.f32 -1.442695, %v522_v0 }
 0x120   :  { %v665_v53 = vpop.f32.mrf.mxu1 }
 0x121   :  { %12108 = vpow2.f32 %v10173_v12 }
 0x122   :  { %v10949_v10 = vpop.f32.mrf.mxu1 }
 0x124   :  { %v595_v9 = vpop.f32.mrf.mxu0 }
 0x125   :  { %v666_v57 = vadd.f32 %v665_v53, %v595_v9 }
 0x126   :  { %v10942_v52 = vpop.f32.mrf.mxu0 }
 0x127   :  { %v675_v62 = vadd.f32 %v13047_v56, %v666_v57  ;;  %v13053_v52 = vld [vmem:[#allocation8 + $0x4] ss:$0 sm:$0xff] }
 0x128   :  { %v12107_v55 = vpop.eup %12106  ;;  %14637 = vst [vmem:[#allocation32_spill] sm:$0xff] %v13053_v52 }
 0x129   :  { %v373_v59 = vadd.f32 1.0, %v12107_v55 }
 0x12a   :  { %v743_v58 = vpop.f32.mrf.mxu1  ;;  %v813_v7 = vpop.f32.mrf.mxu0 }
 0x12b   :  { %v814_v60 = vadd.f32 %v813_v7, %v743_v58  ;;  %12110 = vrcp.f32 %v373_v59 }
 0x12c   :  { %v10960_v5 = vpop.f32.mrf.mxu1  ;;  %v10967_v63 = vpop.f32.mrf.mxu0  ;;  %12112 = vtanh.f32 %v675_v62 }
 0x12d   :  { %v823_v0 = vadd.f32 %v13049_v54, %v814_v60  ;;  %v13056_v63 = vld [vmem:[#allocation8 + $0x5] ss:$0 sm:$0xff] }
 0x12e   :  { %v12109_v12 = vpop.eup %12108  ;;  %14638 = vst [vmem:[#allocation33_spill] sm:$0xff] %v13056_v63 }
 0x12f   :  { %v526_v10 = vadd.f32 1.0, %v12109_v12  ;;  %v10178_v30 = vmul.f32 -1.442695, %v823_v0 }
 0x130   :  { %v976_v9 = vpop.f32.mrf.mxu1 }
 0x131   :  { %12114 = vrcp.f32 %v526_v10 }
 0x132   :  { %12116 = vpow2.f32 %v10178_v30  ;;  %v10985_v53 = vpop.f32.mrf.mxu1 }
 0x134   :  { %v903_v61 = vpop.f32.mrf.mxu0 }
 0x135   :  { %v977_v55 = vadd.f32 %v976_v9, %v903_v61 }
 0x136   :  { %v10978_v7 = vpop.f32.mrf.mxu0 }
 0x137   :  { %v986_v57 = vadd.f32 %v13053_v52, %v977_v55  ;;  %v13062_v52 = vld [vmem:[#allocation8 + $0x6] ss:$0 sm:$0xff] }
 0x138   :  { %v12111_v0 = vpop.eup %12110 }
 0x139   :  { %v10181_v58 = vmul.f32 -1.442695, %v986_v57  ;;  %v12113_v10 = vpop.eup %12112 }
 0x13a   :  { %v1059_v5 = vpop.f32.mrf.mxu1  ;;  %v1129_v60 = vpop.f32.mrf.mxu0  ;;  %v831_v61 = vmul.f32 %v12113_v10, %v12111_v0 }
 0x13b   :  { %12118 = vpow2.f32 %v10181_v58  ;;  %v1130_v59 = vadd.f32 %v1129_v60, %v1059_v5 }
 0x13c   :  { %v10996_v62 = vpop.f32.mrf.mxu1  ;;  %v11003_v12 = vpop.f32.mrf.mxu0 }
 0x13d   :  { %v1139_v30 = vadd.f32 %v13056_v63, %v1130_v59  ;;  %v13064_v63 = vld [vmem:[#allocation8 + $0x7] ss:$0 sm:$0xff] }
 0x13e   :  { %v12115_v53 = vpop.eup %12114 }
 0x13f   :  { %v12117_v56 = vpop.eup %12116  ;;  %v830_v54 = vmul.f32 0.0, %v12115_v53  ;;  %v10184_v9 = vmul.f32 -1.442695, %v1139_v30 }
 0x140   :  { %v827_v7 = vadd.f32 1.0, %v12117_v56 }
 0x141   :  { %v13059_v55 = vadd.f32 %v831_v61, %v830_v54  ;;  %12120 = vpow2.f32 %v10184_v9  ;;  %v1282_v57 = vpop.f32.mrf.mxu1 }
 0x142   :  { %12122 = vrcp.f32 %v827_v7 }
 0x143   :  { %12124 = vtanh.f32 %v13059_v55  ;;  %v11021_v58 = vpop.f32.mrf.mxu1 }
 0x144   :  { %v1212_v5 = vpop.f32.mrf.mxu0 }
 0x145   :  { %v1283_v12 = vadd.f32 %v1282_v57, %v1212_v5 }
 0x146   :  { %v11014_v60 = vpop.f32.mrf.mxu0 }
 0x147   :  { %v1292_v54 = vadd.f32 %v13062_v52, %v1283_v12 }
 0x148   :  { %v12119_v62 = vpop.eup %12118 }
 0x149   :  { %v990_v10 = vadd.f32 1.0, %v12119_v62  ;;  %v14639_v62 = vmov 0.0  }
 0x14a   :  { %v1360_v59 = vpop.f32.mrf.mxu1  ;;  %v1430_v0 = vpop.f32.mrf.mxu0 }
 0x14b   :  { %v1431_v56 = vadd.f32 %v1430_v0, %v1360_v59  ;;  %12126 = vrcp.f32 %v990_v10 }
 0x14c   :  { %v11032_v30 = vpop.f32.mrf.mxu1  ;;  %v11039_v53 = vpop.f32.mrf.mxu0  ;;  %12128 = vtanh.f32 %v1292_v54 }
 0x14d   :  { %v1440_v61 = vadd.f32 %v13064_v63, %v1431_v56 }
 0x14e   :  { %v12121_v9 = vpop.eup %12120 }
 0x14f   :  { %v12123_v7 = vpop.eup %12122  ;;  %v1143_v58 = vadd.f32 1.0, %v12121_v9  ;;  %v10189_v60 = vmul.f32 -1.442695, %v1440_v61  ;;  %v13125_v61 = vld [vmem:[#allocation2 + $0x30] sm:$0xff] }
 0x150   :  { %v12125_v57 = vpop.eup %12124 }
 0x151   :  { %12130 = vrcp.f32 %v1143_v58  ;;  %v834_v5 = vmul.f32 %v12125_v57, %v12123_v7  ;;  %v14640_v58 = vld [vmem:[#allocation22_spill] sm:$0xff] }
 0x152   :  { %12132 = vpow2.f32 %v10189_v60 }
 0x153   :  { %1452 = vst.msk [vmem:[%s14574_s8] sm:$0xff] %vm215_vm2, %v834_v5  ;;  %11049 = vmatmul.mubr.msk.f32.vlgmr.msra.gmra.mxu0 %vm215_vm2, %v834_v5  ;;  %11067 = vmatmul.mubr.msk.f32.vlgmr.msra.gmra.mxu1 %vm215_vm2, %v834_v5 }
 0x154   :  { %11070 = vmatpush3.msra.mxu0 %v12798_v11  ;;  %11088 = vmatpush3.msra.mxu1 %v12820_v15 }
 0x155   :  { %11071 = vmatprep.subr.mxu0 %v14639_v62  ;;  %11089 = vmatprep.subr.mxu1 %v14639_v62 }
 0x156   :  { %11072 = vmatpush3.msra.mxu0 %v12808_v13  ;;  %11090 = vmatpush3.msra.mxu1 %v12829_v17 }
 0x157   :  { %11073 = vmatprep.mubr.msk.f32.mxu0 %vm12661_vm0, %v14639_v62  ;;  %11076 = vmatprep.subr.mxu0 %v14639_v62 }
 0x158   :  { %11091 = vmatprep.mubr.msk.f32.mxu1 %vm12661_vm0, %v14639_v62  ;;  %11094 = vmatprep.subr.mxu1 %v14639_v62  ;;  %v12127_v12 = vpop.eup %12126 }
 0x159   :  { %11074 = vmatmul.mubr.msk.f32.vlgmr.msra.gmra.mxu0 %vm289_vm1, %v13027_v51  ;;  %11092 = vmatmul.mubr.msk.f32.vlgmr.msra.gmra.mxu1 %vm289_vm1, %v13027_v51  ;;  %v12129_v59 = vpop.eup %12128 }
 0x15a   :  { %11077 = vmatpush3.msra.mxu0 %v12818_v14  ;;  %11095 = vmatpush3.msra.mxu1 %v12839_v19  ;;  %v1448_v54 = vmul.f32 %v12129_v59, %v12127_v12 }
 0x15b   :  { %11078 = vmatprep.subr.mxu0 %v14639_v62  ;;  %11096 = vmatprep.subr.mxu1 %v14639_v62 }
 0x15c   :  { %11079 = vmatpush3.msra.mxu0 %v12827_v16  ;;  %11097 = vmatpush3.msra.mxu1 %v12851_v21 }
 0x15d   :  { %11080 = vmatprep.subr.mxu0 %v14639_v62  ;;  %11098 = vmatprep.subr.mxu1 %v14639_v62 }
 0x15e   :  { %v12131_v0 = vpop.eup %12130  ;;  %11081 = vmatpush3.msra.mxu0 %v12837_v18  ;;  %11099 = vmatpush3.msra.mxu1 %v12858_v22 }
 0x15f   :  { %v12133_v10 = vpop.eup %12132  ;;  %v1447_v56 = vmul.f32 0.0, %v12131_v0  ;;  %11082 = vmatprep.subr.mxu0 %v14639_v62  ;;  %11100 = vmatprep.subr.mxu1 %v14639_v62  ;;  %v14644_v0 = vld [vmem:[#allocation28_spill] sm:$0xff] }
 0x160   :  { %v1444_v30 = vadd.f32 1.0, %v12133_v10  ;;  %11083 = vmatpush3.msra.mxu0 %v12847_v20  ;;  %11084 = vmatprep.mubr.msk.f32.mxu0 %vm12661_vm0, %v14639_v62 }
 0x161   :  { %v13105_v53 = vadd.f32 %v1448_v54, %v1447_v56  ;;  %11101 = vmatpush3.msra.mxu1 %v12866_v24  ;;  %11102 = vmatprep.mubr.msk.f32.mxu1 %vm12661_vm0, %v14639_v62 }
 0x162   :  { %12134 = vrcp.f32 %v1444_v30  ;;  %11085 = vmatmul.mubr.msk.f32.vlgmr.msra.gmra.mxu0 %vm215_vm2, %v834_v5  ;;  %11103 = vmatmul.mubr.msk.f32.vlgmr.msra.gmra.mxu1 %vm215_vm2, %v834_v5 }
 0x163   :  { %12136 = vtanh.f32 %v13105_v53  ;;  %11105 = vmatprep.subr.mxu0 %v14639_v62  ;;  %11123 = vmatprep.subr.mxu1 %v14639_v62 }
 0x164   :  { %11106 = vmatpush3.msra.mxu0 %v12860_v23  ;;  %11124 = vmatpush3.msra.mxu1 %v12882_v27 }
 0x165   :  { %11107 = vmatprep.subr.mxu0 %v14639_v62  ;;  %11125 = vmatprep.subr.mxu1 %v14639_v62 }
 0x166   :  { %11108 = vmatpush3.msra.mxu0 %v12870_v25  ;;  %11109 = vmatprep.mubr.msk.f32.mxu0 %vm12661_vm0, %v14639_v62 }
 0x167   :  { %11126 = vmatpush3.msra.mxu1 %v12891_v29  ;;  %11110 = vmatmul.mubr.msk.f32.vlgmr.msra.gmra.mxu0 %vm289_vm1, %v13027_v51 }
 0x168   :  { %11112 = vmatprep.subr.mxu0 %v14639_v62  ;;  %11127 = vmatprep.mubr.msk.f32.mxu1 %vm12661_vm0, %v14639_v62 }
 0x169   :  { %11130 = vmatprep.subr.mxu1 %v14639_v62  ;;  %11113 = vmatpush3.msra.mxu0 %v12880_v26 }
 0x16a   :  { %11128 = vmatmul.mubr.msk.f32.vlgmr.msra.gmra.mxu1 %vm289_vm1, %v13125_v61  ;;  %11114 = vmatprep.subr.mxu0 %v14639_v62 }
 0x16b   :  { %11131 = vmatpush3.msra.mxu1 %v12903_v32  ;;  %11115 = vmatpush3.msra.mxu0 %v12889_v28 }
 0x16c   :  { %11132 = vmatprep.subr.mxu1 %v14639_v62  ;;  %11116 = vmatprep.subr.mxu0 %v14639_v62 }
 0x16d   :  { %11133 = vmatpush3.msra.mxu1 %v12915_v34  ;;  %11117 = vmatpush3.msra.mxu0 %v12901_v31 }
 0x16e   :  { %11134 = vmatprep.subr.mxu1 %v14639_v62  ;;  %11118 = vmatprep.subr.mxu0 %v14639_v62 }
 0x16f   :  { %v12135_v51 = vpop.eup %12134  ;;  %11135 = vmatpush3.msra.mxu1 %v12922_v35  ;;  %11119 = vmatpush3.msra.mxu0 %v12911_v33 }
 0x170   :  { %v12137_v9 = vpop.eup %12136  ;;  %11136 = vmatprep.subr.mxu1 %v14639_v62  ;;  %11120 = vmatprep.mubr.msk.f32.mxu0 %vm12661_vm0, %v14639_v62 }
 0x171   :  { %11137 = vmatpush3.msra.mxu1 %v12930_v37  ;;  %11138 = vmatprep.mubr.msk.f32.mxu1 %vm12661_vm0, %v14639_v62  ;;  %v1451_v7 = vmul.f32 %v12137_v9, %v12135_v51 }
 0x172   :  { %11141 = vmatprep.subr.mxu0 %v14639_v62  ;;  %11159 = vmatprep.subr.mxu1 %v14639_v62 }
 0x173   :  { %10190 = vst.msk [vmem:[%s14575_s9 + $0x38] sm:$0xff] %vm215_vm2, %v1451_v7  ;;  %11121 = vmatmul.mubr.msk.f32.vlgmr.msra.gmra.mxu0 %vm215_vm2, %v1451_v7  ;;  %11139 = vmatmul.mubr.msk.f32.vlgmr.msra.gmra.mxu1 %vm215_vm2, %v1451_v7 }
 0x174   :  { %11142 = vmatpush3.msra.mxu0 %v12924_v36  ;;  %11160 = vmatpush3.msra.mxu1 %v12946_v40 }
 0x175   :  { %11143 = vmatprep.subr.mxu0 %v14639_v62  ;;  %11161 = vmatprep.subr.mxu1 %v14639_v62 }
 0x176   :  { %11144 = vmatpush3.msra.mxu0 %v12934_v38  ;;  %11162 = vmatpush3.msra.mxu1 %v12955_v42 }
 0x177   :  { %11145 = vmatprep.mubr.msk.f32.mxu0 %vm12661_vm0, %v14639_v62  ;;  %11148 = vmatprep.subr.mxu0 %v14639_v62 }
 0x178   :  { %11163 = vmatprep.mubr.msk.f32.mxu1 %vm12661_vm0, %v14639_v62  ;;  %11166 = vmatprep.subr.mxu1 %v14639_v62 }
 0x179   :  { %11146 = vmatmul.mubr.msk.f32.vlgmr.msra.gmra.mxu0 %vm289_vm1, %v13125_v61  ;;  %11164 = vmatmul.mubr.msk.f32.vlgmr.msra.gmra.mxu1 %vm289_vm1, %v13125_v61 }
 0x17a   :  { %11149 = vmatpush3.msra.mxu0 %v12944_v39  ;;  %11167 = vmatpush3.msra.mxu1 %v12968_v44 }
 0x17b   :  { %11150 = vmatprep.subr.mxu0 %v14639_v62  ;;  %11168 = vmatprep.subr.mxu1 %v14639_v62 }
 0x17c   :  { %11151 = vmatpush3.msra.mxu0 %v12953_v41  ;;  %11169 = vmatpush3.msra.mxu1 %v12977_v46 }
 0x17d   :  { %11152 = vmatprep.subr.mxu0 %v14639_v62  ;;  %11170 = vmatprep.subr.mxu1 %v14639_v62 }
 0x17e   :  { %11153 = vmatpush3.msra.mxu0 %v12961_v43  ;;  %11171 = vmatpush3.msra.mxu1 %v12984_v47 }
 0x17f   :  { %11154 = vmatprep.subr.mxu0 %v14639_v62  ;;  %11172 = vmatprep.subr.mxu1 %v14639_v62 }
 0x180   :  { %11155 = vmatpush3.msra.mxu0 %v12970_v45  ;;  %11156 = vmatprep.mubr.msk.f32.mxu0 %vm12661_vm0, %v14639_v62 }
 0x181   :  { %11173 = vmatpush3.msra.mxu1 %v12992_v49  ;;  %11174 = vmatprep.mubr.msk.f32.mxu1 %vm12661_vm0, %v14639_v62 }
 0x182   :  { %11157 = vmatmul.mubr.msk.f32.vlgmr.msra.gmra.mxu0 %vm215_vm2, %v1451_v7  ;;  %11175 = vmatmul.mubr.msk.f32.vlgmr.msra.gmra.mxu1 %vm215_vm2, %v1451_v7  ;;  %v14645_v7 = vld [vmem:[#allocation29_spill] sm:$0xff] }
 0x183   :  { %11177 = vmatprep.subr.mxu0 %v14639_v62  ;;  %11181 = vmatprep.mubr.msk.f32.mxu0 %vm12661_vm0, %v14639_v62 }
 0x184   :  { %11178 = vmatpush3.msra.mxu0 %v12986_v48  ;;  %11195 = vmatprep.subr.mxu1 %v14639_v62 }
 0x185   :  { %11179 = vmatprep.subr.mxu0 %v14639_v62  ;;  %11196 = vmatpush3.msra.mxu1 %v12765_v2  ;;  %v1599_v2 = vpop.f32.mrf.mxu1 }
 0x186   :  { %11180 = vmatpush3.msra.mxu0 %v12996_v50  ;;  %11197 = vmatprep.subr.mxu1 %v14639_v62 }
 0x187   :  { %11182 = vmatmul.mubr.msk.f32.vlgmr.msra.gmra.mxu0 %vm289_vm1, %v13125_v61  ;;  %11198 = vmatpush3.msra.mxu1 %v12771_v4  ;;  %v11057_v4 = vpop.f32.mrf.mxu1 }
 0x188   :  { %11184 = vmatprep.subr.mxu0 %v14639_v62  ;;  %11199 = vmatprep.mubr.msk.f32.mxu1 %vm12661_vm0, %v14639_v62 }
 0x189   :  { %11202 = vmatprep.subr.mxu1 %v14639_v62  ;;  %11185 = vmatpush3.msra.mxu0 %v12763_v1  ;;  %v13221_v1 = vld [vmem:[#allocation2 + $0x10] sm:$0xff] }
 0x18a   :  { %11186 = vmatprep.subr.mxu0 %v14639_v62  ;;  %11192 = vmatprep.mubr.msk.f32.mxu0 %vm12661_vm0, %v14639_v62 }
 0x18b   :  { %11187 = vmatpush3.msra.mxu0 %v12767_v3  ;;  %11200 = vmatmul.mubr.msk.f32.vlgmr.msra.gmra.mxu1 %vm289_vm1, %v13221_v1  ;;  %v14641_v3 = vld [vmem:[#allocation23_spill] sm:$0xff] }
 0x18c   :  { %11188 = vmatprep.subr.mxu0 %v14639_v62  ;;  %11203 = vmatpush3.msra.mxu1 %v14640_v58 }
 0x18d   :  { %11189 = vmatpush3.msra.mxu0 %v12777_v6  ;;  %11210 = vmatprep.mubr.msk.f32.mxu1 %vm12661_vm0, %v14639_v62  ;;  %v14642_v6 = vld [vmem:[#allocation24_spill] sm:$0xff] }
 0x18e   :  { %11190 = vmatprep.subr.mxu0 %v14639_v62  ;;  %11204 = vmatprep.subr.mxu1 %v14639_v62 }
 0x18f   :  { %11191 = vmatpush3.msra.mxu0 %v12786_v8  ;;  %11205 = vmatpush3.msra.mxu1 %v14641_v3  ;;  %v14643_v8 = vld [vmem:[#allocation25_spill] sm:$0xff] }
 0x190   :  { %11213 = vmatprep.subr.mxu0 %v14639_v62  ;;  %11206 = vmatprep.subr.mxu1 %v14639_v62 }
 0x191   :  { %11207 = vmatpush3.msra.mxu1 %v14642_v6 }
 0x192   :  { %11208 = vmatprep.subr.mxu1 %v14639_v62 }
 0x193   :  { %11209 = vmatpush3.msra.mxu1 %v14643_v8 }
 0x194   :  { %11231 = vmatprep.subr.mxu1 %v14639_v62 }
 0x213   :  { %v1526_v60 = vpop.f32.mrf.mxu0  ;;  %v1676_v57 = vpop.f32.mrf.mxu1 }
 0x214   :  { %v1600_v5 = vadd.f32 %v1599_v2, %v1526_v60 }
 0x215   :  { %v11050_v12 = vpop.f32.mrf.mxu0  ;;  %v11068_v59 = vpop.f32.mrf.mxu1 }
 0x216   :  { %v1603_v10 = vadd.f32 %v14644_v0, %v1600_v5  ;;  %v14646_v0 = vld [vmem:[#allocation31_spill] sm:$0xff] }
 0x218   :  { %v10193_v56 = vmul.f32 -1.442695, %v1603_v10 }
 0x219   :  { %v1746_v54 = vpop.f32.mrf.mxu0  ;;  %v1893_v30 = vpop.f32.mrf.mxu1 }
 0x21a   :  { %12138 = vpow2.f32 %v10193_v56  ;;  %v1747_v61 = vadd.f32 %v1746_v54, %v1676_v57  ;;  %v14647_v57 = vld [vmem:[#allocation30_spill] sm:$0xff] }
 0x21b   :  { %v11075_v51 = vpop.f32.mrf.mxu0  ;;  %v11093_v9 = vpop.f32.mrf.mxu1 }
 0x21c   :  { %v1750_v4 = vadd.f32 %v14645_v7, %v1747_v61 }
 0x21e   :  { %v10196_v58 = vmul.f32 -1.442695, %v1750_v4 }
 0x220   :  { %12140 = vpow2.f32 %v10196_v58 }
 0x222   :  { %v1823_v3 = vpop.f32.mrf.mxu0  ;;  %v1965_v6 = vpop.f32.mrf.mxu1 }
 0x223   :  { %v1894_v60 = vadd.f32 %v1893_v30, %v1823_v3 }
 0x224   :  { %v11086_v8 = vpop.f32.mrf.mxu0  ;;  %v11104_v50 = vpop.f32.mrf.mxu1 }
 0x225   :  { %v1897_v54 = vadd.f32 %v14647_v57, %v1894_v60  ;;  %v14648_v8 = vld [vmem:[#allocation32_spill] sm:$0xff] }
 0x227   :  { %v12139_v2 = vpop.eup %12138  ;;  %v2035_v12 = vpop.f32.mrf.mxu0 }
 0x228   :  { %v2036_v59 = vadd.f32 %v2035_v12, %v1965_v6  ;;  %v1607_v5 = vadd.f32 1.0, %v12139_v2 }
 0x229   :  { %v11111_v10 = vpop.f32.mrf.mxu0 }
 0x22a   :  { %v2039_v48 = vadd.f32 %v14646_v0, %v2036_v59  ;;  %v2195_v56 = vpop.f32.mrf.mxu1  ;;  %12142 = vrcp.f32 %v1607_v5 }
 0x22c   :  { %v10201_v51 = vmul.f32 -1.442695, %v2039_v48  ;;  %v11129_v9 = vpop.f32.mrf.mxu1 }
 0x22d   :  { %v12141_v61 = vpop.eup %12140 }
 0x22e   :  { %v1754_v4 = vadd.f32 1.0, %v12141_v61  ;;  %12144 = vpow2.f32 %v10201_v51  ;;  %v14649_v51 = vld [vmem:[#allocation33_spill] sm:$0xff] }
 0x22f   :  { %12146 = vtanh.f32 %v1897_v54 }
 0x230   :  { %12148 = vrcp.f32 %v1754_v4 }
 0x233   :  { %v2122_v50 = vpop.f32.mrf.mxu0  ;;  %v2272_v58 = vpop.f32.mrf.mxu1 }
 0x234   :  { %v2196_v30 = vadd.f32 %v2195_v56, %v2122_v50 }
 0x235   :  { %v11122_v3 = vpop.f32.mrf.mxu0  ;;  %v11140_v6 = vpop.f32.mrf.mxu1 }
 0x236   :  { %v2199_v2 = vadd.f32 %v14648_v8, %v2196_v30 }
 0x237   :  { %v12143_v0 = vpop.eup %12142 }
 0x238   :  { %v10204_v12 = vmul.f32 -1.442695, %v2199_v2 }
 0x239   :  { %v2342_v59 = vpop.f32.mrf.mxu0  ;;  %v2489_v10 = vpop.f32.mrf.mxu1 }
 0x23a   :  { %12150 = vpow2.f32 %v10204_v12  ;;  %v2343_v48 = vadd.f32 %v2342_v59, %v2272_v58 }
 0x23b   :  { %v12145_v60 = vpop.eup %12144  ;;  %v11147_v9 = vpop.f32.mrf.mxu0 }
 0x23c   :  { %v11165_v5 = vpop.f32.mrf.mxu1  ;;  %v12147_v61 = vpop.eup %12146  ;;  %v2346_v54 = vadd.f32 %v14649_v51, %v2343_v48  ;;  %v2043_v57 = vadd.f32 1.0, %v12145_v60 }
 0x23d   :  { %v12149_v4 = vpop.eup %12148  ;;  %v2047_v50 = vmul.f32 %v12147_v61, %v12143_v0 }
 0x23e   :  { %v2046_v56 = vmul.f32 %v12149_v4, %v13059_v55  ;;  %v10207_v3 = vmul.f32 -1.442695, %v2346_v54 }
 0x240   :  { %v13242_v6 = vadd.f32 %v2047_v50, %v2046_v56  ;;  %12152 = vpow2.f32 %v10207_v3 }
 0x241   :  { %12154 = vrcp.f32 %v2043_v57 }
 0x242   :  { %12156 = vtanh.f32 %v13242_v6  ;;  %v2419_v30 = vpop.f32.mrf.mxu0  ;;  %v2561_v58 = vpop.f32.mrf.mxu1 }
 0x243   :  { %v2490_v9 = vadd.f32 %v2489_v10, %v2419_v30 }
 0x244   :  { %v11158_v2 = vpop.f32.mrf.mxu0  ;;  %v11176_v12 = vpop.f32.mrf.mxu1 }
 0x245   :  { %v2493_v0 = vadd.f32 %v13062_v52, %v2490_v9 }
 0x247   :  { %v12151_v59 = vpop.eup %12150  ;;  %v2631_v5 = vpop.f32.mrf.mxu0 }
 0x248   :  { %v2632_v48 = vadd.f32 %v2631_v5, %v2561_v58  ;;  %v2203_v51 = vadd.f32 1.0, %v12151_v59 }
 0x249   :  { %v11183_v60 = vpop.f32.mrf.mxu0 }
 0x24a   :  { %v2635_v55 = vadd.f32 %v13064_v63, %v2632_v48  ;;  %12158 = vrcp.f32 %v2203_v51 }
 0x24c   :  { %v10212_v61 = vmul.f32 -1.442695, %v2635_v55 }
 0x24d   :  { %v12153_v54 = vpop.eup %12152 }
 0x24e   :  { %v12155_v57 = vpop.eup %12154  ;;  %v2350_v4 = vadd.f32 1.0, %v12153_v54  ;;  %12160 = vpow2.f32 %v10212_v61  ;;  %v14662_v61 = vld [vmem:[#allocation31_spill] sm:$0xff] }
 0x24f   :  { %v12157_v56 = vpop.eup %12156  ;;  %12162 = vtanh.f32 %v2493_v0 }
 0x250   :  { %12164 = vrcp.f32 %v2350_v4  ;;  %v2050_v50 = vmul.f32 %v12157_v56, %v12155_v57  ;;  %v14663_v4 = vld [vmem:[#allocation30_spill] sm:$0xff] }
 0x252   :  { %10213 = vst.msk [vmem:[%s14574_s8 + $0x8] sm:$0xff] %vm215_vm2, %v2050_v50  ;;  %11193 = vmatmul.mubr.msk.f32.vlgmr.msra.gmra.mxu0 %vm215_vm2, %v2050_v50  ;;  %11211 = vmatmul.mubr.msk.f32.vlgmr.msra.gmra.mxu1 %vm215_vm2, %v2050_v50 }
 0x253   :  { %11214 = vmatpush3.msra.mxu0 %v12798_v11  ;;  %11232 = vmatpush3.msra.mxu1 %v12820_v15 }
 0x254   :  { %11215 = vmatprep.subr.mxu0 %v14639_v62  ;;  %11233 = vmatprep.subr.mxu1 %v14639_v62 }
 0x255   :  { %11216 = vmatpush3.msra.mxu0 %v12808_v13  ;;  %11234 = vmatpush3.msra.mxu1 %v12829_v17 }
 0x256   :  { %11217 = vmatprep.mubr.msk.f32.mxu0 %vm12661_vm0, %v14639_v62  ;;  %11220 = vmatprep.subr.mxu0 %v14639_v62 }
 0x257   :  { %11235 = vmatprep.mubr.msk.f32.mxu1 %vm12661_vm0, %v14639_v62  ;;  %11238 = vmatprep.subr.mxu1 %v14639_v62  ;;  %v12159_v11 = vpop.eup %12158 }
 0x258   :  { %11218 = vmatmul.mubr.msk.f32.vlgmr.msra.gmra.mxu0 %vm289_vm1, %v13221_v1  ;;  %11236 = vmatmul.mubr.msk.f32.vlgmr.msra.gmra.mxu1 %vm289_vm1, %v13221_v1 }
 0x259   :  { %11221 = vmatpush3.msra.mxu0 %v12818_v14  ;;  %11239 = vmatpush3.msra.mxu1 %v12839_v19 }
 0x25a   :  { %11222 = vmatprep.subr.mxu0 %v14639_v62  ;;  %11240 = vmatprep.subr.mxu1 %v14639_v62 }
 0x25b   :  { %v12161_v13 = vpop.eup %12160  ;;  %11223 = vmatpush3.msra.mxu0 %v12827_v16  ;;  %11241 = vmatpush3.msra.mxu1 %v12851_v21 }
 0x25c   :  { %v12163_v15 = vpop.eup %12162  ;;  %11224 = vmatprep.subr.mxu0 %v14639_v62  ;;  %11242 = vmatprep.subr.mxu1 %v14639_v62  ;;  %v2639_v10 = vadd.f32 1.0, %v12161_v13 }
 0x25d   :  { %v12165_v17 = vpop.eup %12164  ;;  %11225 = vmatpush3.msra.mxu0 %v12837_v18  ;;  %11243 = vmatpush3.msra.mxu1 %v12858_v22  ;;  %v2643_v19 = vmul.f32 %v12163_v15, %v12159_v11  ;;  %v13305_v18 = vld [vmem:[#allocation2 + $0x28] sm:$0xff] }
 0x25e   :  { %v2642_v14 = vmul.f32 %v12165_v17, %v13105_v53  ;;  %11226 = vmatprep.subr.mxu0 %v14639_v62  ;;  %11244 = vmatprep.subr.mxu1 %v14639_v62  ;;  %12166 = vrcp.f32 %v2639_v10 }
 0x25f   :  { %11227 = vmatpush3.msra.mxu0 %v12847_v20  ;;  %11228 = vmatprep.mubr.msk.f32.mxu0 %vm12661_vm0, %v14639_v62 }
 0x260   :  { %v13285_v16 = vadd.f32 %v2643_v19, %v2642_v14  ;;  %11245 = vmatpush3.msra.mxu1 %v12866_v24  ;;  %11246 = vmatprep.mubr.msk.f32.mxu1 %vm12661_vm0, %v14639_v62  ;;  %v13381_v24 = vld [vmem:[#allocation5 + $0x8] sm:$0xff] }
 0x261   :  { %11229 = vmatmul.mubr.msk.f32.vlgmr.msra.gmra.mxu0 %vm215_vm2, %v2050_v50  ;;  %11247 = vmatmul.mubr.msk.f32.vlgmr.msra.gmra.mxu1 %vm215_vm2, %v2050_v50 }
 0x262   :  { %12168 = vtanh.f32 %v13285_v16  ;;  %11249 = vmatprep.subr.mxu0 %v14639_v62  ;;  %11267 = vmatprep.subr.mxu1 %v14639_v62 }
 0x263   :  { %11250 = vmatpush3.msra.mxu0 %v12860_v23  ;;  %11268 = vmatpush3.msra.mxu1 %v12882_v27  ;;  %v14650_v23 = vld [vmem:[#allocation26_spill] sm:$0xff] }
 0x264   :  { %11251 = vmatprep.subr.mxu0 %v14639_v62  ;;  %11269 = vmatprep.subr.mxu1 %v14639_v62  ;;  %v13395_v27 = vld [vmem:[#allocation7 + $0x18] sm:$0xff] }
 0x265   :  { %11252 = vmatpush3.msra.mxu0 %v12870_v25  ;;  %11253 = vmatprep.mubr.msk.f32.mxu0 %vm12661_vm0, %v14639_v62  ;;  %v14651_v25 = vld [vmem:[#allocation27_spill] sm:$0xff]  ;;  %14653 = vst [vmem:[#allocation23_spill] sm:$0xff] %v13395_v27 }
 0x266   :  { %11270 = vmatpush3.msra.mxu1 %v12891_v29  ;;  %11254 = vmatmul.mubr.msk.f32.vlgmr.msra.gmra.mxu0 %vm289_vm1, %v13221_v1  ;;  %v13405_v29 = vld [vmem:[#allocation7 + $0x8] sm:$0xff] }
 0x267   :  { %11256 = vmatprep.subr.mxu0 %v14639_v62  ;;  %11271 = vmatprep.mubr.msk.f32.mxu1 %vm12661_vm0, %v14639_v62  ;;  %14655 = vst [vmem:[#allocation25_spill] sm:$0xff] %v13405_v29 }
 0x268   :  { %11274 = vmatprep.subr.mxu1 %v14639_v62  ;;  %11257 = vmatpush3.msra.mxu0 %v12880_v26  ;;  %v13388_v26 = vld [vmem:[#allocation5] sm:$0xff] }
 0x269   :  { %11272 = vmatmul.mubr.msk.f32.vlgmr.msra.gmra.mxu1 %vm289_vm1, %v13305_v18  ;;  %11258 = vmatprep.subr.mxu0 %v14639_v62  ;;  %14652 = vst [vmem:[#allocation22_spill] sm:$0xff] %v13388_v26 }
 0x26a   :  { %11275 = vmatpush3.msra.mxu1 %v12903_v32  ;;  %11259 = vmatpush3.msra.mxu0 %v12889_v28  ;;  %v13401_v28 = vld [vmem:[#allocation7 + $0x10] sm:$0xff]  ;;  %v2795_v32 = vpop.f32.mrf.mxu1 }
 0x26b   :  { %11276 = vmatprep.subr.mxu1 %v14639_v62  ;;  %11260 = vmatprep.subr.mxu0 %v14639_v62  ;;  %v12167_v20 = vpop.eup %12166  ;;  %14654 = vst [vmem:[#allocation24_spill] sm:$0xff] %v13401_v28 }
 0x26c   :  { %11277 = vmatpush3.msra.mxu1 %v12915_v34  ;;  %11261 = vmatpush3.msra.mxu0 %v12901_v31  ;;  %v13409_v31 = vld [vmem:[#allocation7] sm:$0xff]  ;;  %v13413_v34 = vld [vmem:[#allocation2 + $0x18] sm:$0xff] }
 0x26d   :  { %11278 = vmatprep.subr.mxu1 %v14639_v62  ;;  %11262 = vmatprep.subr.mxu0 %v14639_v62  ;;  %14656 = vst [vmem:[#allocation29_spill] sm:$0xff] %v13409_v31 }
 0x26e   :  { %11279 = vmatpush3.msra.mxu1 %v12922_v35  ;;  %11263 = vmatpush3.msra.mxu0 %v12911_v33  ;;  %v11201_v33 = vpop.f32.mrf.mxu1  ;;  %v13417_v35 = vld [vmem:[#allocation7 + $0x38] sm:$0xff] }
 0x26f   :  { %v12169_v21 = vpop.eup %12168  ;;  %11280 = vmatprep.subr.mxu1 %v14639_v62  ;;  %11264 = vmatprep.mubr.msk.f32.mxu0 %vm12661_vm0, %v14639_v62  ;;  %14657 = vst [vmem:[#allocation32_spill] sm:$0xff] %v13417_v35 }
 0x270   :  { %11281 = vmatpush3.msra.mxu1 %v12930_v37  ;;  %11282 = vmatprep.mubr.msk.f32.mxu1 %vm12661_vm0, %v14639_v62  ;;  %v2646_v22 = vmul.f32 %v12169_v21, %v12167_v20  ;;  %v13427_v37 = vld [vmem:[#allocation7 + $0x28] sm:$0xff] }
 0x271   :  { %11285 = vmatprep.subr.mxu0 %v14639_v62  ;;  %11303 = vmatprep.subr.mxu1 %v14639_v62  ;;  %14659 = vst [vmem:[#allocation27_spill] sm:$0xff] %v13427_v37 }
 0x272   :  { %10214 = vst.msk [vmem:[%s14575_s9 + $0x30] sm:$0xff] %vm215_vm2, %v2646_v22  ;;  %11265 = vmatmul.mubr.msk.f32.vlgmr.msra.gmra.mxu0 %vm215_vm2, %v2646_v22  ;;  %11283 = vmatmul.mubr.msk.f32.vlgmr.msra.gmra.mxu1 %vm215_vm2, %v2646_v22 }
 0x273   :  { %11286 = vmatpush3.msra.mxu0 %v12924_v36  ;;  %11304 = vmatpush3.msra.mxu1 %v12946_v40  ;;  %v13423_v36 = vld [vmem:[#allocation7 + $0x30] sm:$0xff] }
 0x274   :  { %11287 = vmatprep.subr.mxu0 %v14639_v62  ;;  %11305 = vmatprep.subr.mxu1 %v14639_v62  ;;  %14658 = vst [vmem:[#allocation26_spill] sm:$0xff] %v13423_v36 }
 0x275   :  { %11288 = vmatpush3.msra.mxu0 %v12934_v38  ;;  %11306 = vmatpush3.msra.mxu1 %v12955_v42  ;;  %v13431_v38 = vld [vmem:[#allocation7 + $0x20] sm:$0xff] }
 0x276   :  { %11289 = vmatprep.mubr.msk.f32.mxu0 %vm12661_vm0, %v14639_v62  ;;  %11292 = vmatprep.subr.mxu0 %v14639_v62  ;;  %14660 = vst [vmem:[#allocation34_spill] sm:$0xff] %v13431_v38 }
 0x277   :  { %11307 = vmatprep.mubr.msk.f32.mxu1 %vm12661_vm0, %v14639_v62  ;;  %11310 = vmatprep.subr.mxu1 %v14639_v62 }
 0x278   :  { %11290 = vmatmul.mubr.msk.f32.vlgmr.msra.gmra.mxu0 %vm289_vm1, %v13305_v18  ;;  %11308 = vmatmul.mubr.msk.f32.vlgmr.msra.gmra.mxu1 %vm289_vm1, %v13305_v18 }
 0x279   :  { %11293 = vmatpush3.msra.mxu0 %v12944_v39  ;;  %11311 = vmatpush3.msra.mxu1 %v12968_v44  ;;  %v14661_v44 = vld [vmem:[#allocation28_spill] sm:$0xff] }
 0x27a   :  { %11294 = vmatprep.subr.mxu0 %v14639_v62  ;;  %11312 = vmatprep.subr.mxu1 %v14639_v62 }
 0x27b   :  { %11295 = vmatpush3.msra.mxu0 %v12953_v41  ;;  %11313 = vmatpush3.msra.mxu1 %v12977_v46 }
 0x27c   :  { %11296 = vmatprep.subr.mxu0 %v14639_v62  ;;  %11314 = vmatprep.subr.mxu1 %v14639_v62 }
 0x27d   :  { %11297 = vmatpush3.msra.mxu0 %v12961_v43  ;;  %11315 = vmatpush3.msra.mxu1 %v12984_v47 }
 0x27e   :  { %11298 = vmatprep.subr.mxu0 %v14639_v62  ;;  %11316 = vmatprep.subr.mxu1 %v14639_v62 }
 0x27f   :  { %11299 = vmatpush3.msra.mxu0 %v12970_v45  ;;  %11300 = vmatprep.mubr.msk.f32.mxu0 %vm12661_vm0, %v14639_v62 }
 0x280   :  { %11317 = vmatpush3.msra.mxu1 %v12992_v49  ;;  %11318 = vmatprep.mubr.msk.f32.mxu1 %vm12661_vm0, %v14639_v62 }
 0x281   :  { %11301 = vmatmul.mubr.msk.f32.vlgmr.msra.gmra.mxu0 %vm215_vm2, %v2646_v22  ;;  %11319 = vmatmul.mubr.msk.f32.vlgmr.msra.gmra.mxu1 %vm215_vm2, %v2646_v22 }
 0x282   :  { %11321 = vmatprep.subr.mxu0 %v14639_v62  ;;  %11325 = vmatprep.mubr.msk.f32.mxu0 %vm12661_vm0, %v14639_v62 }
 0x283   :  { %11322 = vmatpush3.msra.mxu0 %v14650_v23  ;;  %11339 = vmatprep.subr.mxu1 %v14639_v62 }
 0x284   :  { %11323 = vmatprep.subr.mxu0 %v14639_v62  ;;  %11340 = vmatpush3.msra.mxu1 %v13381_v24 }
 0x285   :  { %11324 = vmatpush3.msra.mxu0 %v14651_v25  ;;  %11341 = vmatprep.subr.mxu1 %v14639_v62 }
 0x286   :  { %11326 = vmatmul.mubr.msk.f32.vlgmr.msra.gmra.mxu0 %vm289_vm1, %v13305_v18  ;;  %11342 = vmatpush3.msra.mxu1 %v13388_v26 }
 0x287   :  { %11328 = vmatprep.subr.mxu0 %v14639_v62  ;;  %11343 = vmatprep.mubr.msk.f32.mxu1 %vm12661_vm0, %v14639_v62 }
 0x288   :  { %11346 = vmatprep.subr.mxu1 %v14639_v62  ;;  %11329 = vmatpush3.msra.mxu0 %v13395_v27 }
 0x289   :  { %11330 = vmatprep.subr.mxu0 %v14639_v62  ;;  %11336 = vmatprep.mubr.msk.f32.mxu0 %vm12661_vm0, %v14639_v62 }
 0x28a   :  { %11331 = vmatpush3.msra.mxu0 %v13401_v28  ;;  %11344 = vmatmul.mubr.msk.f32.vlgmr.msra.gmra.mxu1 %vm289_vm1, %v13413_v34 }
 0x28b   :  { %11332 = vmatprep.subr.mxu0 %v14639_v62  ;;  %11347 = vmatpush3.msra.mxu1 %v13417_v35 }
 0x28c   :  { %11333 = vmatpush3.msra.mxu0 %v13405_v29  ;;  %11354 = vmatprep.mubr.msk.f32.mxu1 %vm12661_vm0, %v14639_v62 }
 0x28d   :  { %11334 = vmatprep.subr.mxu0 %v14639_v62  ;;  %11348 = vmatprep.subr.mxu1 %v14639_v62 }
 0x28e   :  { %11335 = vmatpush3.msra.mxu0 %v13409_v31  ;;  %11349 = vmatpush3.msra.mxu1 %v13423_v36 }
 0x28f   :  { %11357 = vmatprep.subr.mxu0 %v14639_v62  ;;  %11350 = vmatprep.subr.mxu1 %v14639_v62 }
 0x290   :  { %11351 = vmatpush3.msra.mxu1 %v13427_v37 }
 0x291   :  { %11352 = vmatprep.subr.mxu1 %v14639_v62 }
 0x292   :  { %11353 = vmatpush3.msra.mxu1 %v13431_v38 }
 0x293   :  { %11375 = vmatprep.subr.mxu1 %v14639_v62 }
 0x312   :  { %v2722_v39 = vpop.f32.mrf.mxu0  ;;  %v2872_v40 = vpop.f32.mrf.mxu1 }
 0x313   :  { %v2796_v41 = vadd.f32 %v2795_v32, %v2722_v39 }
 0x314   :  { %v11194_v42 = vpop.f32.mrf.mxu0  ;;  %v11212_v43 = vpop.f32.mrf.mxu1 }
 0x315   :  { %v2799_v45 = vadd.f32 %v14661_v44, %v2796_v41  ;;  %v14664_v41 = vld [vmem:[#allocation33_spill] sm:$0xff] }
 0x317   :  { %v10217_v46 = vmul.f32 -1.442695, %v2799_v45 }
 0x318   :  { %v2942_v47 = vpop.f32.mrf.mxu0  ;;  %v3089_v49 = vpop.f32.mrf.mxu1 }
 0x319   :  { %12170 = vpow2.f32 %v10217_v46  ;;  %v2943_v53 = vadd.f32 %v2942_v47, %v2872_v40 }
 0x31a   :  { %v11219_v1 = vpop.f32.mrf.mxu0  ;;  %v11237_v51 = vpop.f32.mrf.mxu1 }
 0x31b   :  { %v2946_v3 = vadd.f32 %v14645_v7, %v2943_v53 }
 0x31d   :  { %v10220_v30 = vmul.f32 -1.442695, %v2946_v3 }
 0x31f   :  { %12172 = vpow2.f32 %v10220_v30 }
 0x321   :  { %v3019_v58 = vpop.f32.mrf.mxu0  ;;  %v3161_v2 = vpop.f32.mrf.mxu1 }
 0x322   :  { %v3090_v5 = vadd.f32 %v3089_v49, %v3019_v58 }
 0x323   :  { %v11230_v12 = vpop.f32.mrf.mxu0  ;;  %v11248_v59 = vpop.f32.mrf.mxu1 }
 0x324   :  { %v3093_v56 = vadd.f32 %v14663_v4, %v3090_v5  ;;  %v13477_v4 = vld [vmem:[#allocation7 + $0x58] sm:$0xff] }
 0x326   :  { %v12171_v9 = vpop.eup %12170  ;;  %v3231_v48 = vpop.f32.mrf.mxu0 }
 0x327   :  { %v3232_v60 = vadd.f32 %v3231_v48, %v3161_v2  ;;  %v2803_v55 = vadd.f32 1.0, %v12171_v9 }
 0x328   :  { %v11255_v0 = vpop.f32.mrf.mxu0 }
 0x329   :  { %v3235_v54 = vadd.f32 %v14662_v61, %v3232_v60  ;;  %v3391_v57 = vpop.f32.mrf.mxu1  ;;  %12174 = vrcp.f32 %v2803_v55 }
 0x32b   :  { %v10225_v50 = vmul.f32 -1.442695, %v3235_v54  ;;  %v11273_v11 = vpop.f32.mrf.mxu1  ;;  %v13461_v54 = vld [vmem:[#allocation5 + $0x10] sm:$0xff] }
 0x32c   :  { %v12173_v7 = vpop.eup %12172 }
 0x32d   :  { %v2950_v13 = vadd.f32 1.0, %v12173_v7  ;;  %12176 = vpow2.f32 %v10225_v50  ;;  %v13485_v7 = vld [vmem:[#allocation7 + $0x50] sm:$0xff] }
 0x32e   :  { %12178 = vtanh.f32 %v3093_v56  ;;  %v13480_v56 = vld [vmem:[#allocation7 + $0x78] sm:$0xff] }
 0x32f   :  { %12180 = vrcp.f32 %v2950_v13  ;;  %v13488_v13 = vld [vmem:[#allocation7 + $0x70] sm:$0xff] }
 0x332   :  { %v3318_v15 = vpop.f32.mrf.mxu0  ;;  %v3468_v17 = vpop.f32.mrf.mxu1 }
 0x333   :  { %v3392_v10 = vadd.f32 %v3391_v57, %v3318_v15  ;;  %v13464_v57 = vld [vmem:[#allocation5 + $0x20] sm:$0xff] }
 0x334   :  { %v11266_v14 = vpop.f32.mrf.mxu0  ;;  %v11284_v19 = vpop.f32.mrf.mxu1 }
 0x335   :  { %v3395_v18 = vadd.f32 %v14648_v8, %v3392_v10  ;;  %v13493_v14 = vld [vmem:[#allocation7 + $0x48] sm:$0xff] }
 0x336   :  { %v12175_v23 = vpop.eup %12174  ;;  %v13496_v19 = vld [vmem:[#allocation7 + $0x68] sm:$0xff] }
 0x337   :  { %v10228_v20 = vmul.f32 -1.442695, %v3395_v18 }
 0x338   :  { %v3538_v21 = vpop.f32.mrf.mxu0  ;;  %v3685_v22 = vpop.f32.mrf.mxu1 }
 0x339   :  { %12182 = vpow2.f32 %v10228_v20  ;;  %v3539_v25 = vadd.f32 %v3538_v21, %v3468_v17  ;;  %v13502_v21 = vld [vmem:[#allocation7 + $0x40] sm:$0xff] }
 0x33a   :  { %v12177_v32 = vpop.eup %12176  ;;  %v11291_v33 = vpop.f32.mrf.mxu0 }
 0x33b   :  { %v11309_v39 = vpop.f32.mrf.mxu1  ;;  %v12179_v40 = vpop.eup %12178  ;;  %v3542_v42 = vadd.f32 %v14664_v41, %v3539_v25  ;;  %v3239_v44 = vadd.f32 1.0, %v12177_v32  ;;  %v13522_v25 = vld [vmem:[#allocation5 + $0x48] sm:$0xff]  ;;  %v13527_v32 = vld [vmem:[#allocation5 + $0x30] sm:$0xff]  ;;  %v13532_v33 = vld [vmem:[#allocation5 + $0x40] sm:$0xff] }
 0x33c   :  { %v12181_v43 = vpop.eup %12180  ;;  %v3243_v46 = vmul.f32 %v12179_v40, %v12175_v23  ;;  %v13509_v23 = vld [vmem:[#allocation7 + $0x60] sm:$0xff]  ;;  %v13543_v40 = vld [vmem:[#allocation7 + $0x98] sm:$0xff] }
 0x33d   :  { %v3242_v45 = vmul.f32 %v12181_v43, %v13242_v6  ;;  %v10231_v47 = vmul.f32 -1.442695, %v3542_v42  ;;  %v13537_v39 = vld [vmem:[#allocation2 + $0x20] sm:$0xff]  ;;  %v13549_v41 = vld [vmem:[#allocation7 + $0xb8] sm:$0xff]  ;;  %v13552_v42 = vld [vmem:[#allocation7 + $0x90] sm:$0xff] }
 0x33e   :  { %v13557_v43 = vld [vmem:[#allocation7 + $0xb0] sm:$0xff] }
 0x33f   :  { %v13442_v49 = vadd.f32 %v3243_v46, %v3242_v45  ;;  %12184 = vpow2.f32 %v10231_v47  ;;  %v13565_v46 = vld [vmem:[#allocation7 + $0xa8] sm:$0xff]  ;;  %v13568_v47 = vld [vmem:[#allocation7 + $0x80] sm:$0xff] }
 0x340   :  { %12186 = vrcp.f32 %v3239_v44  ;;  %v13560_v44 = vld [vmem:[#allocation7 + $0x88] sm:$0xff] }
 0x341   :  { %12188 = vtanh.f32 %v13442_v49  ;;  %v3615_v8 = vpop.f32.mrf.mxu0  ;;  %v3757_v53 = vpop.f32.mrf.mxu1 }
 0x342   :  { %v3686_v30 = vadd.f32 %v3685_v22, %v3615_v8 }
 0x343   :  { %v11302_v1 = vpop.f32.mrf.mxu0  ;;  %v11320_v51 = vpop.f32.mrf.mxu1 }
 0x344   :  { %v3689_v9 = vadd.f32 %v13062_v52, %v3686_v30  ;;  %v13453_v52 = vld [vmem:[#allocation5 + $0x18] sm:$0xff]  ;;  %v13595_v30 = vld [vmem:[#allocation5 + $0x50] sm:$0xff] }
 0x345   :  { %v13587_v51 = vld [vmem:[#allocation5 + $0x58] sm:$0xff] }
 0x346   :  { %v12183_v3 = vpop.eup %12182  ;;  %v3827_v58 = vpop.f32.mrf.mxu0 }
 0x347   :  { %v3828_v2 = vadd.f32 %v3827_v58, %v3757_v53  ;;  %v3399_v12 = vadd.f32 1.0, %v12183_v3  ;;  %v13574_v53 = vld [vmem:[#allocation7 + $0xa0] sm:$0xff]  ;;  %v13590_v3 = vld [vmem:[#allocation5 + $0x68] sm:$0xff] }
 0x348   :  { %v11327_v59 = vpop.f32.mrf.mxu0  ;;  %v13598_v58 = vld [vmem:[#allocation5 + $0x60] sm:$0xff] }
 0x349   :  { %v3831_v6 = vadd.f32 %v13064_v63, %v3828_v2  ;;  %12190 = vrcp.f32 %v3399_v12  ;;  %v13456_v63 = vld [vmem:[#allocation5 + $0x28] sm:$0xff]  ;;  %v13611_v2 = vld [vmem:[#allocation7 + $0xd8] sm:$0xff]  ;;  %v13619_v59 = vld [vmem:[#allocation7 + $0xd0] sm:$0xff] }
 0x34a   :  { %v13614_v12 = vld [vmem:[#allocation7 + $0xf8] sm:$0xff] }
 0x34b   :  { %v10236_v5 = vmul.f32 -1.442695, %v3831_v6  ;;  %v13622_v6 = vld [vmem:[#allocation7 + $0xf0] sm:$0xff] }
 0x34c   :  { %v12185_v48 = vpop.eup %12184 }
 0x34d   :  { %v12187_v60 = vpop.eup %12186  ;;  %v3546_v55 = vadd.f32 1.0, %v12185_v48  ;;  %12192 = vpow2.f32 %v10236_v5  ;;  %v13630_v5 = vld [vmem:[#allocation7 + $0xe8] sm:$0xff]  ;;  %v13635_v48 = vld [vmem:[#allocation7 + $0xc0] sm:$0xff] }
 0x34e   :  { %v12189_v0 = vpop.eup %12188  ;;  %12194 = vtanh.f32 %v3689_v9  ;;  %v13627_v9 = vld [vmem:[#allocation7 + $0xc8] sm:$0xff] }
 0x34f   :  { %12196 = vrcp.f32 %v3546_v55  ;;  %v3246_v61 = vmul.f32 %v12189_v0, %v12187_v60  ;;  %v13640_v60 = vld [vmem:[#allocation7 + $0xe0] sm:$0xff]  ;;  %v13650_v55 = vld [vmem:[#allocation5 + $0x78] sm:$0xff]  ;;  %v13656_v0 = vld [vmem:[#allocation5 + $0x70] sm:$0xff] }
 0x350   :  { %14665 = vst [vmem:[#allocation28_spill] sm:$0xff] %v13650_v55  ;;  %14666 = vst [vmem:[#allocation31_spill] sm:$0xff] %v13656_v0 }
 0x351   :  { %10237 = vst.msk [vmem:[%s14574_s8 + $0x10] sm:$0xff] %vm215_vm2, %v3246_v61  ;;  %11337 = vmatmul.mubr.msk.f32.vlgmr.msra.gmra.mxu0 %vm215_vm2, %v3246_v61  ;;  %11355 = vmatmul.mubr.msk.f32.vlgmr.msra.gmra.mxu1 %vm215_vm2, %v3246_v61 }
 0x352   :  { %11358 = vmatpush3.msra.mxu0 %v13453_v52  ;;  %11376 = vmatpush3.msra.mxu1 %v13456_v63 }
 0x353   :  { %11359 = vmatprep.subr.mxu0 %v14639_v62  ;;  %11377 = vmatprep.subr.mxu1 %v14639_v62 }
 0x354   :  { %11360 = vmatpush3.msra.mxu0 %v13461_v54  ;;  %11378 = vmatpush3.msra.mxu1 %v13464_v57 }
 0x355   :  { %11361 = vmatprep.mubr.msk.f32.mxu0 %vm12661_vm0, %v14639_v62  ;;  %11364 = vmatprep.subr.mxu0 %v14639_v62 }
 0x356   :  { %11379 = vmatprep.mubr.msk.f32.mxu1 %vm12661_vm0, %v14639_v62  ;;  %11382 = vmatprep.subr.mxu1 %v14639_v62  ;;  %v12191_v50 = vpop.eup %12190 }
 0x357   :  { %11362 = vmatmul.mubr.msk.f32.vlgmr.msra.gmra.mxu0 %vm289_vm1, %v13413_v34  ;;  %11380 = vmatmul.mubr.msk.f32.vlgmr.msra.gmra.mxu1 %vm289_vm1, %v13413_v34 }
 0x358   :  { %11365 = vmatpush3.msra.mxu0 %v13477_v4  ;;  %11383 = vmatpush3.msra.mxu1 %v13480_v56 }
 0x359   :  { %11366 = vmatprep.subr.mxu0 %v14639_v62  ;;  %11384 = vmatprep.subr.mxu1 %v14639_v62 }
 0x35a   :  { %v12193_v11 = vpop.eup %12192  ;;  %11367 = vmatpush3.msra.mxu0 %v13485_v7  ;;  %11385 = vmatpush3.msra.mxu1 %v13488_v13 }
 0x35b   :  { %v12195_v15 = vpop.eup %12194  ;;  %11368 = vmatprep.subr.mxu0 %v14639_v62  ;;  %11386 = vmatprep.subr.mxu1 %v14639_v62  ;;  %v3835_v10 = vadd.f32 1.0, %v12193_v11 }
 0x35c   :  { %v12197_v17 = vpop.eup %12196  ;;  %11369 = vmatpush3.msra.mxu0 %v13493_v14  ;;  %11387 = vmatpush3.msra.mxu1 %v13496_v19  ;;  %v3839_v20 = vmul.f32 %v12195_v15, %v12191_v50 }
 0x35d   :  { %v3838_v18 = vmul.f32 %v12197_v17, %v13285_v16  ;;  %11370 = vmatprep.subr.mxu0 %v14639_v62  ;;  %11388 = vmatprep.subr.mxu1 %v14639_v62  ;;  %12198 = vrcp.f32 %v3835_v10  ;;  %v13519_v16 = vld [vmem:[#allocation5 + $0x38] sm:$0xff] }
 0x35e   :  { %11371 = vmatpush3.msra.mxu0 %v13502_v21  ;;  %11372 = vmatprep.mubr.msk.f32.mxu0 %vm12661_vm0, %v14639_v62 }
 0x35f   :  { %v13507_v22 = vadd.f32 %v3839_v20, %v3838_v18  ;;  %11389 = vmatpush3.msra.mxu1 %v13509_v23  ;;  %11390 = vmatprep.mubr.msk.f32.mxu1 %vm12661_vm0, %v14639_v62  ;;  %v13689_v20 = vld [vmem:[#allocation8] ss:$0 sm:$0xff] }
 0x360   :  { %11373 = vmatmul.mubr.msk.f32.vlgmr.msra.gmra.mxu0 %vm215_vm2, %v3246_v61  ;;  %11391 = vmatmul.mubr.msk.f32.vlgmr.msra.gmra.mxu1 %vm215_vm2, %v3246_v61  ;;  %v3991_v61 = vpop.f32.mrf.mxu1  ;;  %14667 = vst [vmem:[#allocation30_spill] sm:$0xff] %v13689_v20 }
 0x361   :  { %12200 = vtanh.f32 %v13507_v22  ;;  %11393 = vmatprep.subr.mxu0 %v14639_v62  ;;  %11411 = vmatprep.subr.mxu1 %v14639_v62 }
 0x362   :  { %11394 = vmatpush3.msra.mxu0 %v13519_v16  ;;  %11412 = vmatpush3.msra.mxu1 %v13522_v25  ;;  %v11345_v50 = vpop.f32.mrf.mxu1 }
 0x363   :  { %11395 = vmatprep.subr.mxu0 %v14639_v62  ;;  %11413 = vmatprep.subr.mxu1 %v14639_v62 }
 0x364   :  { %11396 = vmatpush3.msra.mxu0 %v13527_v32  ;;  %11397 = vmatprep.mubr.msk.f32.mxu0 %vm12661_vm0, %v14639_v62 }
 0x365   :  { %11414 = vmatpush3.msra.mxu1 %v13532_v33  ;;  %11398 = vmatmul.mubr.msk.f32.vlgmr.msra.gmra.mxu0 %vm289_vm1, %v13413_v34 }
 0x366   :  { %11400 = vmatprep.subr.mxu0 %v14639_v62  ;;  %11415 = vmatprep.mubr.msk.f32.mxu1 %vm12661_vm0, %v14639_v62 }
 0x367   :  { %11418 = vmatprep.subr.mxu1 %v14639_v62  ;;  %11401 = vmatpush3.msra.mxu0 %v13543_v40 }
 0x368   :  { %11416 = vmatmul.mubr.msk.f32.vlgmr.msra.gmra.mxu1 %vm289_vm1, %v13537_v39  ;;  %11402 = vmatprep.subr.mxu0 %v14639_v62 }
 0x369   :  { %11419 = vmatpush3.msra.mxu1 %v13549_v41  ;;  %11403 = vmatpush3.msra.mxu0 %v13552_v42 }
 0x36a   :  { %11420 = vmatprep.subr.mxu1 %v14639_v62  ;;  %11404 = vmatprep.subr.mxu0 %v14639_v62  ;;  %v12199_v45 = vpop.eup %12198 }
 0x36b   :  { %11421 = vmatpush3.msra.mxu1 %v13557_v43  ;;  %11405 = vmatpush3.msra.mxu0 %v13560_v44 }
 0x36c   :  { %11422 = vmatprep.subr.mxu1 %v14639_v62  ;;  %11406 = vmatprep.subr.mxu0 %v14639_v62 }
 0x36d   :  { %11423 = vmatpush3.msra.mxu1 %v13565_v46  ;;  %11407 = vmatpush3.msra.mxu0 %v13568_v47 }
 0x36e   :  { %v12201_v8 = vpop.eup %12200  ;;  %11424 = vmatprep.subr.mxu1 %v14639_v62  ;;  %11408 = vmatprep.mubr.msk.f32.mxu0 %vm12661_vm0, %v14639_v62 }
 0x36f   :  { %11425 = vmatpush3.msra.mxu1 %v13574_v53  ;;  %11426 = vmatprep.mubr.msk.f32.mxu1 %vm12661_vm0, %v14639_v62  ;;  %v3842_v1 = vmul.f32 %v12201_v8, %v12199_v45 }
 0x370   :  { %11429 = vmatprep.subr.mxu0 %v14639_v62  ;;  %11447 = vmatprep.subr.mxu1 %v14639_v62 }
 0x371   :  { %10238 = vst.msk [vmem:[%s14575_s9 + $0x28] sm:$0xff] %vm215_vm2, %v3842_v1  ;;  %11409 = vmatmul.mubr.msk.f32.vlgmr.msra.gmra.mxu0 %vm215_vm2, %v3842_v1  ;;  %11427 = vmatmul.mubr.msk.f32.vlgmr.msra.gmra.mxu1 %vm215_vm2, %v3842_v1 }
 0x372   :  { %11430 = vmatpush3.msra.mxu0 %v13587_v51  ;;  %11448 = vmatpush3.msra.mxu1 %v13590_v3 }
 0x373   :  { %11431 = vmatprep.subr.mxu0 %v14639_v62  ;;  %11449 = vmatprep.subr.mxu1 %v14639_v62 }
 0x374   :  { %11432 = vmatpush3.msra.mxu0 %v13595_v30  ;;  %11450 = vmatpush3.msra.mxu1 %v13598_v58 }
 0x375   :  { %11433 = vmatprep.mubr.msk.f32.mxu0 %vm12661_vm0, %v14639_v62  ;;  %11436 = vmatprep.subr.mxu0 %v14639_v62 }
 0x376   :  { %11451 = vmatprep.mubr.msk.f32.mxu1 %vm12661_vm0, %v14639_v62  ;;  %11454 = vmatprep.subr.mxu1 %v14639_v62 }
 0x377   :  { %11434 = vmatmul.mubr.msk.f32.vlgmr.msra.gmra.mxu0 %vm289_vm1, %v13537_v39  ;;  %11452 = vmatmul.mubr.msk.f32.vlgmr.msra.gmra.mxu1 %vm289_vm1, %v13537_v39 }
 0x378   :  { %11437 = vmatpush3.msra.mxu0 %v13611_v2  ;;  %11455 = vmatpush3.msra.mxu1 %v13614_v12 }
 0x379   :  { %11438 = vmatprep.subr.mxu0 %v14639_v62  ;;  %11456 = vmatprep.subr.mxu1 %v14639_v62 }
 0x37a   :  { %11439 = vmatpush3.msra.mxu0 %v13619_v59  ;;  %11457 = vmatpush3.msra.mxu1 %v13622_v6 }
 0x37b   :  { %11440 = vmatprep.subr.mxu0 %v14639_v62  ;;  %11458 = vmatprep.subr.mxu1 %v14639_v62 }
 0x37c   :  { %11441 = vmatpush3.msra.mxu0 %v13627_v9  ;;  %11459 = vmatpush3.msra.mxu1 %v13630_v5 }
 0x37d   :  { %11442 = vmatprep.subr.mxu0 %v14639_v62  ;;  %11460 = vmatprep.subr.mxu1 %v14639_v62 }
 0x37e   :  { %11443 = vmatpush3.msra.mxu0 %v13635_v48  ;;  %11444 = vmatprep.mubr.msk.f32.mxu0 %vm12661_vm0, %v14639_v62 }
 0x37f   :  { %11461 = vmatpush3.msra.mxu1 %v13640_v60  ;;  %11462 = vmatprep.mubr.msk.f32.mxu1 %vm12661_vm0, %v14639_v62 }
 0x380   :  { %11445 = vmatmul.mubr.msk.f32.vlgmr.msra.gmra.mxu0 %vm215_vm2, %v3842_v1  ;;  %11463 = vmatmul.mubr.msk.f32.vlgmr.msra.gmra.mxu1 %vm215_vm2, %v3842_v1 }
 0x381   :  { %11465 = vmatprep.subr.mxu0 %v14639_v62  ;;  %11469 = vmatprep.mubr.msk.f32.mxu0 %vm12661_vm0, %v14639_v62 }
 0x382   :  { %11466 = vmatpush3.msra.mxu0 %v13650_v55  ;;  %11483 = vmatprep.subr.mxu1 %v14639_v62 }
 0x383   :  { %11467 = vmatprep.subr.mxu0 %v14639_v62  ;;  %11484 = vmatpush3.msra.mxu1 %v13381_v24 }
 0x384   :  { %11468 = vmatpush3.msra.mxu0 %v13656_v0  ;;  %11485 = vmatprep.subr.mxu1 %v14639_v62  ;;  %v13711_v0 = vld [vmem:[#allocation8 + $0x7] ss:$0 sm:$0xff] }
 0x385   :  { %11470 = vmatmul.mubr.msk.f32.vlgmr.msra.gmra.mxu0 %vm289_vm1, %v13537_v39  ;;  %11486 = vmatpush3.msra.mxu1 %v13388_v26 }
 0x386   :  { %11472 = vmatprep.subr.mxu0 %v14639_v62  ;;  %11487 = vmatprep.mubr.msk.f32.mxu1 %vm12661_vm0, %v14639_v62 }
 0x387   :  { %11490 = vmatprep.subr.mxu1 %v14639_v62  ;;  %11473 = vmatpush3.msra.mxu0 %v13395_v27 }
 0x388   :  { %11488 = vmatmul.mubr.msk.f32.vlgmr.msra.gmra.mxu1 %vm289_vm1, %v13537_v39  ;;  %11474 = vmatprep.subr.mxu0 %v14639_v62 }
 0x389   :  { %11491 = vmatpush3.msra.mxu1 %v13417_v35  ;;  %11475 = vmatpush3.msra.mxu0 %v13401_v28 }
 0x38a   :  { %11492 = vmatprep.subr.mxu1 %v14639_v62  ;;  %11476 = vmatprep.subr.mxu0 %v14639_v62 }
 0x38b   :  { %11493 = vmatpush3.msra.mxu1 %v13423_v36  ;;  %11477 = vmatpush3.msra.mxu0 %v13405_v29 }
 0x38c   :  { %11494 = vmatprep.subr.mxu1 %v14639_v62  ;;  %11478 = vmatprep.subr.mxu0 %v14639_v62 }
 0x38d   :  { %11495 = vmatpush3.msra.mxu1 %v13427_v37  ;;  %11479 = vmatpush3.msra.mxu0 %v13409_v31  ;;  %v13692_v31 = vld [vmem:[#allocation8 + $0x1] ss:$0 sm:$0xff] }
 0x38e   :  { %11496 = vmatprep.subr.mxu1 %v14639_v62  ;;  %11480 = vmatprep.mubr.msk.f32.mxu0 %vm12661_vm0, %v14639_v62  ;;  %14668 = vst [vmem:[#allocation33_spill] sm:$0xff] %v13692_v31 }
 0x38f   :  { %11497 = vmatpush3.msra.mxu1 %v13431_v38  ;;  %11498 = vmatprep.mubr.msk.f32.mxu1 %vm12661_vm0, %v14639_v62 }
 0x390   :  { %11501 = vmatprep.subr.mxu0 %v14639_v62  ;;  %11519 = vmatprep.subr.mxu1 %v14639_v62 }
 0x411   :  { %v3918_v11 = vpop.f32.mrf.mxu0  ;;  %v4068_v15 = vpop.f32.mrf.mxu1 }
 0x412   :  { %v3992_v17 = vadd.f32 %v3991_v61, %v3918_v11 }
 0x413   :  { %v11338_v10 = vpop.f32.mrf.mxu0  ;;  %v11356_v18 = vpop.f32.mrf.mxu1 }
 0x414   :  { %v3995_v45 = vadd.f32 %v13689_v20, %v3992_v17 }
 0x416   :  { %v10241_v8 = vmul.f32 -1.442695, %v3995_v45 }
 0x417   :  { %v4138_v1 = vpop.f32.mrf.mxu0  ;;  %v4285_v38 = vpop.f32.mrf.mxu1 }
 0x418   :  { %12202 = vpow2.f32 %v10241_v8  ;;  %v4139_v37 = vadd.f32 %v4138_v1, %v4068_v15  ;;  %v13695_v8 = vld [vmem:[#allocation8 + $0x3] ss:$0 sm:$0xff]  ;;  %v13698_v15 = vld [vmem:[#allocation8 + $0x2] ss:$0 sm:$0xff] }
 0x419   :  { %v11363_v36 = vpop.f32.mrf.mxu0  ;;  %v11381_v35 = vpop.f32.mrf.mxu1  ;;  %14669 = vst [vmem:[#allocation35_spill] sm:$0xff] %v13695_v8  ;;  %14670 = vst [vmem:[#allocation36_spill] sm:$0xff] %v13698_v15 }
 0x41a   :  { %v4142_v50 = vadd.f32 %v13692_v31, %v4139_v37 }
 0x41c   :  { %v10244_v29 = vmul.f32 -1.442695, %v4142_v50 }
 0x41e   :  { %12204 = vpow2.f32 %v10244_v29 }
 0x420   :  { %v4215_v61 = vpop.f32.mrf.mxu0  ;;  %v4357_v11 = vpop.f32.mrf.mxu1 }
 0x421   :  { %v4286_v27 = vadd.f32 %v4285_v38, %v4215_v61 }
 0x422   :  { %v11374_v10 = vpop.f32.mrf.mxu0  ;;  %v11392_v18 = vpop.f32.mrf.mxu1 }
 0x423   :  { %v4289_v37 = vadd.f32 %v13698_v15, %v4286_v27  ;;  %v13701_v18 = vld [vmem:[#allocation8 + $0x4] ss:$0 sm:$0xff] }
 0x424   :  { %14671 = vst [vmem:[#allocation37_spill] sm:$0xff] %v13701_v18 }
 0x425   :  { %v12203_v28 = vpop.eup %12202  ;;  %v4427_v17 = vpop.f32.mrf.mxu0 }
 0x426   :  { %v4428_v45 = vadd.f32 %v4427_v17, %v4357_v11  ;;  %v3999_v20 = vadd.f32 1.0, %v12203_v28 }
 0x427   :  { %v11399_v26 = vpop.f32.mrf.mxu0 }
 0x428   :  { %v4431_v35 = vadd.f32 %v13695_v8, %v4428_v45  ;;  %v4587_v36 = vpop.f32.mrf.mxu1  ;;  %12206 = vrcp.f32 %v3999_v20 }
 0x42a   :  { %v10249_v29 = vmul.f32 -1.442695, %v4431_v35  ;;  %v11417_v1 = vpop.f32.mrf.mxu1 }
 0x42b   :  { %v12205_v50 = vpop.eup %12204 }
 0x42c   :  { %v4146_v10 = vadd.f32 1.0, %v12205_v50  ;;  %12208 = vpow2.f32 %v10249_v29 }
 0x42d   :  { %12210 = vtanh.f32 %v4289_v37 }
 0x42e   :  { %12212 = vrcp.f32 %v4146_v10  ;;  %v13704_v10 = vld [vmem:[#allocation8 + $0x5] ss:$0 sm:$0xff] }
 0x42f   :  { %14672 = vst [vmem:[#allocation38_spill] sm:$0xff] %v13704_v10 }
 0x431   :  { %v4514_v38 = vpop.f32.mrf.mxu0  ;;  %v4664_v28 = vpop.f32.mrf.mxu1 }
 0x432   :  { %v4588_v26 = vadd.f32 %v4587_v36, %v4514_v38 }
 0x433   :  { %v11410_v61 = vpop.f32.mrf.mxu0  ;;  %v11428_v11 = vpop.f32.mrf.mxu1 }
 0x434   :  { %v4591_v17 = vadd.f32 %v13701_v18, %v4588_v26 }
 0x435   :  { %v12207_v35 = vpop.eup %12206 }
 0x436   :  { %v10252_v45 = vmul.f32 -1.442695, %v4591_v17 }
 0x437   :  { %v4734_v8 = vpop.f32.mrf.mxu0  ;;  %v4881_v27 = vpop.f32.mrf.mxu1 }
 0x438   :  { %12214 = vpow2.f32 %v10252_v45  ;;  %v4735_v1 = vadd.f32 %v4734_v8, %v4664_v28 }
 0x439   :  { %v12209_v20 = vpop.eup %12208  ;;  %v11435_v50 = vpop.f32.mrf.mxu0 }
 0x43a   :  { %v11453_v29 = vpop.f32.mrf.mxu1  ;;  %v12211_v37 = vpop.eup %12210  ;;  %v4738_v36 = vadd.f32 %v13704_v10, %v4735_v1  ;;  %v4435_v61 = vadd.f32 1.0, %v12209_v20 }
 0x43b   :  { %v12213_v38 = vpop.eup %12212  ;;  %v4439_v15 = vmul.f32 %v12211_v37, %v12207_v35  ;;  %v13716_v35 = vld [vmem:[#allocation8 + $0x6] ss:$0 sm:$0xff] }
 0x43c   :  { %v4438_v11 = vmul.f32 %v12213_v38, %v13442_v49  ;;  %v10255_v26 = vmul.f32 -1.442695, %v4738_v36 }
 0x43e   :  { %v13708_v17 = vadd.f32 %v4439_v15, %v4438_v11  ;;  %12216 = vpow2.f32 %v10255_v26 }
 0x43f   :  { %12218 = vrcp.f32 %v4435_v61 }
 0x440   :  { %12220 = vtanh.f32 %v13708_v17  ;;  %v4811_v8 = vpop.f32.mrf.mxu0  ;;  %v4953_v28 = vpop.f32.mrf.mxu1 }
 0x441   :  { %v4882_v18 = vadd.f32 %v4881_v27, %v4811_v8 }
 0x442   :  { %v11446_v45 = vpop.f32.mrf.mxu0  ;;  %v11464_v50 = vpop.f32.mrf.mxu1 }
 0x443   :  { %v4885_v37 = vadd.f32 %v13716_v35, %v4882_v18 }
 0x445   :  { %v12215_v29 = vpop.eup %12214  ;;  %v5023_v31 = vpop.f32.mrf.mxu0 }
 0x446   :  { %v5024_v1 = vadd.f32 %v5023_v31, %v4953_v28  ;;  %v4595_v10 = vadd.f32 1.0, %v12215_v29 }
 0x447   :  { %v11471_v20 = vpop.f32.mrf.mxu0 }
 0x448   :  { %v5027_v49 = vadd.f32 %v13711_v0, %v5024_v1  ;;  %v13714_v15 = vpop.f32.mrf.mxu1  ;;  %12222 = vrcp.f32 %v4595_v10 }
 0x44a   :  { %v10260_v36 = vmul.f32 -1.442695, %v5027_v49  ;;  %v11489_v38 = vpop.f32.mrf.mxu1  ;;  %v14673_v49 = vld [vmem:[#allocation31_spill] sm:$0xff] }
 0x44b   :  { %v12217_v61 = vpop.eup %12216  ;;  %v14678_v38 = vld [vmem:[#allocation29_spill] sm:$0xff] }
 0x44c   :  { %v12219_v11 = vpop.eup %12218  ;;  %v4742_v27 = vadd.f32 1.0, %v12217_v61  ;;  %12224 = vpow2.f32 %v10260_v36  ;;  %v14675_v36 = vld [vmem:[#allocation23_spill] sm:$0xff]  ;;  %v13871_v61 = vld [vmem:[#allocation2 + $0x28] sm:$0xff] }
 0x44d   :  { %v12221_v31 = vpop.eup %12220  ;;  %12226 = vtanh.f32 %v4885_v37  ;;  %v14674_v37 = vld [vmem:[#allocation22_spill] sm:$0xff] }
 0x44e   :  { %12228 = vrcp.f32 %v4742_v27  ;;  %v4442_v26 = vmul.f32 %v12221_v31, %v12219_v11  ;;  %v14679_v11 = vld [vmem:[#allocation32_spill] sm:$0xff]  ;;  %v14680_v27 = vld [vmem:[#allocation26_spill] sm:$0xff]  ;;  %v14681_v31 = vld [vmem:[#allocation27_spill] sm:$0xff] }
 0x450   :  { %10261 = vst.msk [vmem:[%s14574_s8 + $0x18] sm:$0xff] %vm215_vm2, %v4442_v26  ;;  %11481 = vmatmul.mubr.msk.f32.vlgmr.msra.gmra.mxu0 %vm215_vm2, %v4442_v26  ;;  %11499 = vmatmul.mubr.msk.f32.vlgmr.msra.gmra.mxu1 %vm215_vm2, %v4442_v26 }
 0x451   :  { %11502 = vmatpush3.msra.mxu0 %v13453_v52  ;;  %11520 = vmatpush3.msra.mxu1 %v13456_v63 }
 0x452   :  { %11503 = vmatprep.subr.mxu0 %v14639_v62  ;;  %11521 = vmatprep.subr.mxu1 %v14639_v62 }
 0x453   :  { %11504 = vmatpush3.msra.mxu0 %v13461_v54  ;;  %11522 = vmatpush3.msra.mxu1 %v13464_v57 }
 0x454   :  { %11505 = vmatprep.mubr.msk.f32.mxu0 %vm12661_vm0, %v14639_v62  ;;  %11508 = vmatprep.subr.mxu0 %v14639_v62 }
 0x455   :  { %11523 = vmatprep.mubr.msk.f32.mxu1 %vm12661_vm0, %v14639_v62  ;;  %11526 = vmatprep.subr.mxu1 %v14639_v62  ;;  %v12223_v18 = vpop.eup %12222 }
 0x456   :  { %11506 = vmatmul.mubr.msk.f32.vlgmr.msra.gmra.mxu0 %vm289_vm1, %v13537_v39  ;;  %11524 = vmatmul.mubr.msk.f32.vlgmr.msra.gmra.mxu1 %vm289_vm1, %v13537_v39 }
 0x457   :  { %11509 = vmatpush3.msra.mxu0 %v13477_v4  ;;  %11527 = vmatpush3.msra.mxu1 %v13480_v56 }
 0x458   :  { %11510 = vmatprep.subr.mxu0 %v14639_v62  ;;  %11528 = vmatprep.subr.mxu1 %v14639_v62 }
 0x459   :  { %v12225_v10 = vpop.eup %12224  ;;  %11511 = vmatpush3.msra.mxu0 %v13485_v7  ;;  %11529 = vmatpush3.msra.mxu1 %v13488_v13 }
 0x45a   :  { %v12227_v8 = vpop.eup %12226  ;;  %11512 = vmatprep.subr.mxu0 %v14639_v62  ;;  %11530 = vmatprep.subr.mxu1 %v14639_v62  ;;  %v5031_v45 = vadd.f32 1.0, %v12225_v10 }
 0x45b   :  { %v12229_v28 = vpop.eup %12228  ;;  %11513 = vmatpush3.msra.mxu0 %v13493_v14  ;;  %11531 = vmatpush3.msra.mxu1 %v13496_v19  ;;  %v5035_v29 = vmul.f32 %v12227_v8, %v12223_v18 }
 0x45c   :  { %v5034_v50 = vmul.f32 %v12229_v28, %v13507_v22  ;;  %11514 = vmatprep.subr.mxu0 %v14639_v62  ;;  %11532 = vmatprep.subr.mxu1 %v14639_v62  ;;  %12230 = vrcp.f32 %v5031_v45 }
 0x45d   :  { %11515 = vmatpush3.msra.mxu0 %v13502_v21  ;;  %11516 = vmatprep.mubr.msk.f32.mxu0 %vm12661_vm0, %v14639_v62 }
 0x45e   :  { %v13757_v1 = vadd.f32 %v5035_v29, %v5034_v50  ;;  %11533 = vmatpush3.msra.mxu1 %v13509_v23  ;;  %11534 = vmatprep.mubr.msk.f32.mxu1 %vm12661_vm0, %v14639_v62  ;;  %v14683_v50 = vld [vmem:[#allocation30_spill] sm:$0xff] }
 0x45f   :  { %11517 = vmatmul.mubr.msk.f32.vlgmr.msra.gmra.mxu0 %vm215_vm2, %v4442_v26  ;;  %11535 = vmatmul.mubr.msk.f32.vlgmr.msra.gmra.mxu1 %vm215_vm2, %v4442_v26  ;;  %v14682_v26 = vld [vmem:[#allocation34_spill] sm:$0xff] }
 0x460   :  { %12232 = vtanh.f32 %v13757_v1  ;;  %11537 = vmatprep.subr.mxu0 %v14639_v62  ;;  %11555 = vmatprep.subr.mxu1 %v14639_v62 }
 0x461   :  { %11538 = vmatpush3.msra.mxu0 %v13519_v16  ;;  %11556 = vmatpush3.msra.mxu1 %v13522_v25 }
 0x462   :  { %11539 = vmatprep.subr.mxu0 %v14639_v62  ;;  %11557 = vmatprep.subr.mxu1 %v14639_v62 }
 0x463   :  { %11540 = vmatpush3.msra.mxu0 %v13527_v32  ;;  %11541 = vmatprep.mubr.msk.f32.mxu0 %vm12661_vm0, %v14639_v62 }
 0x464   :  { %11558 = vmatpush3.msra.mxu1 %v13532_v33  ;;  %11542 = vmatmul.mubr.msk.f32.vlgmr.msra.gmra.mxu0 %vm289_vm1, %v13537_v39 }
 0x465   :  { %11544 = vmatprep.subr.mxu0 %v14639_v62  ;;  %11559 = vmatprep.mubr.msk.f32.mxu1 %vm12661_vm0, %v14639_v62 }
 0x466   :  { %11562 = vmatprep.subr.mxu1 %v14639_v62  ;;  %11545 = vmatpush3.msra.mxu0 %v13543_v40 }
 0x467   :  { %11560 = vmatmul.mubr.msk.f32.vlgmr.msra.gmra.mxu1 %vm289_vm1, %v13413_v34  ;;  %11546 = vmatprep.subr.mxu0 %v14639_v62 }
 0x468   :  { %11563 = vmatpush3.msra.mxu1 %v13549_v41  ;;  %11547 = vmatpush3.msra.mxu0 %v13552_v42 }
 0x469   :  { %11564 = vmatprep.subr.mxu1 %v14639_v62  ;;  %11548 = vmatprep.subr.mxu0 %v14639_v62  ;;  %v12231_v22 = vpop.eup %12230 }
 0x46a   :  { %11565 = vmatpush3.msra.mxu1 %v13557_v43  ;;  %11549 = vmatpush3.msra.mxu0 %v13560_v44 }
 0x46b   :  { %11566 = vmatprep.subr.mxu1 %v14639_v62  ;;  %11550 = vmatprep.subr.mxu0 %v14639_v62 }
 0x46c   :  { %11567 = vmatpush3.msra.mxu1 %v13565_v46  ;;  %11551 = vmatpush3.msra.mxu0 %v13568_v47 }
 0x46d   :  { %v12233_v39 = vpop.eup %12232  ;;  %11568 = vmatprep.subr.mxu1 %v14639_v62  ;;  %11552 = vmatprep.mubr.msk.f32.mxu0 %vm12661_vm0, %v14639_v62 }
 0x46e   :  { %11569 = vmatpush3.msra.mxu1 %v13574_v53  ;;  %11570 = vmatprep.mubr.msk.f32.mxu1 %vm12661_vm0, %v14639_v62  ;;  %v5038_v20 = vmul.f32 %v12233_v39, %v12231_v22 }
 0x46f   :  { %11573 = vmatprep.subr.mxu0 %v14639_v62  ;;  %11591 = vmatprep.subr.mxu1 %v14639_v62 }
 0x470   :  { %10262 = vst.msk [vmem:[%s14575_s9 + $0x20] sm:$0xff] %vm215_vm2, %v5038_v20  ;;  %11553 = vmatmul.mubr.msk.f32.vlgmr.msra.gmra.mxu0 %vm215_vm2, %v5038_v20  ;;  %11571 = vmatmul.mubr.msk.f32.vlgmr.msra.gmra.mxu1 %vm215_vm2, %v5038_v20 }
 0x471   :  { %11574 = vmatpush3.msra.mxu0 %v13587_v51  ;;  %11592 = vmatpush3.msra.mxu1 %v13590_v3 }
 0x472   :  { %11575 = vmatprep.subr.mxu0 %v14639_v62  ;;  %11593 = vmatprep.subr.mxu1 %v14639_v62 }
 0x473   :  { %11576 = vmatpush3.msra.mxu0 %v13595_v30  ;;  %11594 = vmatpush3.msra.mxu1 %v13598_v58 }
 0x474   :  { %11577 = vmatprep.mubr.msk.f32.mxu0 %vm12661_vm0, %v14639_v62  ;;  %11580 = vmatprep.subr.mxu0 %v14639_v62 }
 0x475   :  { %11595 = vmatprep.mubr.msk.f32.mxu1 %vm12661_vm0, %v14639_v62  ;;  %11598 = vmatprep.subr.mxu1 %v14639_v62 }
 0x476   :  { %11578 = vmatmul.mubr.msk.f32.vlgmr.msra.gmra.mxu0 %vm289_vm1, %v13413_v34  ;;  %11596 = vmatmul.mubr.msk.f32.vlgmr.msra.gmra.mxu1 %vm289_vm1, %v13413_v34 }
 0x477   :  { %11581 = vmatpush3.msra.mxu0 %v13611_v2  ;;  %11599 = vmatpush3.msra.mxu1 %v13614_v12 }
 0x478   :  { %11582 = vmatprep.subr.mxu0 %v14639_v62  ;;  %11600 = vmatprep.subr.mxu1 %v14639_v62 }
 0x479   :  { %11583 = vmatpush3.msra.mxu0 %v13619_v59  ;;  %11601 = vmatpush3.msra.mxu1 %v13622_v6 }
 0x47a   :  { %11584 = vmatprep.subr.mxu0 %v14639_v62  ;;  %11602 = vmatprep.subr.mxu1 %v14639_v62 }
 0x47b   :  { %11585 = vmatpush3.msra.mxu0 %v13627_v9  ;;  %11603 = vmatpush3.msra.mxu1 %v13630_v5 }
 0x47c   :  { %11586 = vmatprep.subr.mxu0 %v14639_v62  ;;  %11604 = vmatprep.subr.mxu1 %v14639_v62 }
 0x47d   :  { %11587 = vmatpush3.msra.mxu0 %v13635_v48  ;;  %11588 = vmatprep.mubr.msk.f32.mxu0 %vm12661_vm0, %v14639_v62 }
 0x47e   :  { %11605 = vmatpush3.msra.mxu1 %v13640_v60  ;;  %11606 = vmatprep.mubr.msk.f32.mxu1 %vm12661_vm0, %v14639_v62 }
 0x47f   :  { %11589 = vmatmul.mubr.msk.f32.vlgmr.msra.gmra.mxu0 %vm215_vm2, %v5038_v20  ;;  %11607 = vmatmul.mubr.msk.f32.vlgmr.msra.gmra.mxu1 %vm215_vm2, %v5038_v20 }
 0x480   :  { %11609 = vmatprep.subr.mxu0 %v14639_v62  ;;  %11613 = vmatprep.mubr.msk.f32.mxu0 %vm12661_vm0, %v14639_v62 }
 0x481   :  { %11610 = vmatpush3.msra.mxu0 %v13650_v55  ;;  %11627 = vmatprep.subr.mxu1 %v14639_v62 }
 0x482   :  { %11611 = vmatprep.subr.mxu0 %v14639_v62  ;;  %11628 = vmatpush3.msra.mxu1 %v13381_v24  ;;  %v14676_v24 = vld [vmem:[#allocation24_spill] sm:$0xff] }
 0x483   :  { %11612 = vmatpush3.msra.mxu0 %v14673_v49  ;;  %11629 = vmatprep.subr.mxu1 %v14639_v62 }
 0x484   :  { %11614 = vmatmul.mubr.msk.f32.vlgmr.msra.gmra.mxu0 %vm289_vm1, %v13413_v34  ;;  %11630 = vmatpush3.msra.mxu1 %v14674_v37  ;;  %v14677_v34 = vld [vmem:[#allocation25_spill] sm:$0xff] }
 0x485   :  { %11616 = vmatprep.subr.mxu0 %v14639_v62  ;;  %11631 = vmatprep.mubr.msk.f32.mxu1 %vm12661_vm0, %v14639_v62 }
 0x486   :  { %11634 = vmatprep.subr.mxu1 %v14639_v62  ;;  %11617 = vmatpush3.msra.mxu0 %v14675_v36 }
 0x487   :  { %11618 = vmatprep.subr.mxu0 %v14639_v62  ;;  %11624 = vmatprep.mubr.msk.f32.mxu0 %vm12661_vm0, %v14639_v62 }
 0x488   :  { %11619 = vmatpush3.msra.mxu0 %v14676_v24  ;;  %11632 = vmatmul.mubr.msk.f32.vlgmr.msra.gmra.mxu1 %vm289_vm1, %v13871_v61 }
 0x489   :  { %11620 = vmatprep.subr.mxu0 %v14639_v62  ;;  %11635 = vmatpush3.msra.mxu1 %v14679_v11 }
 0x48a   :  { %11621 = vmatpush3.msra.mxu0 %v14677_v34  ;;  %11642 = vmatprep.mubr.msk.f32.mxu1 %vm12661_vm0, %v14639_v62  ;;  %v14684_v34 = vld [vmem:[#allocation33_spill] sm:$0xff] }
 0x48b   :  { %11622 = vmatprep.subr.mxu0 %v14639_v62  ;;  %11636 = vmatprep.subr.mxu1 %v14639_v62 }
 0x48c   :  { %11623 = vmatpush3.msra.mxu0 %v14678_v38  ;;  %11637 = vmatpush3.msra.mxu1 %v14680_v27 }
 0x48d   :  { %11645 = vmatprep.subr.mxu0 %v14639_v62  ;;  %11638 = vmatprep.subr.mxu1 %v14639_v62 }
 0x48e   :  { %11639 = vmatpush3.msra.mxu1 %v14681_v31 }
 0x48f   :  { %11640 = vmatprep.subr.mxu1 %v14639_v62 }
 0x490   :  { %11641 = vmatpush3.msra.mxu1 %v14682_v26 }
 0x491   :  { %11663 = vmatprep.subr.mxu1 %v14639_v62 }
 0x510   :  { %v5113_v18 = vpop.f32.mrf.mxu0  ;;  %v5263_v10 = vpop.f32.mrf.mxu1 }
 0x511   :  { %v5187_v8 = vadd.f32 %v13714_v15, %v5113_v18 }
 0x512   :  { %v11482_v28 = vpop.f32.mrf.mxu0  ;;  %v11500_v45 = vpop.f32.mrf.mxu1 }
 0x513   :  { %v5190_v29 = vadd.f32 %v14683_v50, %v5187_v8  ;;  %v14685_v50 = vld [vmem:[#allocation35_spill] sm:$0xff] }
 0x515   :  { %v10265_v22 = vmul.f32 -1.442695, %v5190_v29 }
 0x516   :  { %v5333_v39 = vpop.f32.mrf.mxu0  ;;  %v5480_v20 = vpop.f32.mrf.mxu1 }
 0x517   :  { %12234 = vpow2.f32 %v10265_v22  ;;  %v5334_v37 = vadd.f32 %v5333_v39, %v5263_v10  ;;  %v14686_v10 = vld [vmem:[#allocation36_spill] sm:$0xff] }
 0x518   :  { %v11507_v36 = vpop.f32.mrf.mxu0  ;;  %v11525_v24 = vpop.f32.mrf.mxu1 }
 0x519   :  { %v5337_v38 = vadd.f32 %v14684_v34, %v5334_v37 }
 0x51b   :  { %v10268_v11 = vmul.f32 -1.442695, %v5337_v38 }
 0x51d   :  { %12236 = vpow2.f32 %v10268_v11 }
 0x51f   :  { %v5410_v27 = vpop.f32.mrf.mxu0  ;;  %v5552_v31 = vpop.f32.mrf.mxu1 }
 0x520   :  { %v5481_v18 = vadd.f32 %v5480_v20, %v5410_v27 }
 0x521   :  { %v11518_v26 = vpop.f32.mrf.mxu0  ;;  %v11536_v49 = vpop.f32.mrf.mxu1 }
 0x522   :  { %v5484_v39 = vadd.f32 %v14686_v10, %v5481_v18  ;;  %v14687_v26 = vld [vmem:[#allocation37_spill] sm:$0xff] }
 0x524   :  { %v12235_v15 = vpop.eup %12234  ;;  %v5622_v28 = vpop.f32.mrf.mxu0 }
 0x525   :  { %v5623_v45 = vadd.f32 %v5622_v28, %v5552_v31  ;;  %v5194_v8 = vadd.f32 1.0, %v12235_v15 }
 0x526   :  { %v11543_v29 = vpop.f32.mrf.mxu0 }
 0x527   :  { %v5626_v55 = vadd.f32 %v14685_v50, %v5623_v45  ;;  %v5781_v22 = vpop.f32.mrf.mxu1  ;;  %12238 = vrcp.f32 %v5194_v8 }
 0x529   :  { %v10273_v36 = vmul.f32 -1.442695, %v5626_v55  ;;  %v11561_v24 = vpop.f32.mrf.mxu1 }
 0x52a   :  { %v12237_v37 = vpop.eup %12236 }
 0x52b   :  { %v5341_v38 = vadd.f32 1.0, %v12237_v37  ;;  %12240 = vpow2.f32 %v10273_v36  ;;  %v14688_v36 = vld [vmem:[#allocation38_spill] sm:$0xff] }
 0x52c   :  { %12242 = vtanh.f32 %v5484_v39 }
 0x52d   :  { %12244 = vrcp.f32 %v5341_v38 }
 0x530   :  { %v5708_v49 = vpop.f32.mrf.mxu0  ;;  %v5858_v11 = vpop.f32.mrf.mxu1 }
 0x531   :  { %v5782_v20 = vadd.f32 %v5781_v22, %v5708_v49 }
 0x532   :  { %v11554_v27 = vpop.f32.mrf.mxu0  ;;  %v11572_v31 = vpop.f32.mrf.mxu1 }
 0x533   :  { %v5785_v15 = vadd.f32 %v14687_v26, %v5782_v20 }
 0x534   :  { %v12239_v50 = vpop.eup %12238 }
 0x535   :  { %v10276_v28 = vmul.f32 -1.442695, %v5785_v15 }
 0x536   :  { %v5928_v45 = vpop.f32.mrf.mxu0  ;;  %v6075_v29 = vpop.f32.mrf.mxu1 }
 0x537   :  { %12246 = vpow2.f32 %v10276_v28  ;;  %v5929_v55 = vadd.f32 %v5928_v45, %v5858_v11 }
 0x538   :  { %v12241_v18 = vpop.eup %12240  ;;  %v11579_v24 = vpop.f32.mrf.mxu0 }
 0x539   :  { %v11597_v8 = vpop.f32.mrf.mxu1  ;;  %v12243_v37 = vpop.eup %12242  ;;  %v5932_v39 = vadd.f32 %v14688_v36, %v5929_v55  ;;  %v5630_v10 = vadd.f32 1.0, %v12241_v18 }
 0x53a   :  { %v12245_v38 = vpop.eup %12244  ;;  %v5634_v49 = vmul.f32 %v12243_v37, %v12239_v50 }
 0x53b   :  { %v5633_v22 = vmul.f32 %v12245_v38, %v13708_v17  ;;  %v10279_v27 = vmul.f32 -1.442695, %v5932_v39 }
 0x53d   :  { %v13893_v31 = vadd.f32 %v5634_v49, %v5633_v22  ;;  %12248 = vpow2.f32 %v10279_v27 }
 0x53e   :  { %12250 = vrcp.f32 %v5630_v10 }
 0x53f   :  { %12252 = vtanh.f32 %v13893_v31  ;;  %v6005_v20 = vpop.f32.mrf.mxu0  ;;  %v6147_v11 = vpop.f32.mrf.mxu1 }
 0x540   :  { %v6076_v24 = vadd.f32 %v6075_v29, %v6005_v20 }
 0x541   :  { %v11590_v15 = vpop.f32.mrf.mxu0  ;;  %v11608_v28 = vpop.f32.mrf.mxu1 }
 0x542   :  { %v6079_v50 = vadd.f32 %v13716_v35, %v6076_v24 }
 0x544   :  { %v12247_v45 = vpop.eup %12246  ;;  %v6217_v8 = vpop.f32.mrf.mxu0 }
 0x545   :  { %v6218_v55 = vadd.f32 %v6217_v8, %v6147_v11  ;;  %v5789_v36 = vadd.f32 1.0, %v12247_v45 }
 0x546   :  { %v11615_v18 = vpop.f32.mrf.mxu0 }
 0x547   :  { %v6221_v17 = vadd.f32 %v13711_v0, %v6218_v55  ;;  %12254 = vrcp.f32 %v5789_v36 }
 0x549   :  { %v10284_v37 = vmul.f32 -1.442695, %v6221_v17 }
 0x54a   :  { %v12249_v39 = vpop.eup %12248 }
 0x54b   :  { %v12251_v10 = vpop.eup %12250  ;;  %v5936_v38 = vadd.f32 1.0, %v12249_v39  ;;  %12256 = vpow2.f32 %v10284_v37  ;;  %v14692_v37 = vld [vmem:[#allocation35_spill] sm:$0xff] }
 0x54c   :  { %v12253_v22 = vpop.eup %12252  ;;  %12258 = vtanh.f32 %v6079_v50 }
 0x54d   :  { %12260 = vrcp.f32 %v5936_v38  ;;  %v5637_v49 = vmul.f32 %v12253_v22, %v12251_v10  ;;  %v14693_v38 = vld [vmem:[#allocation36_spill] sm:$0xff] }
 0x54f   :  { %10285 = vst.msk [vmem:[%s14574_s8 + $0x20] sm:$0xff] %vm215_vm2, %v5637_v49  ;;  %11625 = vmatmul.mubr.msk.f32.vlgmr.msra.gmra.mxu0 %vm215_vm2, %v5637_v49  ;;  %11643 = vmatmul.mubr.msk.f32.vlgmr.msra.gmra.mxu1 %vm215_vm2, %v5637_v49 }
 0x550   :  { %11646 = vmatpush3.msra.mxu0 %v13453_v52  ;;  %11664 = vmatpush3.msra.mxu1 %v13456_v63 }
 0x551   :  { %11647 = vmatprep.subr.mxu0 %v14639_v62  ;;  %11665 = vmatprep.subr.mxu1 %v14639_v62 }
 0x552   :  { %11648 = vmatpush3.msra.mxu0 %v13461_v54  ;;  %11666 = vmatpush3.msra.mxu1 %v13464_v57 }
 0x553   :  { %11649 = vmatprep.mubr.msk.f32.mxu0 %vm12661_vm0, %v14639_v62  ;;  %11652 = vmatprep.subr.mxu0 %v14639_v62 }
 0x554   :  { %11667 = vmatprep.mubr.msk.f32.mxu1 %vm12661_vm0, %v14639_v62  ;;  %11670 = vmatprep.subr.mxu1 %v14639_v62  ;;  %v12255_v52 = vpop.eup %12254 }
 0x555   :  { %11650 = vmatmul.mubr.msk.f32.vlgmr.msra.gmra.mxu0 %vm289_vm1, %v13871_v61  ;;  %11668 = vmatmul.mubr.msk.f32.vlgmr.msra.gmra.mxu1 %vm289_vm1, %v13871_v61 }
 0x556   :  { %11653 = vmatpush3.msra.mxu0 %v13477_v4  ;;  %11671 = vmatpush3.msra.mxu1 %v13480_v56 }
 0x557   :  { %11654 = vmatprep.subr.mxu0 %v14639_v62  ;;  %11672 = vmatprep.subr.mxu1 %v14639_v62 }
 0x558   :  { %v12257_v63 = vpop.eup %12256  ;;  %11655 = vmatpush3.msra.mxu0 %v13485_v7  ;;  %11673 = vmatpush3.msra.mxu1 %v13488_v13  ;;  %v13956_v13 = vld [vmem:[#allocation2 + $0x10] sm:$0xff] }
 0x559   :  { %v12259_v54 = vpop.eup %12258  ;;  %11656 = vmatprep.subr.mxu0 %v14639_v62  ;;  %11674 = vmatprep.subr.mxu1 %v14639_v62  ;;  %v6225_v29 = vadd.f32 1.0, %v12257_v63 }
 0x55a   :  { %v12261_v57 = vpop.eup %12260  ;;  %11657 = vmatpush3.msra.mxu0 %v13493_v14  ;;  %11675 = vmatpush3.msra.mxu1 %v13496_v19  ;;  %v6229_v56 = vmul.f32 %v12259_v54, %v12255_v52 }
 0x55b   :  { %v6228_v4 = vmul.f32 %v12261_v57, %v13757_v1  ;;  %11658 = vmatprep.subr.mxu0 %v14639_v62  ;;  %11676 = vmatprep.subr.mxu1 %v14639_v62  ;;  %12262 = vrcp.f32 %v6225_v29 }
 0x55c   :  { %11659 = vmatpush3.msra.mxu0 %v13502_v21  ;;  %11660 = vmatprep.mubr.msk.f32.mxu0 %vm12661_vm0, %v14639_v62 }
 0x55d   :  { %v13936_v7 = vadd.f32 %v6229_v56, %v6228_v4  ;;  %11677 = vmatpush3.msra.mxu1 %v13509_v23  ;;  %11678 = vmatprep.mubr.msk.f32.mxu1 %vm12661_vm0, %v14639_v62  ;;  %v14689_v23 = vld [vmem:[#allocation28_spill] sm:$0xff] }
 0x55e   :  { %11661 = vmatmul.mubr.msk.f32.vlgmr.msra.gmra.mxu0 %vm215_vm2, %v5637_v49  ;;  %11679 = vmatmul.mubr.msk.f32.vlgmr.msra.gmra.mxu1 %vm215_vm2, %v5637_v49 }
 0x55f   :  { %12264 = vtanh.f32 %v13936_v7  ;;  %11681 = vmatprep.subr.mxu0 %v14639_v62  ;;  %11699 = vmatprep.subr.mxu1 %v14639_v62 }
 0x560   :  { %11682 = vmatpush3.msra.mxu0 %v13519_v16  ;;  %11700 = vmatpush3.msra.mxu1 %v13522_v25  ;;  %v14032_v16 = vld [vmem:[#allocation5 + $0x8] sm:$0xff]  ;;  %v14690_v25 = vld [vmem:[#allocation31_spill] sm:$0xff] }
 0x561   :  { %11683 = vmatprep.subr.mxu0 %v14639_v62  ;;  %11701 = vmatprep.subr.mxu1 %v14639_v62 }
 0x562   :  { %11684 = vmatpush3.msra.mxu0 %v13527_v32  ;;  %11685 = vmatprep.mubr.msk.f32.mxu0 %vm12661_vm0, %v14639_v62  ;;  %v14039_v32 = vld [vmem:[#allocation5] sm:$0xff] }
 0x563   :  { %11702 = vmatpush3.msra.mxu1 %v13532_v33  ;;  %11686 = vmatmul.mubr.msk.f32.vlgmr.msra.gmra.mxu0 %vm289_vm1, %v13871_v61  ;;  %v14046_v33 = vld [vmem:[#allocation7 + $0x18] sm:$0xff] }
 0x564   :  { %11688 = vmatprep.subr.mxu0 %v14639_v62  ;;  %11703 = vmatprep.mubr.msk.f32.mxu1 %vm12661_vm0, %v14639_v62 }
 0x565   :  { %11706 = vmatprep.subr.mxu1 %v14639_v62  ;;  %11689 = vmatpush3.msra.mxu0 %v13543_v40  ;;  %v14052_v40 = vld [vmem:[#allocation7 + $0x10] sm:$0xff] }
 0x566   :  { %11704 = vmatmul.mubr.msk.f32.vlgmr.msra.gmra.mxu1 %vm289_vm1, %v13956_v13  ;;  %11690 = vmatprep.subr.mxu0 %v14639_v62 }
 0x567   :  { %11707 = vmatpush3.msra.mxu1 %v13549_v41  ;;  %11691 = vmatpush3.msra.mxu0 %v13552_v42  ;;  %v14056_v41 = vld [vmem:[#allocation7 + $0x8] sm:$0xff]  ;;  %v14060_v42 = vld [vmem:[#allocation7] sm:$0xff] }
 0x568   :  { %11708 = vmatprep.subr.mxu1 %v14639_v62  ;;  %11692 = vmatprep.subr.mxu0 %v14639_v62  ;;  %v12263_v14 = vpop.eup %12262 }
 0x569   :  { %11709 = vmatpush3.msra.mxu1 %v13557_v43  ;;  %11693 = vmatpush3.msra.mxu0 %v13560_v44  ;;  %v6380_v43 = vpop.f32.mrf.mxu1 }
 0x56a   :  { %11710 = vmatprep.subr.mxu1 %v14639_v62  ;;  %11694 = vmatprep.subr.mxu0 %v14639_v62 }
 0x56b   :  { %11711 = vmatpush3.msra.mxu1 %v13565_v46  ;;  %11695 = vmatpush3.msra.mxu0 %v13568_v47  ;;  %v11633_v44 = vpop.f32.mrf.mxu1  ;;  %v14064_v46 = vld [vmem:[#allocation2 + $0x30] sm:$0xff]  ;;  %v14068_v47 = vld [vmem:[#allocation7 + $0x38] sm:$0xff] }
 0x56c   :  { %v12265_v19 = vpop.eup %12264  ;;  %11712 = vmatprep.subr.mxu1 %v14639_v62  ;;  %11696 = vmatprep.mubr.msk.f32.mxu0 %vm12661_vm0, %v14639_v62 }
 0x56d   :  { %11713 = vmatpush3.msra.mxu1 %v13574_v53  ;;  %11714 = vmatprep.mubr.msk.f32.mxu1 %vm12661_vm0, %v14639_v62  ;;  %v6232_v21 = vmul.f32 %v12265_v19, %v12263_v14  ;;  %v14074_v53 = vld [vmem:[#allocation7 + $0x30] sm:$0xff] }
 0x56e   :  { %11717 = vmatprep.subr.mxu0 %v14639_v62  ;;  %11735 = vmatprep.subr.mxu1 %v14639_v62 }
 0x56f   :  { %10286 = vst.msk [vmem:[%s14575_s9 + $0x18] sm:$0xff] %vm215_vm2, %v6232_v21  ;;  %11697 = vmatmul.mubr.msk.f32.vlgmr.msra.gmra.mxu0 %vm215_vm2, %v6232_v21  ;;  %11715 = vmatmul.mubr.msk.f32.vlgmr.msra.gmra.mxu1 %vm215_vm2, %v6232_v21 }
 0x570   :  { %11718 = vmatpush3.msra.mxu0 %v13587_v51  ;;  %11736 = vmatpush3.msra.mxu1 %v13590_v3  ;;  %v14078_v51 = vld [vmem:[#allocation7 + $0x28] sm:$0xff]  ;;  %v14082_v3 = vld [vmem:[#allocation7 + $0x20] sm:$0xff] }
 0x571   :  { %11719 = vmatprep.subr.mxu0 %v14639_v62  ;;  %11737 = vmatprep.subr.mxu1 %v14639_v62 }
 0x572   :  { %11720 = vmatpush3.msra.mxu0 %v13595_v30  ;;  %11738 = vmatpush3.msra.mxu1 %v13598_v58 }
 0x573   :  { %11721 = vmatprep.mubr.msk.f32.mxu0 %vm12661_vm0, %v14639_v62  ;;  %11724 = vmatprep.subr.mxu0 %v14639_v62 }
 0x574   :  { %11739 = vmatprep.mubr.msk.f32.mxu1 %vm12661_vm0, %v14639_v62  ;;  %11742 = vmatprep.subr.mxu1 %v14639_v62 }
 0x575   :  { %11722 = vmatmul.mubr.msk.f32.vlgmr.msra.gmra.mxu0 %vm289_vm1, %v13956_v13  ;;  %11740 = vmatmul.mubr.msk.f32.vlgmr.msra.gmra.mxu1 %vm289_vm1, %v13956_v13 }
 0x576   :  { %11725 = vmatpush3.msra.mxu0 %v13611_v2  ;;  %11743 = vmatpush3.msra.mxu1 %v13614_v12 }
 0x577   :  { %11726 = vmatprep.subr.mxu0 %v14639_v62  ;;  %11744 = vmatprep.subr.mxu1 %v14639_v62 }
 0x578   :  { %11727 = vmatpush3.msra.mxu0 %v13619_v59  ;;  %11745 = vmatpush3.msra.mxu1 %v13622_v6  ;;  %v14691_v6 = vld [vmem:[#allocation30_spill] sm:$0xff] }
 0x579   :  { %11728 = vmatprep.subr.mxu0 %v14639_v62  ;;  %11746 = vmatprep.subr.mxu1 %v14639_v62 }
 0x57a   :  { %11729 = vmatpush3.msra.mxu0 %v13627_v9  ;;  %11747 = vmatpush3.msra.mxu1 %v13630_v5 }
 0x57b   :  { %11730 = vmatprep.subr.mxu0 %v14639_v62  ;;  %11748 = vmatprep.subr.mxu1 %v14639_v62 }
 0x57c   :  { %11731 = vmatpush3.msra.mxu0 %v13635_v48  ;;  %11732 = vmatprep.mubr.msk.f32.mxu0 %vm12661_vm0, %v14639_v62 }
 0x57d   :  { %11749 = vmatpush3.msra.mxu1 %v13640_v60  ;;  %11750 = vmatprep.mubr.msk.f32.mxu1 %vm12661_vm0, %v14639_v62 }
 0x57e   :  { %11733 = vmatmul.mubr.msk.f32.vlgmr.msra.gmra.mxu0 %vm215_vm2, %v6232_v21  ;;  %11751 = vmatmul.mubr.msk.f32.vlgmr.msra.gmra.mxu1 %vm215_vm2, %v6232_v21 }
 0x57f   :  { %11753 = vmatprep.subr.mxu0 %v14639_v62  ;;  %11757 = vmatprep.mubr.msk.f32.mxu0 %vm12661_vm0, %v14639_v62 }
 0x580   :  { %11754 = vmatpush3.msra.mxu0 %v14689_v23  ;;  %11771 = vmatprep.subr.mxu1 %v14639_v62 }
 0x581   :  { %11755 = vmatprep.subr.mxu0 %v14639_v62  ;;  %11772 = vmatpush3.msra.mxu1 %v14032_v16 }
 0x582   :  { %11756 = vmatpush3.msra.mxu0 %v14690_v25  ;;  %11773 = vmatprep.subr.mxu1 %v14639_v62 }
 0x583   :  { %11758 = vmatmul.mubr.msk.f32.vlgmr.msra.gmra.mxu0 %vm289_vm1, %v13956_v13  ;;  %11774 = vmatpush3.msra.mxu1 %v14039_v32 }
 0x584   :  { %11760 = vmatprep.subr.mxu0 %v14639_v62  ;;  %11775 = vmatprep.mubr.msk.f32.mxu1 %vm12661_vm0, %v14639_v62 }
 0x585   :  { %11778 = vmatprep.subr.mxu1 %v14639_v62  ;;  %11761 = vmatpush3.msra.mxu0 %v14046_v33 }
 0x586   :  { %11762 = vmatprep.subr.mxu0 %v14639_v62  ;;  %11768 = vmatprep.mubr.msk.f32.mxu0 %vm12661_vm0, %v14639_v62 }
 0x587   :  { %11763 = vmatpush3.msra.mxu0 %v14052_v40  ;;  %11776 = vmatmul.mubr.msk.f32.vlgmr.msra.gmra.mxu1 %vm289_vm1, %v14064_v46 }
 0x588   :  { %11764 = vmatprep.subr.mxu0 %v14639_v62  ;;  %11779 = vmatpush3.msra.mxu1 %v14068_v47 }
 0x589   :  { %11765 = vmatpush3.msra.mxu0 %v14056_v41  ;;  %11786 = vmatprep.mubr.msk.f32.mxu1 %vm12661_vm0, %v14639_v62 }
 0x58a   :  { %11766 = vmatprep.subr.mxu0 %v14639_v62  ;;  %11780 = vmatprep.subr.mxu1 %v14639_v62 }
 0x58b   :  { %11767 = vmatpush3.msra.mxu0 %v14060_v42  ;;  %11781 = vmatpush3.msra.mxu1 %v14074_v53 }
 0x58c   :  { %11789 = vmatprep.subr.mxu0 %v14639_v62  ;;  %11782 = vmatprep.subr.mxu1 %v14639_v62 }
 0x58d   :  { %11783 = vmatpush3.msra.mxu1 %v14078_v51 }
 0x58e   :  { %11784 = vmatprep.subr.mxu1 %v14639_v62 }
 0x58f   :  { %11785 = vmatpush3.msra.mxu1 %v14082_v3 }
 0x590   :  { %11807 = vmatprep.subr.mxu1 %v14639_v62 }
 0x60f   :  { %v6307_v30 = vpop.f32.mrf.mxu0  ;;  %v6457_v58 = vpop.f32.mrf.mxu1 }
 0x610   :  { %v6381_v2 = vadd.f32 %v6380_v43, %v6307_v30 }
 0x611   :  { %v11626_v12 = vpop.f32.mrf.mxu0  ;;  %v11644_v59 = vpop.f32.mrf.mxu1 }
 0x612   :  { %v6384_v9 = vadd.f32 %v14691_v6, %v6381_v2  ;;  %v14694_v2 = vld [vmem:[#allocation38_spill] sm:$0xff] }
 0x614   :  { %v10289_v5 = vmul.f32 -1.442695, %v6384_v9 }
 0x615   :  { %v6527_v48 = vpop.f32.mrf.mxu0  ;;  %v6674_v60 = vpop.f32.mrf.mxu1 }
 0x616   :  { %12266 = vpow2.f32 %v10289_v5  ;;  %v6528_v1 = vadd.f32 %v6527_v48, %v6457_v58 }
 0x617   :  { %v11651_v61 = vpop.f32.mrf.mxu0  ;;  %v11669_v36 = vpop.f32.mrf.mxu1 }
 0x618   :  { %v6531_v27 = vadd.f32 %v14684_v34, %v6528_v1 }
 0x61a   :  { %v10292_v20 = vmul.f32 -1.442695, %v6531_v27 }
 0x61c   :  { %12268 = vpow2.f32 %v10292_v20 }
 0x61e   :  { %v6604_v11 = vpop.f32.mrf.mxu0  ;;  %v6746_v15 = vpop.f32.mrf.mxu1 }
 0x61f   :  { %v6675_v8 = vadd.f32 %v6674_v60, %v6604_v11 }
 0x620   :  { %v11662_v28 = vpop.f32.mrf.mxu0  ;;  %v11680_v45 = vpop.f32.mrf.mxu1 }
 0x621   :  { %v6678_v22 = vadd.f32 %v14693_v38, %v6675_v8  ;;  %v14128_v38 = vld [vmem:[#allocation7 + $0x58] sm:$0xff] }
 0x623   :  { %v12267_v24 = vpop.eup %12266  ;;  %v6816_v55 = vpop.f32.mrf.mxu0 }
 0x624   :  { %v6817_v18 = vadd.f32 %v6816_v55, %v6746_v15  ;;  %v6388_v17 = vadd.f32 1.0, %v12267_v24 }
 0x625   :  { %v11687_v50 = vpop.f32.mrf.mxu0 }
 0x626   :  { %v6820_v39 = vadd.f32 %v14692_v37, %v6817_v18  ;;  %v6975_v10 = vpop.f32.mrf.mxu1  ;;  %12270 = vrcp.f32 %v6388_v17 }
 0x628   :  { %v10297_v49 = vmul.f32 -1.442695, %v6820_v39  ;;  %v11705_v52 = vpop.f32.mrf.mxu1  ;;  %v14112_v39 = vld [vmem:[#allocation5 + $0x10] sm:$0xff] }
 0x629   :  { %v12269_v34 = vpop.eup %12268 }
 0x62a   :  { %v6535_v63 = vadd.f32 1.0, %v12269_v34  ;;  %12272 = vpow2.f32 %v10297_v49  ;;  %v14136_v34 = vld [vmem:[#allocation7 + $0x50] sm:$0xff] }
 0x62b   :  { %12274 = vtanh.f32 %v6678_v22  ;;  %v14131_v22 = vld [vmem:[#allocation7 + $0x78] sm:$0xff] }
 0x62c   :  { %12276 = vrcp.f32 %v6535_v63  ;;  %v14139_v63 = vld [vmem:[#allocation7 + $0x70] sm:$0xff] }
 0x62f   :  { %v6902_v54 = vpop.f32.mrf.mxu0  ;;  %v7052_v57 = vpop.f32.mrf.mxu1 }
 0x630   :  { %v6976_v29 = vadd.f32 %v6975_v10, %v6902_v54  ;;  %v14115_v10 = vld [vmem:[#allocation5 + $0x20] sm:$0xff] }
 0x631   :  { %v11698_v4 = vpop.f32.mrf.mxu0  ;;  %v11716_v56 = vpop.f32.mrf.mxu1 }
 0x632   :  { %v6979_v13 = vadd.f32 %v14687_v26, %v6976_v29  ;;  %v14144_v4 = vld [vmem:[#allocation7 + $0x48] sm:$0xff] }
 0x633   :  { %v12271_v23 = vpop.eup %12270  ;;  %v14147_v56 = vld [vmem:[#allocation7 + $0x68] sm:$0xff] }
 0x634   :  { %v10300_v14 = vmul.f32 -1.442695, %v6979_v13 }
 0x635   :  { %v7122_v19 = vpop.f32.mrf.mxu0  ;;  %v7269_v21 = vpop.f32.mrf.mxu1 }
 0x636   :  { %12278 = vpow2.f32 %v10300_v14  ;;  %v7123_v25 = vadd.f32 %v7122_v19, %v7052_v57  ;;  %v14153_v19 = vld [vmem:[#allocation7 + $0x40] sm:$0xff] }
 0x637   :  { %v12273_v43 = vpop.eup %12272  ;;  %v11723_v44 = vpop.f32.mrf.mxu0 }
 0x638   :  { %v11741_v30 = vpop.f32.mrf.mxu1  ;;  %v12275_v58 = vpop.eup %12274  ;;  %v7126_v12 = vadd.f32 %v14694_v2, %v7123_v25  ;;  %v6824_v6 = vadd.f32 1.0, %v12273_v43  ;;  %v14173_v25 = vld [vmem:[#allocation5 + $0x48] sm:$0xff]  ;;  %v14178_v43 = vld [vmem:[#allocation5 + $0x30] sm:$0xff]  ;;  %v14183_v44 = vld [vmem:[#allocation5 + $0x40] sm:$0xff] }
 0x639   :  { %v12277_v59 = vpop.eup %12276  ;;  %v6828_v5 = vmul.f32 %v12275_v58, %v12271_v23  ;;  %v14160_v23 = vld [vmem:[#allocation7 + $0x60] sm:$0xff]  ;;  %v14188_v30 = vld [vmem:[#allocation2 + $0x8] sm:$0xff]  ;;  %v14194_v58 = vld [vmem:[#allocation7 + $0x98] sm:$0xff] }
 0x63a   :  { %v6827_v9 = vmul.f32 %v12277_v59, %v13893_v31  ;;  %v10303_v48 = vmul.f32 -1.442695, %v7126_v12  ;;  %v14200_v2 = vld [vmem:[#allocation7 + $0xb8] sm:$0xff]  ;;  %v14208_v12 = vld [vmem:[#allocation7 + $0xb0] sm:$0xff]  ;;  %v14211_v59 = vld [vmem:[#allocation7 + $0x88] sm:$0xff] }
 0x63c   :  { %v14093_v60 = vadd.f32 %v6828_v5, %v6827_v9  ;;  %12280 = vpow2.f32 %v10303_v48  ;;  %v14216_v9 = vld [vmem:[#allocation7 + $0xa8] sm:$0xff]  ;;  %v14219_v5 = vld [vmem:[#allocation7 + $0x80] sm:$0xff] }
 0x63d   :  { %12282 = vrcp.f32 %v6824_v6 }
 0x63e   :  { %12284 = vtanh.f32 %v14093_v60  ;;  %v7199_v26 = vpop.f32.mrf.mxu0  ;;  %v7341_v1 = vpop.f32.mrf.mxu1 }
 0x63f   :  { %v7270_v20 = vadd.f32 %v7269_v21, %v7199_v26  ;;  %v14225_v26 = vld [vmem:[#allocation7 + $0xa0] sm:$0xff] }
 0x640   :  { %v11734_v61 = vpop.f32.mrf.mxu0  ;;  %v11752_v36 = vpop.f32.mrf.mxu1 }
 0x641   :  { %v7273_v24 = vadd.f32 %v13716_v35, %v7270_v20  ;;  %v14107_v35 = vld [vmem:[#allocation5 + $0x28] sm:$0xff]  ;;  %v14238_v61 = vld [vmem:[#allocation5 + $0x58] sm:$0xff]  ;;  %v14249_v20 = vld [vmem:[#allocation5 + $0x60] sm:$0xff] }
 0x642   :  { %v14241_v36 = vld [vmem:[#allocation5 + $0x68] sm:$0xff] }
 0x643   :  { %v12279_v27 = vpop.eup %12278  ;;  %v7411_v11 = vpop.f32.mrf.mxu0 }
 0x644   :  { %v7412_v15 = vadd.f32 %v7411_v11, %v7341_v1  ;;  %v6983_v28 = vadd.f32 1.0, %v12279_v27  ;;  %v14246_v27 = vld [vmem:[#allocation5 + $0x50] sm:$0xff]  ;;  %v14262_v11 = vld [vmem:[#allocation7 + $0xd8] sm:$0xff] }
 0x645   :  { %v11759_v45 = vpop.f32.mrf.mxu0 }
 0x646   :  { %v7415_v31 = vadd.f32 %v13711_v0, %v7412_v15  ;;  %12286 = vrcp.f32 %v6983_v28  ;;  %v14104_v0 = vld [vmem:[#allocation5 + $0x18] sm:$0xff]  ;;  %v14270_v28 = vld [vmem:[#allocation7 + $0xd0] sm:$0xff] }
 0x647   :  { %v14265_v15 = vld [vmem:[#allocation7 + $0xf8] sm:$0xff]  ;;  %v14273_v45 = vld [vmem:[#allocation7 + $0xf0] sm:$0xff] }
 0x648   :  { %v10308_v8 = vmul.f32 -1.442695, %v7415_v31  ;;  %v14278_v31 = vld [vmem:[#allocation7 + $0xc8] sm:$0xff] }
 0x649   :  { %v12281_v55 = vpop.eup %12280 }
 0x64a   :  { %v12283_v18 = vpop.eup %12282  ;;  %v7130_v17 = vadd.f32 1.0, %v12281_v55  ;;  %12288 = vpow2.f32 %v10308_v8  ;;  %v14286_v8 = vld [vmem:[#allocation7 + $0xc0] sm:$0xff] }
 0x64b   :  { %v12285_v50 = vpop.eup %12284  ;;  %12290 = vtanh.f32 %v7273_v24  ;;  %v14281_v24 = vld [vmem:[#allocation7 + $0xe8] sm:$0xff]  ;;  %v14291_v55 = vld [vmem:[#allocation7 + $0xe0] sm:$0xff] }
 0x64c   :  { %12292 = vrcp.f32 %v7130_v17  ;;  %v6831_v37 = vmul.f32 %v12285_v50, %v12283_v18  ;;  %v14301_v18 = vld [vmem:[#allocation5 + $0x78] sm:$0xff]  ;;  %v14307_v17 = vld [vmem:[#allocation5 + $0x70] sm:$0xff] }
 0x64e   :  { %10309 = vst.msk [vmem:[%s14574_s8 + $0x28] sm:$0xff] %vm215_vm2, %v6831_v37  ;;  %11769 = vmatmul.mubr.msk.f32.vlgmr.msra.gmra.mxu0 %vm215_vm2, %v6831_v37  ;;  %11787 = vmatmul.mubr.msk.f32.vlgmr.msra.gmra.mxu1 %vm215_vm2, %v6831_v37 }
 0x64f   :  { %11790 = vmatpush3.msra.mxu0 %v14104_v0  ;;  %11808 = vmatpush3.msra.mxu1 %v14107_v35 }
 0x650   :  { %11791 = vmatprep.subr.mxu0 %v14639_v62  ;;  %11809 = vmatprep.subr.mxu1 %v14639_v62 }
 0x651   :  { %11792 = vmatpush3.msra.mxu0 %v14112_v39  ;;  %11810 = vmatpush3.msra.mxu1 %v14115_v10 }
 0x652   :  { %11793 = vmatprep.mubr.msk.f32.mxu0 %vm12661_vm0, %v14639_v62  ;;  %11796 = vmatprep.subr.mxu0 %v14639_v62 }
 0x653   :  { %11811 = vmatprep.mubr.msk.f32.mxu1 %vm12661_vm0, %v14639_v62  ;;  %11814 = vmatprep.subr.mxu1 %v14639_v62  ;;  %v12287_v49 = vpop.eup %12286 }
 0x654   :  { %11794 = vmatmul.mubr.msk.f32.vlgmr.msra.gmra.mxu0 %vm289_vm1, %v14064_v46  ;;  %11812 = vmatmul.mubr.msk.f32.vlgmr.msra.gmra.mxu1 %vm289_vm1, %v14064_v46 }
 0x655   :  { %11797 = vmatpush3.msra.mxu0 %v14128_v38  ;;  %11815 = vmatpush3.msra.mxu1 %v14131_v22 }
 0x656   :  { %11798 = vmatprep.subr.mxu0 %v14639_v62  ;;  %11816 = vmatprep.subr.mxu1 %v14639_v62 }
 0x657   :  { %v12289_v52 = vpop.eup %12288  ;;  %11799 = vmatpush3.msra.mxu0 %v14136_v34  ;;  %11817 = vmatpush3.msra.mxu1 %v14139_v63 }
 0x658   :  { %v12291_v54 = vpop.eup %12290  ;;  %11800 = vmatprep.subr.mxu0 %v14639_v62  ;;  %11818 = vmatprep.subr.mxu1 %v14639_v62  ;;  %v7419_v29 = vadd.f32 1.0, %v12289_v52 }
 0x659   :  { %v12293_v57 = vpop.eup %12292  ;;  %11801 = vmatpush3.msra.mxu0 %v14144_v4  ;;  %11819 = vmatpush3.msra.mxu1 %v14147_v56  ;;  %v7423_v14 = vmul.f32 %v12291_v54, %v12287_v49 }
 0x65a   :  { %v7422_v13 = vmul.f32 %v12293_v57, %v13936_v7  ;;  %11802 = vmatprep.subr.mxu0 %v14639_v62  ;;  %11820 = vmatprep.subr.mxu1 %v14639_v62  ;;  %12294 = vrcp.f32 %v7419_v29  ;;  %v14170_v7 = vld [vmem:[#allocation5 + $0x38] sm:$0xff] }
 0x65b   :  { %11803 = vmatpush3.msra.mxu0 %v14153_v19  ;;  %11804 = vmatprep.mubr.msk.f32.mxu0 %vm12661_vm0, %v14639_v62 }
 0x65c   :  { %v14158_v21 = vadd.f32 %v7423_v14, %v7422_v13  ;;  %11821 = vmatpush3.msra.mxu1 %v14160_v23  ;;  %11822 = vmatprep.mubr.msk.f32.mxu1 %vm12661_vm0, %v14639_v62  ;;  %v14345_v13 = vld [vmem:[#allocation8 + $0x1] ss:$0 sm:$0xff] }
 0x65d   :  { %11805 = vmatmul.mubr.msk.f32.vlgmr.msra.gmra.mxu0 %vm215_vm2, %v6831_v37  ;;  %11823 = vmatmul.mubr.msk.f32.vlgmr.msra.gmra.mxu1 %vm215_vm2, %v6831_v37  ;;  %v14342_v37 = vld [vmem:[#allocation8] ss:$0 sm:$0xff]  ;;  %14695 = vst [vmem:[#allocation22_spill] sm:$0xff] %v14345_v13 }
 0x65e   :  { %12296 = vtanh.f32 %v14158_v21  ;;  %11825 = vmatprep.subr.mxu0 %v14639_v62  ;;  %11843 = vmatprep.subr.mxu1 %v14639_v62 }
 0x65f   :  { %11826 = vmatpush3.msra.mxu0 %v14170_v7  ;;  %11844 = vmatpush3.msra.mxu1 %v14173_v25 }
 0x660   :  { %11827 = vmatprep.subr.mxu0 %v14639_v62  ;;  %11845 = vmatprep.subr.mxu1 %v14639_v62 }
 0x661   :  { %11828 = vmatpush3.msra.mxu0 %v14178_v43  ;;  %11829 = vmatprep.mubr.msk.f32.mxu0 %vm12661_vm0, %v14639_v62 }
 0x662   :  { %11846 = vmatpush3.msra.mxu1 %v14183_v44  ;;  %11830 = vmatmul.mubr.msk.f32.vlgmr.msra.gmra.mxu0 %vm289_vm1, %v14064_v46  ;;  %v14203_v46 = vld [vmem:[#allocation7 + $0x90] sm:$0xff] }
 0x663   :  { %11832 = vmatprep.subr.mxu0 %v14639_v62  ;;  %11847 = vmatprep.mubr.msk.f32.mxu1 %vm12661_vm0, %v14639_v62 }
 0x664   :  { %11850 = vmatprep.subr.mxu1 %v14639_v62  ;;  %11833 = vmatpush3.msra.mxu0 %v14194_v58 }
 0x665   :  { %11848 = vmatmul.mubr.msk.f32.vlgmr.msra.gmra.mxu1 %vm289_vm1, %v14188_v30  ;;  %11834 = vmatprep.subr.mxu0 %v14639_v62 }
 0x666   :  { %11851 = vmatpush3.msra.mxu1 %v14200_v2  ;;  %11835 = vmatpush3.msra.mxu0 %v14203_v46 }
 0x667   :  { %11852 = vmatprep.subr.mxu1 %v14639_v62  ;;  %11836 = vmatprep.subr.mxu0 %v14639_v62  ;;  %v12295_v6 = vpop.eup %12294 }
 0x668   :  { %11853 = vmatpush3.msra.mxu1 %v14208_v12  ;;  %11837 = vmatpush3.msra.mxu0 %v14211_v59 }
 0x669   :  { %11854 = vmatprep.subr.mxu1 %v14639_v62  ;;  %11838 = vmatprep.subr.mxu0 %v14639_v62 }
 0x66a   :  { %11855 = vmatpush3.msra.mxu1 %v14216_v9  ;;  %11839 = vmatpush3.msra.mxu0 %v14219_v5 }
 0x66b   :  { %v12297_v48 = vpop.eup %12296  ;;  %11856 = vmatprep.subr.mxu1 %v14639_v62  ;;  %11840 = vmatprep.mubr.msk.f32.mxu0 %vm12661_vm0, %v14639_v62 }
 0x66c   :  { %11857 = vmatpush3.msra.mxu1 %v14225_v26  ;;  %11858 = vmatprep.mubr.msk.f32.mxu1 %vm12661_vm0, %v14639_v62  ;;  %v7426_v1 = vmul.f32 %v12297_v48, %v12295_v6 }
 0x66d   :  { %11861 = vmatprep.subr.mxu0 %v14639_v62  ;;  %11879 = vmatprep.subr.mxu1 %v14639_v62 }
 0x66e   :  { %10310 = vst.msk [vmem:[%s14575_s9 + $0x10] sm:$0xff] %vm215_vm2, %v7426_v1  ;;  %11841 = vmatmul.mubr.msk.f32.vlgmr.msra.gmra.mxu0 %vm215_vm2, %v7426_v1  ;;  %11859 = vmatmul.mubr.msk.f32.vlgmr.msra.gmra.mxu1 %vm215_vm2, %v7426_v1 }
 0x66f   :  { %11862 = vmatpush3.msra.mxu0 %v14238_v61  ;;  %11880 = vmatpush3.msra.mxu1 %v14241_v36 }
 0x670   :  { %11863 = vmatprep.subr.mxu0 %v14639_v62  ;;  %11881 = vmatprep.subr.mxu1 %v14639_v62 }
 0x671   :  { %11864 = vmatpush3.msra.mxu0 %v14246_v27  ;;  %11882 = vmatpush3.msra.mxu1 %v14249_v20 }
 0x672   :  { %11865 = vmatprep.mubr.msk.f32.mxu0 %vm12661_vm0, %v14639_v62  ;;  %11868 = vmatprep.subr.mxu0 %v14639_v62 }
 0x673   :  { %11883 = vmatprep.mubr.msk.f32.mxu1 %vm12661_vm0, %v14639_v62  ;;  %11886 = vmatprep.subr.mxu1 %v14639_v62 }
 0x674   :  { %11866 = vmatmul.mubr.msk.f32.vlgmr.msra.gmra.mxu0 %vm289_vm1, %v14188_v30  ;;  %11884 = vmatmul.mubr.msk.f32.vlgmr.msra.gmra.mxu1 %vm289_vm1, %v14188_v30 }
 0x675   :  { %11869 = vmatpush3.msra.mxu0 %v14262_v11  ;;  %11887 = vmatpush3.msra.mxu1 %v14265_v15 }
 0x676   :  { %11870 = vmatprep.subr.mxu0 %v14639_v62  ;;  %11888 = vmatprep.subr.mxu1 %v14639_v62 }
 0x677   :  { %11871 = vmatpush3.msra.mxu0 %v14270_v28  ;;  %11889 = vmatpush3.msra.mxu1 %v14273_v45 }
 0x678   :  { %11872 = vmatprep.subr.mxu0 %v14639_v62  ;;  %11890 = vmatprep.subr.mxu1 %v14639_v62 }
 0x679   :  { %11873 = vmatpush3.msra.mxu0 %v14278_v31  ;;  %11891 = vmatpush3.msra.mxu1 %v14281_v24 }
 0x67a   :  { %11874 = vmatprep.subr.mxu0 %v14639_v62  ;;  %11892 = vmatprep.subr.mxu1 %v14639_v62 }
 0x67b   :  { %11875 = vmatpush3.msra.mxu0 %v14286_v8  ;;  %11876 = vmatprep.mubr.msk.f32.mxu0 %vm12661_vm0, %v14639_v62 }
 0x67c   :  { %11893 = vmatpush3.msra.mxu1 %v14291_v55  ;;  %11894 = vmatprep.mubr.msk.f32.mxu1 %vm12661_vm0, %v14639_v62 }
 0x67d   :  { %11877 = vmatmul.mubr.msk.f32.vlgmr.msra.gmra.mxu0 %vm215_vm2, %v7426_v1  ;;  %11895 = vmatmul.mubr.msk.f32.vlgmr.msra.gmra.mxu1 %vm215_vm2, %v7426_v1 }
 0x67e   :  { %11897 = vmatprep.subr.mxu0 %v14639_v62  ;;  %11901 = vmatprep.mubr.msk.f32.mxu0 %vm12661_vm0, %v14639_v62 }
 0x67f   :  { %11898 = vmatpush3.msra.mxu0 %v14301_v18  ;;  %11915 = vmatprep.subr.mxu1 %v14639_v62 }
 0x680   :  { %11899 = vmatprep.subr.mxu0 %v14639_v62  ;;  %11916 = vmatpush3.msra.mxu1 %v14032_v16  ;;  %v7574_v16 = vpop.f32.mrf.mxu1 }
 0x681   :  { %11900 = vmatpush3.msra.mxu0 %v14307_v17  ;;  %11917 = vmatprep.subr.mxu1 %v14639_v62 }
 0x682   :  { %11902 = vmatmul.mubr.msk.f32.vlgmr.msra.gmra.mxu0 %vm289_vm1, %v14188_v30  ;;  %11918 = vmatpush3.msra.mxu1 %v14039_v32  ;;  %v11777_v32 = vpop.f32.mrf.mxu1 }
 0x683   :  { %11904 = vmatprep.subr.mxu0 %v14639_v62  ;;  %11919 = vmatprep.mubr.msk.f32.mxu1 %vm12661_vm0, %v14639_v62 }
 0x684   :  { %11922 = vmatprep.subr.mxu1 %v14639_v62  ;;  %11905 = vmatpush3.msra.mxu0 %v14046_v33  ;;  %v14328_v33 = vld [vmem:[#allocation2 + $0x38] sm:$0xff] }
 0x685   :  { %11906 = vmatprep.subr.mxu0 %v14639_v62  ;;  %11912 = vmatprep.mubr.msk.f32.mxu0 %vm12661_vm0, %v14639_v62 }
 0x686   :  { %11907 = vmatpush3.msra.mxu0 %v14052_v40  ;;  %11920 = vmatmul.mubr.msk.f32.vlgmr.msra.gmra.mxu1 %vm289_vm1, %v14328_v33 }
 0x687   :  { %11908 = vmatprep.subr.mxu0 %v14639_v62  ;;  %11923 = vmatpush3.msra.mxu1 %v14068_v47 }
 0x688   :  { %11909 = vmatpush3.msra.mxu0 %v14056_v41  ;;  %11930 = vmatprep.mubr.msk.f32.mxu1 %vm12661_vm0, %v14639_v62 }
 0x689   :  { %11910 = vmatprep.subr.mxu0 %v14639_v62  ;;  %11924 = vmatprep.subr.mxu1 %v14639_v62 }
 0x68a   :  { %11911 = vmatpush3.msra.mxu0 %v14060_v42  ;;  %11925 = vmatpush3.msra.mxu1 %v14074_v53 }
 0x68b   :  { %11933 = vmatprep.subr.mxu0 %v14639_v62  ;;  %11926 = vmatprep.subr.mxu1 %v14639_v62 }
 0x68c   :  { %11927 = vmatpush3.msra.mxu1 %v14078_v51 }
 0x68d   :  { %11928 = vmatprep.subr.mxu1 %v14639_v62 }
 0x68e   :  { %11929 = vmatpush3.msra.mxu1 %v14082_v3 }
 0x68f   :  { %11951 = vmatprep.subr.mxu1 %v14639_v62 }
 0x70e   :  { %v7501_v40 = vpop.f32.mrf.mxu0  ;;  %v7651_v41 = vpop.f32.mrf.mxu1 }
 0x70f   :  { %v7575_v42 = vadd.f32 %v7574_v16, %v7501_v40 }
 0x710   :  { %v11770_v47 = vpop.f32.mrf.mxu0  ;;  %v11788_v50 = vpop.f32.mrf.mxu1 }
 0x711   :  { %v7578_v49 = vadd.f32 %v14342_v37, %v7575_v42 }
 0x713   :  { %v10313_v53 = vmul.f32 -1.442695, %v7578_v49  ;;  %v14348_v49 = vld [vmem:[#allocation8 + $0x3] ss:$0 sm:$0xff] }
 0x714   :  { %v7721_v52 = vpop.f32.mrf.mxu0  ;;  %v7868_v54 = vpop.f32.mrf.mxu1  ;;  %14696 = vst [vmem:[#allocation23_spill] sm:$0xff] %v14348_v49 }
 0x715   :  { %12298 = vpow2.f32 %v10313_v53  ;;  %v7722_v51 = vadd.f32 %v7721_v52, %v7651_v41  ;;  %v14351_v52 = vld [vmem:[#allocation8 + $0x2] ss:$0 sm:$0xff] }
 0x716   :  { %v11795_v57 = vpop.f32.mrf.mxu0  ;;  %v11813_v29 = vpop.f32.mrf.mxu1  ;;  %14697 = vst [vmem:[#allocation24_spill] sm:$0xff] %v14351_v52 }
 0x717   :  { %v7725_v3 = vadd.f32 %v14345_v13, %v7722_v51  ;;  %v14364_v13 = vld [vmem:[#allocation8 + $0x7] ss:$0 sm:$0xff] }
 0x719   :  { %v10316_v14 = vmul.f32 -1.442695, %v7725_v3 }
 0x71b   :  { %12300 = vpow2.f32 %v10316_v14 }
 0x71d   :  { %v7798_v30 = vpop.f32.mrf.mxu0  ;;  %v7940_v6 = vpop.f32.mrf.mxu1 }
 0x71e   :  { %v7869_v32 = vadd.f32 %v7868_v54, %v7798_v30 }
 0x71f   :  { %v11806_v48 = vpop.f32.mrf.mxu0  ;;  %v11824_v1 = vpop.f32.mrf.mxu1 }
 0x720   :  { %v7872_v51 = vadd.f32 %v14351_v52, %v7869_v32 }
 0x722   :  { %v12299_v16 = vpop.eup %12298  ;;  %v8010_v40 = vpop.f32.mrf.mxu0 }
 0x723   :  { %v8011_v42 = vadd.f32 %v8010_v40, %v7940_v6  ;;  %v7582_v47 = vadd.f32 1.0, %v12299_v16  ;;  %v14354_v16 = vld [vmem:[#allocation8 + $0x4] ss:$0 sm:$0xff] }
 0x724   :  { %v11831_v50 = vpop.f32.mrf.mxu0  ;;  %14698 = vst [vmem:[#allocation25_spill] sm:$0xff] %v14354_v16 }
 0x725   :  { %v8014_v41 = vadd.f32 %v14348_v49, %v8011_v42  ;;  %v8169_v53 = vpop.f32.mrf.mxu1  ;;  %12302 = vrcp.f32 %v7582_v47 }
 0x727   :  { %v10321_v57 = vmul.f32 -1.442695, %v8014_v41  ;;  %v11849_v29 = vpop.f32.mrf.mxu1 }
 0x728   :  { %v12301_v3 = vpop.eup %12300 }
 0x729   :  { %v7729_v14 = vadd.f32 1.0, %v12301_v3  ;;  %12304 = vpow2.f32 %v10321_v57 }
 0x72a   :  { %12306 = vtanh.f32 %v7872_v51 }
 0x72b   :  { %12308 = vrcp.f32 %v7729_v14  ;;  %v14357_v14 = vld [vmem:[#allocation8 + $0x5] ss:$0 sm:$0xff] }
 0x72c   :  { %14699 = vst [vmem:[#allocation29_spill] sm:$0xff] %v14357_v14 }
 0x72e   :  { %v8096_v54 = vpop.f32.mrf.mxu0  ;;  %v8246_v30 = vpop.f32.mrf.mxu1 }
 0x72f   :  { %v8170_v6 = vadd.f32 %v8169_v53, %v8096_v54 }
 0x730   :  { %v11842_v48 = vpop.f32.mrf.mxu0  ;;  %v11860_v1 = vpop.f32.mrf.mxu1 }
 0x731   :  { %v8173_v40 = vadd.f32 %v14354_v16, %v8170_v6 }
 0x732   :  { %v12303_v41 = vpop.eup %12302 }
 0x733   :  { %v10324_v42 = vmul.f32 -1.442695, %v8173_v40 }
 0x734   :  { %v8316_v50 = vpop.f32.mrf.mxu0  ;;  %v8463_v32 = vpop.f32.mrf.mxu1 }
 0x735   :  { %12310 = vpow2.f32 %v10324_v42  ;;  %v8317_v29 = vadd.f32 %v8316_v50, %v8246_v30 }
 0x736   :  { %v12305_v47 = vpop.eup %12304  ;;  %v11867_v3 = vpop.f32.mrf.mxu0 }
 0x737   :  { %v11885_v57 = vpop.f32.mrf.mxu1  ;;  %v12307_v51 = vpop.eup %12306  ;;  %v8320_v53 = vadd.f32 %v14357_v14, %v8317_v29  ;;  %v8018_v48 = vadd.f32 1.0, %v12305_v47 }
 0x738   :  { %v12309_v54 = vpop.eup %12308  ;;  %v8022_v52 = vmul.f32 %v12307_v51, %v12303_v41 }
 0x739   :  { %v8021_v1 = vmul.f32 %v12309_v54, %v14093_v60  ;;  %v10327_v6 = vmul.f32 -1.442695, %v8320_v53 }
 0x73b   :  { %v14361_v40 = vadd.f32 %v8022_v52, %v8021_v1  ;;  %12312 = vpow2.f32 %v10327_v6  ;;  %v14367_v52 = vld [vmem:[#allocation8 + $0x6] ss:$0 sm:$0xff] }
 0x73c   :  { %12314 = vrcp.f32 %v8018_v48 }
 0x73d   :  { %12316 = vtanh.f32 %v14361_v40  ;;  %v8393_v30 = vpop.f32.mrf.mxu0  ;;  %v8535_v42 = vpop.f32.mrf.mxu1 }
 0x73e   :  { %v8464_v16 = vadd.f32 %v8463_v32, %v8393_v30 }
 0x73f   :  { %v11878_v50 = vpop.f32.mrf.mxu0  ;;  %v11896_v3 = vpop.f32.mrf.mxu1 }
 0x740   :  { %v8467_v41 = vadd.f32 %v14367_v52, %v8464_v16  ;;  %v14701_v50 = vld [vmem:[#allocation23_spill] sm:$0xff] }
 0x742   :  { %v12311_v57 = vpop.eup %12310  ;;  %v8605_v49 = vpop.f32.mrf.mxu0 }
 0x743   :  { %v8606_v29 = vadd.f32 %v8605_v49, %v8535_v42  ;;  %v8177_v14 = vadd.f32 1.0, %v12311_v57 }
 0x744   :  { %v11903_v47 = vpop.f32.mrf.mxu0 }
 0x745   :  { %v8609_v60 = vadd.f32 %v14364_v13, %v8606_v29  ;;  %12318 = vrcp.f32 %v8177_v14  ;;  %v14702_v29 = vld [vmem:[#allocation24_spill] sm:$0xff] }
 0x747   :  { %v10332_v51 = vmul.f32 -1.442695, %v8609_v60 }
 0x748   :  { %v12313_v53 = vpop.eup %12312 }
 0x749   :  { %v12315_v54 = vpop.eup %12314  ;;  %v8324_v48 = vadd.f32 1.0, %v12313_v53  ;;  %12320 = vpow2.f32 %v10332_v51 }
 0x74a   :  { %v12317_v1 = vpop.eup %12316  ;;  %12322 = vtanh.f32 %v8467_v41 }
 0x74b   :  { %12324 = vrcp.f32 %v8324_v48  ;;  %v8025_v49 = vmul.f32 %v12317_v1, %v12315_v54 }
 0x74d   :  { %10333 = vst.msk [vmem:[%s14574_s8 + $0x30] sm:$0xff] %vm215_vm2, %v8025_v49  ;;  %11913 = vmatmul.mubr.msk.f32.vlgmr.msra.gmra.mxu0 %vm215_vm2, %v8025_v49  ;;  %11931 = vmatmul.mubr.msk.f32.vlgmr.msra.gmra.mxu1 %vm215_vm2, %v8025_v49 }
 0x74e   :  { %11934 = vmatpush3.msra.mxu0 %v14104_v0  ;;  %11952 = vmatpush3.msra.mxu1 %v14107_v35 }
 0x74f   :  { %11935 = vmatprep.subr.mxu0 %v14639_v62  ;;  %11953 = vmatprep.subr.mxu1 %v14639_v62 }
 0x750   :  { %11936 = vmatpush3.msra.mxu0 %v14112_v39  ;;  %11954 = vmatpush3.msra.mxu1 %v14115_v10 }
 0x751   :  { %11937 = vmatprep.mubr.msk.f32.mxu0 %vm12661_vm0, %v14639_v62  ;;  %11940 = vmatprep.subr.mxu0 %v14639_v62 }
 0x752   :  { %11955 = vmatprep.mubr.msk.f32.mxu1 %vm12661_vm0, %v14639_v62  ;;  %11958 = vmatprep.subr.mxu1 %v14639_v62  ;;  %v12319_v0 = vpop.eup %12318 }
 0x753   :  { %11938 = vmatmul.mubr.msk.f32.vlgmr.msra.gmra.mxu0 %vm289_vm1, %v14328_v33  ;;  %11956 = vmatmul.mubr.msk.f32.vlgmr.msra.gmra.mxu1 %vm289_vm1, %v14328_v33 }
 0x754   :  { %11941 = vmatpush3.msra.mxu0 %v14128_v38  ;;  %11959 = vmatpush3.msra.mxu1 %v14131_v22 }
 0x755   :  { %11942 = vmatprep.subr.mxu0 %v14639_v62  ;;  %11960 = vmatprep.subr.mxu1 %v14639_v62 }
 0x756   :  { %v12321_v35 = vpop.eup %12320  ;;  %11943 = vmatpush3.msra.mxu0 %v14136_v34  ;;  %11961 = vmatpush3.msra.mxu1 %v14139_v63  ;;  %v14428_v63 = vld [vmem:[#allocation2] sm:$0xff] }
 0x757   :  { %v12323_v39 = vpop.eup %12322  ;;  %11944 = vmatprep.subr.mxu0 %v14639_v62  ;;  %11962 = vmatprep.subr.mxu1 %v14639_v62  ;;  %v8613_v16 = vadd.f32 1.0, %v12321_v35  ;;  %v14703_v35 = vld [vmem:[#allocation25_spill] sm:$0xff] }
 0x758   :  { %v12325_v10 = vpop.eup %12324  ;;  %11945 = vmatpush3.msra.mxu0 %v14144_v4  ;;  %11963 = vmatpush3.msra.mxu1 %v14147_v56  ;;  %v8617_v22 = vmul.f32 %v12323_v39, %v12319_v0 }
 0x759   :  { %v8616_v38 = vmul.f32 %v12325_v10, %v14158_v21  ;;  %11946 = vmatprep.subr.mxu0 %v14639_v62  ;;  %11964 = vmatprep.subr.mxu1 %v14639_v62  ;;  %12326 = vrcp.f32 %v8613_v16  ;;  %v8768_v21 = vpop.f32.mrf.mxu1 }
 0x75a   :  { %11947 = vmatpush3.msra.mxu0 %v14153_v19  ;;  %11948 = vmatprep.mubr.msk.f32.mxu0 %vm12661_vm0, %v14639_v62 }
 0x75b   :  { %v14408_v34 = vadd.f32 %v8617_v22, %v8616_v38  ;;  %11965 = vmatpush3.msra.mxu1 %v14160_v23  ;;  %11966 = vmatprep.mubr.msk.f32.mxu1 %vm12661_vm0, %v14639_v62  ;;  %v11921_v23 = vpop.f32.mrf.mxu1 }
 0x75c   :  { %11949 = vmatmul.mubr.msk.f32.vlgmr.msra.gmra.mxu0 %vm215_vm2, %v8025_v49  ;;  %11967 = vmatmul.mubr.msk.f32.vlgmr.msra.gmra.mxu1 %vm215_vm2, %v8025_v49  ;;  %v14704_v23 = vld [vmem:[#allocation29_spill] sm:$0xff] }
 0x75d   :  { %12328 = vtanh.f32 %v14408_v34  ;;  %11969 = vmatprep.subr.mxu0 %v14639_v62  ;;  %11987 = vmatprep.subr.mxu1 %v14639_v62 }
 0x75e   :  { %11970 = vmatpush3.msra.mxu0 %v14170_v7  ;;  %11988 = vmatpush3.msra.mxu1 %v14173_v25  ;;  %v197_v7 = vld [vmem:[#allocation10 + $0x18] sm:$0xff]  ;;  %v196_v25 = vld [vmem:[#allocation10 + $0x10] sm:$0xff] }
 0x75f   :  { %11971 = vmatprep.subr.mxu0 %v14639_v62  ;;  %11989 = vmatprep.subr.mxu1 %v14639_v62 }
 0x760   :  { %11972 = vmatpush3.msra.mxu0 %v14178_v43  ;;  %11973 = vmatprep.mubr.msk.f32.mxu0 %vm12661_vm0, %v14639_v62  ;;  %v195_v43 = vld [vmem:[#allocation10 + $0x8] sm:$0xff] }
 0x761   :  { %11990 = vmatpush3.msra.mxu1 %v14183_v44  ;;  %11974 = vmatmul.mubr.msk.f32.vlgmr.msra.gmra.mxu0 %vm289_vm1, %v14328_v33  ;;  %v194_v44 = vld [vmem:[#allocation10] sm:$0xff] }
 0x762   :  { %11976 = vmatprep.subr.mxu0 %v14639_v62  ;;  %11991 = vmatprep.mubr.msk.f32.mxu1 %vm12661_vm0, %v14639_v62 }
 0x763   :  { %11994 = vmatprep.subr.mxu1 %v14639_v62  ;;  %11977 = vmatpush3.msra.mxu0 %v14194_v58  ;;  %v202_v58 = vld [vmem:[#allocation10 + $0x38] sm:$0xff] }
 0x764   :  { %11992 = vmatmul.mubr.msk.f32.vlgmr.msra.gmra.mxu1 %vm289_vm1, %v14428_v63  ;;  %11978 = vmatprep.subr.mxu0 %v14639_v62 }
 0x765   :  { %11995 = vmatpush3.msra.mxu1 %v14200_v2  ;;  %11979 = vmatpush3.msra.mxu0 %v14203_v46  ;;  %v201_v2 = vld [vmem:[#allocation10 + $0x30] sm:$0xff]  ;;  %v200_v46 = vld [vmem:[#allocation10 + $0x28] sm:$0xff] }
 0x766   :  { %11996 = vmatprep.subr.mxu1 %v14639_v62  ;;  %11980 = vmatprep.subr.mxu0 %v14639_v62  ;;  %v12327_v4 = vpop.eup %12326 }
 0x767   :  { %11997 = vmatpush3.msra.mxu1 %v14208_v12  ;;  %11981 = vmatpush3.msra.mxu0 %v14211_v59  ;;  %v199_v12 = vld [vmem:[#allocation10 + $0x20] sm:$0xff] }
 0x768   :  { %11998 = vmatprep.subr.mxu1 %v14639_v62  ;;  %11982 = vmatprep.subr.mxu0 %v14639_v62 }
 0x769   :  { %11999 = vmatpush3.msra.mxu1 %v14216_v9  ;;  %11983 = vmatpush3.msra.mxu0 %v14219_v5 }
 0x76a   :  { %v12329_v56 = vpop.eup %12328  ;;  %12000 = vmatprep.subr.mxu1 %v14639_v62  ;;  %11984 = vmatprep.mubr.msk.f32.mxu0 %vm12661_vm0, %v14639_v62 }
 0x76b   :  { %12001 = vmatpush3.msra.mxu1 %v14225_v26  ;;  %12002 = vmatprep.mubr.msk.f32.mxu1 %vm12661_vm0, %v14639_v62  ;;  %v8620_v19 = vmul.f32 %v12329_v56, %v12327_v4 }
 0x76c   :  { %12005 = vmatprep.subr.mxu0 %v14639_v62  ;;  %12023 = vmatprep.subr.mxu1 %v14639_v62 }
 0x76d   :  { %10334 = vst.msk [vmem:[%s14575_s9 + $0x8] sm:$0xff] %vm215_vm2, %v8620_v19  ;;  %11985 = vmatmul.mubr.msk.f32.vlgmr.msra.gmra.mxu0 %vm215_vm2, %v8620_v19  ;;  %12003 = vmatmul.mubr.msk.f32.vlgmr.msra.gmra.mxu1 %vm215_vm2, %v8620_v19 }
 0x76e   :  { %12006 = vmatpush3.msra.mxu0 %v14238_v61  ;;  %12024 = vmatpush3.msra.mxu1 %v14241_v36 }
 0x76f   :  { %12007 = vmatprep.subr.mxu0 %v14639_v62  ;;  %12025 = vmatprep.subr.mxu1 %v14639_v62 }
 0x770   :  { %12008 = vmatpush3.msra.mxu0 %v14246_v27  ;;  %12026 = vmatpush3.msra.mxu1 %v14249_v20 }
 0x771   :  { %12009 = vmatprep.mubr.msk.f32.mxu0 %vm12661_vm0, %v14639_v62  ;;  %12012 = vmatprep.subr.mxu0 %v14639_v62 }
 0x772   :  { %12027 = vmatprep.mubr.msk.f32.mxu1 %vm12661_vm0, %v14639_v62  ;;  %12030 = vmatprep.subr.mxu1 %v14639_v62 }
 0x773   :  { %12010 = vmatmul.mubr.msk.f32.vlgmr.msra.gmra.mxu0 %vm289_vm1, %v14428_v63  ;;  %12028 = vmatmul.mubr.msk.f32.vlgmr.msra.gmra.mxu1 %vm289_vm1, %v14428_v63 }
 0x774   :  { %12013 = vmatpush3.msra.mxu0 %v14262_v11  ;;  %12031 = vmatpush3.msra.mxu1 %v14265_v15 }
 0x775   :  { %12014 = vmatprep.subr.mxu0 %v14639_v62  ;;  %12032 = vmatprep.subr.mxu1 %v14639_v62 }
 0x776   :  { %12015 = vmatpush3.msra.mxu0 %v14270_v28  ;;  %12033 = vmatpush3.msra.mxu1 %v14273_v45 }
 0x777   :  { %12016 = vmatprep.subr.mxu0 %v14639_v62  ;;  %12034 = vmatprep.subr.mxu1 %v14639_v62 }
 0x778   :  { %12017 = vmatpush3.msra.mxu0 %v14278_v31  ;;  %12035 = vmatpush3.msra.mxu1 %v14281_v24  ;;  %v14700_v31 = vld [vmem:[#allocation22_spill] sm:$0xff] }
 0x779   :  { %12018 = vmatprep.subr.mxu0 %v14639_v62  ;;  %12036 = vmatprep.subr.mxu1 %v14639_v62 }
 0x77a   :  { %12019 = vmatpush3.msra.mxu0 %v14286_v8  ;;  %12020 = vmatprep.mubr.msk.f32.mxu0 %vm12661_vm0, %v14639_v62 }
 0x77b   :  { %12037 = vmatpush3.msra.mxu1 %v14291_v55  ;;  %12038 = vmatprep.mubr.msk.f32.mxu1 %vm12661_vm0, %v14639_v62 }
 0x77c   :  { %12021 = vmatmul.mubr.msk.f32.vlgmr.msra.gmra.mxu0 %vm215_vm2, %v8620_v19  ;;  %12039 = vmatmul.mubr.msk.f32.vlgmr.msra.gmra.mxu1 %vm215_vm2, %v8620_v19 }
 0x77d   :  { %12041 = vmatprep.subr.mxu0 %v14639_v62  ;;  %12045 = vmatprep.mubr.msk.f32.mxu0 %vm12661_vm0, %v14639_v62 }
 0x77e   :  { %12042 = vmatpush3.msra.mxu0 %v14301_v18  ;;  %12059 = vmatprep.subr.mxu1 %v14639_v62 }
 0x77f   :  { %12043 = vmatprep.subr.mxu0 %v14639_v62  ;;  %12067 = vmatprep.mubr.msk.f32.mxu1 %vm12661_vm0, %v14639_v62 }
 0x780   :  { %12044 = vmatpush3.msra.mxu0 %v14307_v17  ;;  %12060 = vmatpush3.msra.mxu1 %v197_v7 }
 0x781   :  { %12046 = vmatmul.mubr.msk.f32.vlgmr.msra.gmra.mxu0 %vm289_vm1, %v14428_v63  ;;  %12048 = vmatprep.subr.mxu0 %v14639_v62 }
 0x782   :  { %12056 = vmatprep.mubr.msk.f32.mxu0 %vm12661_vm0, %v14639_v62  ;;  %12061 = vmatprep.subr.mxu1 %v14639_v62 }
 0x783   :  { %12062 = vmatpush3.msra.mxu1 %v196_v25  ;;  %12049 = vmatpush3.msra.mxu0 %v202_v58 }
 0x784   :  { %12063 = vmatprep.subr.mxu1 %v14639_v62  ;;  %12050 = vmatprep.subr.mxu0 %v14639_v62 }
 0x785   :  { %12064 = vmatpush3.msra.mxu1 %v195_v43  ;;  %12051 = vmatpush3.msra.mxu0 %v201_v2 }
 0x786   :  { %12065 = vmatprep.subr.mxu1 %v14639_v62  ;;  %12052 = vmatprep.subr.mxu0 %v14639_v62 }
 0x787   :  { %12066 = vmatpush3.msra.mxu1 %v194_v44  ;;  %12053 = vmatpush3.msra.mxu0 %v200_v46 }
 0x788   :  { %12081 = vmatprep.subr.mxu1 %v14639_v62  ;;  %12054 = vmatprep.subr.mxu0 %v14639_v62 }
 0x789   :  { %12055 = vmatpush3.msra.mxu0 %v199_v12 }
 0x78a   :  { %12070 = vmatprep.subr.mxu0 %v14639_v62 }
 0x80d   :  { %v8695_v59 = vpop.f32.mrf.mxu0  ;;  %v8845_v9 = vpop.f32.mrf.mxu1 }
 0x80e   :  { %v8769_v5 = vadd.f32 %v8768_v21, %v8695_v59 }
 0x80f   :  { %v11914_v26 = vpop.f32.mrf.mxu0  ;;  %v11932_v61 = vpop.f32.mrf.mxu1 }
 0x810   :  { %v8772_v36 = vadd.f32 %v14342_v37, %v8769_v5 }
 0x812   :  { %v10337_v27 = vmul.f32 -1.442695, %v8772_v36 }
 0x813   :  { %v8915_v20 = vpop.f32.mrf.mxu0  ;;  %v9062_v11 = vpop.f32.mrf.mxu1 }
 0x814   :  { %12330 = vpow2.f32 %v10337_v27  ;;  %v8916_v15 = vadd.f32 %v8915_v20, %v8845_v9 }
 0x815   :  { %v11939_v28 = vpop.f32.mrf.mxu0  ;;  %v11957_v45 = vpop.f32.mrf.mxu1 }
 0x816   :  { %v8919_v24 = vadd.f32 %v14700_v31, %v8916_v15 }
 0x818   :  { %v10340_v8 = vmul.f32 -1.442695, %v8919_v24 }
 0x81a   :  { %12332 = vpow2.f32 %v10340_v8 }
 0x81c   :  { %v8992_v55 = vpop.f32.mrf.mxu0  ;;  %v9134_v18 = vpop.f32.mrf.mxu1 }
 0x81d   :  { %v9063_v14 = vadd.f32 %v9062_v11, %v8992_v55 }
 0x81e   :  { %v11950_v17 = vpop.f32.mrf.mxu0  ;;  %v11968_v33 = vpop.f32.mrf.mxu1 }
 0x81f   :  { %v9066_v47 = vadd.f32 %v14702_v29, %v9063_v14  ;;  %v203_v17 = vld [vmem:[#allocation11] sm:$0xff] }
 0x821   :  { %v12331_v32 = vpop.eup %12330  ;;  %v9204_v6 = vpop.f32.mrf.mxu0 }
 0x822   :  { %v9205_v30 = vadd.f32 %v9204_v6, %v9134_v18  ;;  %v8776_v37 = vadd.f32 1.0, %v12331_v32  ;;  %v206_v18 = vld [vmem:[#allocation11 + $0x18] sm:$0xff] }
 0x823   :  { %v11975_v42 = vpop.f32.mrf.mxu0 }
 0x824   :  { %v9208_v3 = vadd.f32 %v14701_v50, %v9205_v30  ;;  %v9363_v57 = vpop.f32.mrf.mxu1  ;;  %12334 = vrcp.f32 %v8776_v37 }
 0x826   :  { %v10345_v60 = vmul.f32 -1.442695, %v9208_v3  ;;  %v11993_v41 = vpop.f32.mrf.mxu1 }
 0x827   :  { %v12333_v51 = vpop.eup %12332  ;;  %v208_v41 = vld [vmem:[#allocation11 + $0x20] sm:$0xff] }
 0x828   :  { %v8923_v53 = vadd.f32 1.0, %v12333_v51  ;;  %12336 = vpow2.f32 %v10345_v60  ;;  %v210_v60 = vld [vmem:[#allocation11 + $0x30] sm:$0xff] }
 0x829   :  { %12338 = vtanh.f32 %v9066_v47  ;;  %v211_v47 = vld [vmem:[#allocation11 + $0x38] sm:$0xff] }
 0x82a   :  { %12340 = vrcp.f32 %v8923_v53 }
 0x82d   :  { %v9290_v54 = vpop.f32.mrf.mxu0  ;;  %v9440_v48 = vpop.f32.mrf.mxu1 }
 0x82e   :  { %v9364_v1 = vadd.f32 %v9363_v57, %v9290_v54 }
 0x82f   :  { %v11986_v49 = vpop.f32.mrf.mxu0  ;;  %v12004_v0 = vpop.f32.mrf.mxu1 }
 0x830   :  { %v9367_v39 = vadd.f32 %v14703_v35, %v9364_v1  ;;  %v10360_v1 = vld [vmem:[%s14571_s5] ss:$0 sm:$0xff]  ;;  %s12598_s5 = scalar_lea.vmem %s10139_s16, 128 }
 0x831   :  { %v12335_v22 = vpop.eup %12334  ;;  %p12599_p2 = scmp.ne.s32.totalorder %s10139_s16, %s12598_s5  ;;  %p12604_p4 = scmp.lt.s32.totalorder %s12598_s5, %s12598_s5 }
 0x832   :  { %v10348_v10 = vmul.f32 -1.442695, %v9367_v39 }
 0x833   :  { %v9510_v16 = vpop.f32.mrf.mxu0  ;;  %v9657_v38 = vpop.f32.mrf.mxu1  ;;  %p12605_p5 = por %p12604_p4, %p12603_p3 }
 0x834   :  { %12342 = vpow2.f32 %v10348_v10  ;;  %v9511_v63 = vadd.f32 %v9510_v16, %v9440_v48 }
 0x835   :  { %v12337_v4 = vpop.eup %12336  ;;  %v12011_v56 = vpop.f32.mrf.mxu0  ;;  %p12606_p6 = pnand %p12605_p5, %p12599_p2 }
 0x836   :  { %v12029_v19 = vpop.f32.mrf.mxu1  ;;  %v12339_v21 = vpop.eup %12338  ;;  %v9514_v7 = vadd.f32 %v14704_v23, %v9511_v63  ;;  %v9212_v43 = vadd.f32 1.0, %v12337_v4 }
 0x837   :  { %v12341_v25 = vpop.eup %12340  ;;  %v9216_v58 = vmul.f32 %v12339_v21, %v12335_v22 }
 0x838   :  { %v9215_v44 = vmul.f32 %v12341_v25, %v14361_v40  ;;  %v10351_v2 = vmul.f32 -1.442695, %v9514_v7 }
 0x83a   :  { %v9217_v46 = vadd.f32 %v9216_v58, %v9215_v44  ;;  %12344 = vpow2.f32 %v10351_v2 }
 0x83b   :  { %12346 = vrcp.f32 %v9212_v43 }
 0x83c   :  { %12348 = vtanh.f32 %v9217_v46  ;;  %v9587_v12 = vpop.f32.mrf.mxu0  ;;  %v9729_v59 = vpop.f32.mrf.mxu1 }
 0x83d   :  { %v9658_v61 = vadd.f32 %v9657_v38, %v9587_v12 }
 0x83e   :  { %v12022_v9 = vpop.f32.mrf.mxu0  ;;  %v12040_v5 = vpop.f32.mrf.mxu1 }
 0x83f   :  { %v9661_v40 = vadd.f32 %v14367_v52, %v9658_v61  ;;  %v204_v52 = vld [vmem:[#allocation11 + $0x8] sm:$0xff] }
 0x841   :  { %v12343_v26 = vpop.eup %12342  ;;  %v9799_v36 = vpop.f32.mrf.mxu0 }
 0x842   :  { %v9800_v27 = vadd.f32 %v9799_v36, %v9729_v59  ;;  %v9371_v20 = vadd.f32 1.0, %v12343_v26 }
 0x843   :  { %v12047_v11 = vpop.f32.mrf.mxu0 }
 0x844   :  { %v9803_v15 = vadd.f32 %v14364_v13, %v9800_v27  ;;  %12350 = vrcp.f32 %v9371_v20  ;;  %v205_v13 = vld [vmem:[#allocation11 + $0x10] sm:$0xff] }
 0x846   :  { %v10356_v28 = vmul.f32 -1.442695, %v9803_v15 }
 0x847   :  { %v12345_v45 = vpop.eup %12344 }
 0x848   :  { %v12347_v31 = vpop.eup %12346  ;;  %v9518_v24 = vadd.f32 1.0, %v12345_v45  ;;  %12352 = vpow2.f32 %v10356_v28 }
 0x849   :  { %v12349_v8 = vpop.eup %12348  ;;  %12354 = vtanh.f32 %v9661_v40 }
 0x84a   :  { %12356 = vrcp.f32 %v9518_v24  ;;  %v9219_v55 = vmul.f32 %v12349_v8, %v12347_v31 }
 0x84c   :  { %10357 = vst.msk [vmem:[%s14574_s8 + $0x38] sm:$0xff] %vm215_vm2, %v9219_v55  ;;  %12068 = vmatmul.mubr.msk.f32.vlgmr.msra.gmra.mxu1 %vm215_vm2, %v9219_v55 }
 0x84d   :  { %12082 = vmatpush3.msra.mxu1 %v206_v18  ;;  %12089 = vmatprep.mubr.msk.f32.mxu1 %vm12661_vm0, %v14639_v62 }
 0x84e   :  { %12083 = vmatprep.subr.mxu1 %v14639_v62 }
 0x84f   :  { %12084 = vmatpush3.msra.mxu1 %v205_v13 }
 0x850   :  { %12085 = vmatprep.subr.mxu1 %v14639_v62 }
 0x851   :  { %12086 = vmatpush3.msra.mxu1 %v204_v52  ;;  %v12351_v33 = vpop.eup %12350 }
 0x852   :  { %12087 = vmatprep.subr.mxu1 %v14639_v62 }
 0x853   :  { %12088 = vmatpush3.msra.mxu1 %v203_v17 }
 0x854   :  { %12090 = vmatmul.mubr.msk.f32.vlgmr.msra.gmra.mxu1 %vm215_vm2, %v9217_v46 }
 0x855   :  { %v12353_v32 = vpop.eup %12352 }
 0x856   :  { %v12355_v14 = vpop.eup %12354  ;;  %v9807_v30 = vadd.f32 1.0, %v12353_v32 }
 0x857   :  { %v12357_v6 = vpop.eup %12356  ;;  %v9811_v42 = vmul.f32 %v12355_v14, %v12351_v33 }
 0x858   :  { %v9810_v37 = vmul.f32 %v12357_v6, %v14408_v34  ;;  %12358 = vrcp.f32 %v9807_v30  ;;  %v209_v34 = vld [vmem:[#allocation11 + $0x28] sm:$0xff] }
 0x85a   :  { %v9812_v50 = vadd.f32 %v9811_v42, %v9810_v37 }
 0x85c   :  { %12360 = vtanh.f32 %v9812_v50 }
 0x865   :  { %v12359_v3 = vpop.eup %12358 }
 0x869   :  { %v12361_v57 = vpop.eup %12360 }
 0x86a   :  { %v9814_v29 = vmul.f32 %v12361_v57, %v12359_v3 }
 0x86c   :  { %9817 = vst.msk [vmem:[%s14575_s9] sm:$0xff] %vm215_vm2, %v9814_v29  ;;  %12057 = vmatmul.mubr.msk.f32.vlgmr.msra.gmra.mxu0 %vm215_vm2, %v9814_v29 }
 0x86d   :  { %12071 = vmatpush3.msra.mxu0 %v211_v47  ;;  %12078 = vmatprep.mubr.msk.f32.mxu0 %vm12661_vm0, %v14639_v62 }
 0x86e   :  { %12072 = vmatprep.subr.mxu0 %v14639_v62 }
 0x86f   :  { %12073 = vmatpush3.msra.mxu0 %v210_v60 }
 0x870   :  { %12074 = vmatprep.subr.mxu0 %v14639_v62 }
 0x871   :  { %12075 = vmatpush3.msra.mxu0 %v209_v34 }
 0x872   :  { %12076 = vmatprep.subr.mxu0 %v14639_v62  ;;  %v10363_v62 = vld [vmem:[%s14573_s7] ss:$0 sm:$0xff] }
 0x873   :  { %12077 = vmatpush3.msra.mxu0 %v208_v41 }
 0x874   :  { %12079 = vmatmul.mubr.msk.f32.vlgmr.msra.gmra.mxu0 %vm215_vm2, %v9812_v50 }
 0x90c   :  { %v9960_v51 = vpop.f32.mrf.mxu1 }
 0x90e   :  { %v12069_v53 = vpop.f32.mrf.mxu1 }
 0x914   :  { %v10115_v54 = vpop.f32.mrf.mxu1 }
 0x916   :  { %v12091_v48 = vpop.f32.mrf.mxu1 }
 0x92c   :  { %v9887_v49 = vpop.f32.mrf.mxu0 }
 0x92d   :  { %v9961_v0 = vadd.f32 %v9960_v51, %v9887_v49 }
 0x92e   :  { %v12058_v35 = vpop.f32.mrf.mxu0 }
 0x92f   :  { %v9970_v39 = vadd.f32 %v10360_v1, %v9961_v0 }
 0x931   :  { %12362 = vtanh.f32 %v9970_v39 }
 0x934   :  { %v10042_v10 = vpop.f32.mrf.mxu0 }
 0x935   :  { %v10116_v16 = vadd.f32 %v10115_v54, %v10042_v10 }
 0x936   :  { %v12080_v38 = vpop.f32.mrf.mxu0 }
 0x937   :  { %v10125_v22 = vadd.f32 %v10363_v62, %v10116_v16 }
 0x939   :  { %12364 = vtanh.f32 %v10125_v22 }
 0x93e   :  { %v12363_v63 = vpop.eup %12362 }
 0x93f   :  { %9972 = vst.msk [vmem:[#allocation13] sm:$0xff] %vm215_vm2, %v12363_v63 }
 0x940   :  { %12609 = shalt.err (!%p12606_p6)
}
 0x941   :  { %10141 = dma.vmem_to_hbm [thread:$0]  %s10139_s16, 128, %s14576_s10, [#allocation4]  }
 0x942   :  { %s12663_s3 = smov [#allocation14]  }
 0x943   :  { %s10148_s18 = sshll.u32 %s12663_s3, 4  ;;  %s10149_s18 = int_to_ptr.vmem [resolvable:$true] %s10148_s18 }
 0x944   :  { %s12618_s19 = scalar_lea.vmem %s10149_s18, 128  ;;  %p12623_p8 = scmp.lt.s32.totalorder %s10149_s18, %s10149_s18 }
 0x945   :  { %p12619_p7 = scmp.ne.s32.totalorder %s10149_s18, %s12618_s19  ;;  %p12624_p9 = scmp.lt.s32.totalorder %s12618_s19, %s12618_s19 }
 0x946   :  { %v12365_v4 = vpop.eup %12364 }
 0x947   :  { %10127 = vst.msk [vmem:[#allocation14] sm:$0xff] %vm215_vm2, %v12365_v4  ;;  %p12625_p10 = por %p12624_p9, %p12623_p8 }
 0x949   :  { %p12626_p11 = pnand %p12625_p10, %p12619_p7 }
 0x94b   :  { %12629 = shalt.err (!%p12626_p11)
}
 0x94c   :  { %10151 = dma.vmem_to_hbm [thread:$0]  %s10149_s18, 128, %s14577_s11, [#allocation15]  }
 0x94d   :  { %12646 = dma.done.wait [#allocation4], 128  }
 0x94e   :  { %12647 = vsyncadd [#allocation4], 4294967168 }
 0x94f   :  { %12648 = dma.done.wait [#allocation15], 128  }
 0x950   :  { %12649 = vsyncadd [#allocation15], 4294967168 }
 0x951   :  { %10162 = vsyncpa [#allocation3], 1 }
 0x952   :  { %10163 = vsyncpa [#allocation6], 1 }
 0x953   :  { %10164 = vsyncpa [#allocation9], 1 }
 0x954   :  { %10165 = vsyncpa [#allocation12], 1 }
 0x955   :  { %10166 = vsyncpa [#allocation4], 1 }
 0x956   :  { %10167 = vsyncpa [#allocation15], 1 }

</bundles_post_ra>
